<compile_context>
chip_gen: v7x
topology: tpu7x:2x2x1
jax: 0.10.0
libtpu: 0.0.40
codegen_flags: <defaults>
</compile_context>

<pallas_src>
import numpy as np
import jax
import jax.numpy as jnp
from jax.experimental import pallas as pl
from jax.experimental.pallas import tpu as pltpu

N_EMBD = 384
HIDDEN = 4 * N_EMBD          # 1536
TM = 128                     # rows per grid step (MXU-row dense, (8,128)-aligned)


# ---------------- fused FFN kernel ----------------
def _ffn_kernel(x_ref, w1_ref, b1_ref, w2_ref, b2_ref, o_ref):
    # Linear -> ReLU -> Linear  (Dropout = identity in eval mode)
    xb = x_ref[...].astype(jnp.bfloat16)
    h = jnp.dot(xb, w1_ref[...], preferred_element_type=jnp.float32) + b1_ref[...]
    h = jnp.maximum(h, 0.0)
    hb = h.astype(jnp.bfloat16)
    o_ref[...] = jnp.dot(hb, w2_ref[...], preferred_element_type=jnp.float32) + b2_ref[...]


def feed_forward(x, w1, b1, w2, b2):
    """x: (..., C) float32; w1: (C, 4C) bf16; b1: (1, 4C) f32; w2: (4C, C) bf16; b2: (1, C) f32."""
    orig_shape = x.shape
    C = orig_shape[-1]
    H = w1.shape[1]

    x2 = x.reshape(-1, C)                        # collapse (B, T) -> M rows
    M = x2.shape[0]
    Mp = pl.cdiv(M, TM) * TM
    if Mp != M:
        x2 = jnp.pad(x2, ((0, Mp - M), (0, 0)))  # pad rows to a multiple of TM

    out = pl.pallas_call(
        _ffn_kernel,
        out_shape=jax.ShapeDtypeStruct((Mp, C), jnp.float32),
        grid=(Mp // TM,),
        in_specs=[
            pl.BlockSpec((TM, C), lambda i: (i, 0)),   # activation tile (streams over rows)
            pl.BlockSpec((C, H), lambda i: (0, 0)),    # W1 (bf16), VMEM-resident
            pl.BlockSpec((1, H), lambda i: (0, 0)),    # b1
            pl.BlockSpec((H, C), lambda i: (0, 0)),    # W2 (bf16), VMEM-resident
            pl.BlockSpec((1, C), lambda i: (0, 0)),    # b2
        ],
        out_specs=pl.BlockSpec((TM, C), lambda i: (i, 0)),
        compiler_params=pltpu.CompilerParams(
            dimension_semantics=("parallel",),
            vmem_limit_bytes=32 * 1024 * 1024,
        ),
    )(x2, w1, b1, w2, b2)

    if Mp != M:
        out = out[:M]
    return out.reshape(orig_shape)


# ---------------- deterministic parameter init ----------------
def init_params(key):
    k1, k2 = jax.random.split(key)
    std = 0.02
    w1 = (jax.random.normal(k1, (N_EMBD, HIDDEN), jnp.float32) * std).astype(jnp.bfloat16)
    b1 = jnp.zeros((1, HIDDEN), jnp.float32)
    w2 = (jax.random.normal(k2, (HIDDEN, N_EMBD), jnp.float32) * std).astype(jnp.bfloat16)
    b2 = jnp.zeros((1, N_EMBD), jnp.float32)
    return w1, b1, w2, b2


# ---------------- pure-JAX reference (same precision policy as the kernel) ----------------
def ref_forward(x, w1, b1, w2, b2):
    xb = x.astype(jnp.bfloat16).astype(jnp.float32)
    h = jnp.maximum(xb @ w1.astype(jnp.float32) + b1, 0.0)
    hb = h.astype(jnp.bfloat16).astype(jnp.float32)
    return hb @ w2.astype(jnp.float32) + b2


if __name__ == "__main__":
    key = jax.random.PRNGKey(0)
    pkey, dkey = jax.random.split(key)
    w1, b1, w2, b2 = init_params(pkey)

    B, T = 2, 64                                  # B*T = 128 -> one full MXU-row tile
    x = jax.random.normal(dkey, (B, T, N_EMBD), jnp.float32)

    out = feed_forward(x, w1, b1, w2, b2)
    out = jax.block_until_ready(out)
    assert out.shape == (B, T, N_EMBD)
    assert bool(jnp.all(jnp.isfinite(out)))

    ref = jax.block_until_ready(ref_forward(x.reshape(-1, N_EMBD), w1, b1, w2, b2))
    np.testing.assert_allclose(
        np.asarray(out.reshape(-1, N_EMBD)), np.asarray(ref), rtol=1e-3, atol=1e-3)

    print("KERNEL_OK")
</pallas_src>

<mosaic_0001>
module attributes {stable_mosaic.version = 11 : i64} {
  func.func @_ffn_kernel(%arg0: i32, %arg1: memref<128x384xf32, #tpu.memory_space<vmem>>, %arg2: memref<384x1536xbf16, #tpu.memory_space<vmem>>, %arg3: memref<1x1536xf32, #tpu.memory_space<vmem>>, %arg4: memref<1536x384xbf16, #tpu.memory_space<vmem>>, %arg5: memref<1x384xf32, #tpu.memory_space<vmem>>, %arg6: memref<128x384xf32, #tpu.memory_space<vmem>>) attributes {dimension_semantics = [#tpu.dimension_semantics<parallel>], iteration_bounds = array<i64: 1>, scalar_prefetch = 0 : i64, scratch_operands = 0 : i64, tpu.core_type = #tpu.core_type<tc>, window_params = [{transform_indices = @transform_0, window_bounds = array<i64: 128, 384>}, {pipeline_mode = #tpu.pipeline_mode<synchronous>, transform_indices = @transform_1, window_bounds = array<i64: 384, 1536>}, {pipeline_mode = #tpu.pipeline_mode<synchronous>, transform_indices = @transform_2, window_bounds = array<i64: 1, 1536>}, {pipeline_mode = #tpu.pipeline_mode<synchronous>, transform_indices = @transform_3, window_bounds = array<i64: 1536, 384>}, {pipeline_mode = #tpu.pipeline_mode<synchronous>, transform_indices = @transform_4, window_bounds = array<i64: 1, 384>}, {transform_indices = @transform_5, window_bounds = array<i64: 128, 384>}]} {
    %c0 = arith.constant 0 : index
    %c0_0 = arith.constant 0 : index
    %0 = vector.load %arg1[%c0, %c0_0] : memref<128x384xf32, #tpu.memory_space<vmem>>, vector<128x384xf32>
    %1 = arith.truncf %0 : vector<128x384xf32> to vector<128x384xbf16>
    %c0_1 = arith.constant 0 : index
    %c0_2 = arith.constant 0 : index
    %2 = vector.load %arg2[%c0_1, %c0_2] : memref<384x1536xbf16, #tpu.memory_space<vmem>>, vector<384x1536xbf16>
    %cst = arith.constant dense<0.000000e+00> : vector<128x1536xf32>
    %3 = tpu.matmul %1, %2, %cst {dimension_numbers = #tpu.dot_dimension_numbers<[1], [0], [0], [1], [0, 0, 1, 1], [], []>} : vector<128x384xbf16>, vector<384x1536xbf16>, vector<128x1536xf32> -> vector<128x1536xf32>
    %c0_3 = arith.constant 0 : index
    %c0_4 = arith.constant 0 : index
    %4 = vector.load %arg3[%c0_3, %c0_4] : memref<1x1536xf32, #tpu.memory_space<vmem>>, vector<1x1536xf32>
    %5 = vector.broadcast %4 : vector<1x1536xf32> to vector<128x1536xf32>
    %6 = arith.addf %3, %5 : vector<128x1536xf32>
    %cst_5 = arith.constant 0.000000e+00 : f32
    %7 = vector.broadcast %cst_5 : f32 to vector<128x1536xf32>
    %8 = arith.maximumf %6, %7 : vector<128x1536xf32>
    %9 = arith.truncf %8 : vector<128x1536xf32> to vector<128x1536xbf16>
    %c0_6 = arith.constant 0 : index
    %c0_7 = arith.constant 0 : index
    %10 = vector.load %arg4[%c0_6, %c0_7] : memref<1536x384xbf16, #tpu.memory_space<vmem>>, vector<1536x384xbf16>
    %cst_8 = arith.constant dense<0.000000e+00> : vector<128x384xf32>
    %11 = tpu.matmul %9, %10, %cst_8 {dimension_numbers = #tpu.dot_dimension_numbers<[1], [0], [0], [1], [0, 0, 1, 1], [], []>} : vector<128x1536xbf16>, vector<1536x384xbf16>, vector<128x384xf32> -> vector<128x384xf32>
    %c0_9 = arith.constant 0 : index
    %c0_10 = arith.constant 0 : index
    %12 = vector.load %arg5[%c0_9, %c0_10] : memref<1x384xf32, #tpu.memory_space<vmem>>, vector<1x384xf32>
    %13 = vector.broadcast %12 : vector<1x384xf32> to vector<128x384xf32>
    %14 = arith.addf %11, %13 : vector<128x384xf32>
    %c0_11 = arith.constant 0 : index
    %c0_12 = arith.constant 0 : index
    %15 = vector.load %arg6[%c0_11, %c0_12] : memref<128x384xf32, #tpu.memory_space<vmem>>, vector<128x384xf32>
    tpu.vector_store %arg6[%c0_11, %c0_12], %14 {strides = array<i32>} : memref<128x384xf32, #tpu.memory_space<vmem>>, vector<128x384xf32>,
    return
  }
  func.func @transform_0(%arg0: i32) -> (i32, i32) {
    %c0_i32 = arith.constant 0 : i32
    %c0_i32_0 = arith.constant 0 : i32
    return %arg0, %c0_i32 : i32, i32
  }
  func.func @transform_1(%arg0: i32) -> (i32, i32) {
    %c0_i32 = arith.constant 0 : i32
    %c0_i32_0 = arith.constant 0 : i32
    %c0_i32_1 = arith.constant 0 : i32
    return %c0_i32, %c0_i32_0 : i32, i32
  }
  func.func @transform_2(%arg0: i32) -> (i32, i32) {
    %c0_i32 = arith.constant 0 : i32
    %c0_i32_0 = arith.constant 0 : i32
    %c0_i32_1 = arith.constant 0 : i32
    return %c0_i32, %c0_i32_0 : i32, i32
  }
  func.func @transform_3(%arg0: i32) -> (i32, i32) {
    %c0_i32 = arith.constant 0 : i32
    %c0_i32_0 = arith.constant 0 : i32
    %c0_i32_1 = arith.constant 0 : i32
    return %c0_i32, %c0_i32_0 : i32, i32
  }
  func.func @transform_4(%arg0: i32) -> (i32, i32) {
    %c0_i32 = arith.constant 0 : i32
    %c0_i32_0 = arith.constant 0 : i32
    %c0_i32_1 = arith.constant 0 : i32
    return %c0_i32, %c0_i32_0 : i32, i32
  }
  func.func @transform_5(%arg0: i32) -> (i32, i32) {
    %c0_i32 = arith.constant 0 : i32
    %c0_i32_0 = arith.constant 0 : i32
    return %arg0, %c0_i32 : i32, i32
  }
}

</mosaic_0001>

<bundles_post_ra>
// kernel: tpu_custom_call.1
= control target key start
LH: loop header
LB: loop body
LE: loop exit
PB: predicated region body
PF: predicated region fallthrough
CT: control target
= control target key end

     0   :  { %10 = vsyncpa [#allocation3], 0  ;;  %s10653_s0 = inlined_call_operand.hbm [shape: f32[128,384], index: 0, kind: input, shape index: {}]   ;;  %s10654_s1 = inlined_call_operand.hbm [shape: bf16[384,1536], index: 1, kind: input, shape index: {}]   ;;  %s10655_s2 = inlined_call_operand.hbm [shape: f32[1,1536], index: 2, kind: input, shape index: {}]   ;;  %s10656_s3 = inlined_call_operand.hbm [shape: bf16[1536,384], index: 3, kind: input, shape index: {}]   ;;  %s10657_s4 = inlined_call_operand.hbm [shape: f32[1,384], index: 4, kind: input, shape index: {}]   ;;  %s10658_s5 = inlined_call_operand.hbm [shape: f32[128,384], index: 5, kind: output, shape index: {}]  }
   0x1   :  { %11 = vsyncpa [#allocation6], 0 }
   0x2   :  { %12 = vsyncpa [#allocation9], 0 }
   0x3   :  { %13 = vsyncpa [#allocation4], 0  ;;  %s9364_s18 = smov [#allocation5]   ;;  %s9224_s22 = scalar_lea.hbm %s10654_s1, 36864 }
   0x4   :  { %s31_s19 = sshll.u32 %s9364_s18, 4  ;;  %p9225_p0 = scmp.ne.s32.totalorder %s10654_s1, %s9224_s22  ;;  %s32_s19 = int_to_ptr.vmem [resolvable:$true] %s31_s19 }
   0x5   :  { %p9228_p1 = scmp.lt.u32.totalorder %s9224_s22, %s10654_s1 }
   0x7   :  { %p9230_p2 = pnand %p9228_p1, %p9225_p0 }
   0x9   :  { %9233 = shalt.err (!%p9230_p2)
}
   0xa   :  { %s9234_s27 = scalar_lea.vmem %s32_s19, 36864  ;;  %p9239_p4 = scmp.lt.s32.totalorder %s32_s19, %s32_s19 }
   0xb   :  { %p9235_p3 = scmp.ne.s32.totalorder %s32_s19, %s9234_s27  ;;  %p9240_p5 = scmp.lt.s32.totalorder %s9234_s27, %s9234_s27 }
   0xd   :  { %p9241_p6 = por %p9240_p5, %p9239_p4 }
   0xf   :  { %p9242_p7 = pnand %p9241_p6, %p9235_p3 }
  0x11   :  { %9245 = shalt.err (!%p9242_p7)
}
  0x12   :  { %s9365_s28 = smov 768   ;;  %s9366_s29 = smov 48  }
  0x13   :  { %37 = dma.hbm_to_vmem [thread:$0]  %s10654_s1, 36864, %s32_s19, [#allocation6], %s9365_s28, %s9365_s28, %s9366_s29  }
  0x14   :  { %s9367_s7 = smov [#allocation8]   ;;  %s9246_s11 = scalar_lea.hbm %s10656_s3, 36864 }
  0x15   :  { %s53_s8 = sshll.u32 %s9367_s7, 4  ;;  %p9247_p8 = scmp.ne.s32.totalorder %s10656_s3, %s9246_s11  ;;  %s54_s8 = int_to_ptr.vmem [resolvable:$true] %s53_s8 }
  0x16   :  { %p9250_p9 = scmp.lt.u32.totalorder %s9246_s11, %s10656_s3 }
  0x18   :  { %p9252_p10 = pnand %p9250_p9, %p9247_p8 }
  0x1a   :  { %9255 = shalt.err (!%p9252_p10)
}
  0x1b   :  { %s9256_s16 = scalar_lea.vmem %s54_s8, 36864  ;;  %p9261_p12 = scmp.lt.s32.totalorder %s54_s8, %s54_s8 }
  0x1c   :  { %p9257_p11 = scmp.ne.s32.totalorder %s54_s8, %s9256_s16  ;;  %p9262_p13 = scmp.lt.s32.totalorder %s9256_s16, %s9256_s16 }
  0x1e   :  { %p9263_p0 = por %p9262_p13, %p9261_p12 }
  0x20   :  { %p9264_p1 = pnand %p9263_p0, %p9257_p11 }
  0x22   :  { %9267 = shalt.err (!%p9264_p1)
}
  0x23   :  { %s9368_s1 = smov 192   ;;  %s9369_s17 = smov 12  }
  0x24   :  { %59 = dma.hbm_to_vmem [thread:$0]  %s10656_s3, 36864, %s54_s8, [#allocation9], %s9368_s1, %s9368_s1, %s9369_s17  }
  0x25   :  { %s9370_s20 = smov [#allocation2]   ;;  %s9268_s24 = scalar_lea.hbm %s10653_s0, 6144 }
  0x26   :  { %s19_s21 = sshll.u32 %s9370_s20, 4  ;;  %p9269_p2 = scmp.ne.s32.totalorder %s10653_s0, %s9268_s24  ;;  %s20_s21 = int_to_ptr.vmem [resolvable:$true] %s19_s21 }
  0x27   :  { %p9272_p3 = scmp.lt.u32.totalorder %s9268_s24, %s10653_s0 }
  0x29   :  { %p9274_p4 = pnand %p9272_p3, %p9269_p2 }
  0x2b   :  { %9277 = shalt.err (!%p9274_p4)
}
  0x2c   :  { %s9278_s29 = scalar_lea.vmem %s20_s21, 6144  ;;  %p9283_p6 = scmp.lt.s32.totalorder %s20_s21, %s20_s21 }
  0x2d   :  { %p9279_p5 = scmp.ne.s32.totalorder %s20_s21, %s9278_s29  ;;  %p9284_p7 = scmp.lt.s32.totalorder %s9278_s29, %s9278_s29 }
  0x2f   :  { %p9285_p8 = por %p9284_p7, %p9283_p6 }
  0x31   :  { %p9286_p9 = pnand %p9285_p8, %p9279_p5 }
  0x33   :  { %9289 = shalt.err (!%p9286_p9)
}
  0x34   :  { %s9371_s3 = smov 384   ;;  %s9372_s30 = smov 24  }
  0x35   :  { %25 = dma.hbm_to_vmem [thread:$0]  %s10653_s0, 6144, %s20_s21, [#allocation3], %s9371_s3, %s9371_s3, %s9372_s30  }
  0x36   :  { %s9373_s8 = smov [#allocation7]   ;;  %s9374_s10 = smov [#allocation10]  }
  0x37   :  { %s44_s9 = sshll.u32 %s9373_s8, 4  ;;  %s66_s11 = sshll.u32 %s9374_s10, 4  ;;  %s45_s9 = int_to_ptr.vmem [resolvable:$true] %s44_s9  ;;  %s67_s11 = int_to_ptr.vmem [resolvable:$true] %s66_s11 }
  0x38   :  { %s9290_s14 = scalar_lea.hbm %s10655_s2, 192 }
  0x39   :  { %p9291_p10 = scmp.ne.s32.totalorder %s10655_s2, %s9290_s14  ;;  %p9294_p11 = scmp.lt.u32.totalorder %s9290_s14, %s10655_s2 }
  0x3b   :  { %p9296_p12 = pnand %p9294_p11, %p9291_p10 }
  0x3d   :  { %9299 = shalt.err (!%p9296_p12)
}
  0x3e   :  { %s9300_s0 = scalar_lea.vmem %s45_s9, 192  ;;  %p9305_p0 = scmp.lt.s32.totalorder %s45_s9, %s45_s9 }
  0x3f   :  { %p9301_p13 = scmp.ne.s32.totalorder %s45_s9, %s9300_s0  ;;  %p9306_p1 = scmp.lt.s32.totalorder %s9300_s0, %s9300_s0 }
  0x41   :  { %p9307_p2 = por %p9306_p1, %p9305_p0 }
  0x43   :  { %p9308_p3 = pnand %p9307_p2, %p9301_p13 }
  0x45   :  { %9311 = shalt.err (!%p9308_p3)
}
  0x46   :  { %47 = dma.hbm_to_vmem [thread:$0]  %s10655_s2, 192, %s45_s9, [#allocation6]  }
  0x47   :  { %s9312_s22 = scalar_lea.hbm %s10657_s4, 48 }
  0x48   :  { %p9313_p4 = scmp.ne.s32.totalorder %s10657_s4, %s9312_s22  ;;  %p9316_p5 = scmp.lt.u32.totalorder %s9312_s22, %s10657_s4 }
  0x4a   :  { %p9318_p6 = pnand %p9316_p5, %p9313_p4 }
  0x4c   :  { %9321 = shalt.err (!%p9318_p6)
}
  0x4d   :  { %s9322_s27 = scalar_lea.vmem %s67_s11, 48  ;;  %s9326_s28 = scalar_lea.vmem %s67_s11, 64 }
  0x4e   :  { %p9323_p7 = scmp.ne.s32.totalorder %s67_s11, %s9322_s27  ;;  %p9327_p8 = scmp.lt.s32.totalorder %s67_s11, %s67_s11 }
  0x4f   :  { %p9328_p9 = scmp.lt.s32.totalorder %s9326_s28, %s9322_s27 }
  0x51   :  { %p9329_p10 = por %p9328_p9, %p9327_p8 }
  0x53   :  { %p9330_p11 = pnand %p9329_p10, %p9323_p7 }
  0x55   :  { %9333 = shalt.err (!%p9330_p11)
}
  0x56   :  { %69 = dma.hbm_to_vmem [thread:$0]  %s10657_s4, 48, %s67_s11, [#allocation9]  }
  0x57   :  { %9356 = dma.done.wait [#allocation3], 6144  }
  0x58   :  { %9357 = vsyncadd [#allocation3], 4294961152 }
  0x59   :  { %9358 = dma.done.wait [#allocation6], 37056  }
  0x5a   :  { %9359 = vsyncadd [#allocation6], 4294930240 }
  0x5b   :  { %9360 = dma.done.wait [#allocation9], 36912  }
  0x5c   :  { %9361 = vsyncadd [#allocation9], 4294930384  ;;  %v8407_v0 = vld [vmem:[#allocation5 + $0x4] ss:$48 sps:$4 sm:$0xff]   ;;  %v8409_v1 = vld [vmem:[#allocation5 + $0xc] ss:$48 sps:$4 sm:$0xff]  }
  0x5d   :  { %1950 = vmatprep.subr.bf16.mxu0 %v8407_v0  ;;  %v8411_v2 = vld [vmem:[#allocation5] ss:$48 sps:$4 sm:$0xff]   ;;  %v8412_v3 = vld [vmem:[#allocation5 + $0x8] ss:$48 sps:$4 sm:$0xff]   ;;  %2176 = vmatprep.subr.bf16.mxu1 %v8409_v1  ;;  %v8413_v4 = vld [vmem:[#allocation5 + $0x64] ss:$48 sps:$4 sm:$0xff]  }
  0x5e   :  { %1951 = vmatpush1.bf16.msra.mxu0 %v8411_v2  ;;  %2177 = vmatpush1.bf16.msra.mxu1 %v8412_v3  ;;  %v8415_v5 = vld [vmem:[#allocation5 + $0x6c] ss:$48 sps:$4 sm:$0xff]   ;;  %v8417_v6 = vld [vmem:[#allocation5 + $0x60] ss:$48 sps:$4 sm:$0xff]   ;;  %v8418_v7 = vld [vmem:[#allocation5 + $0x68] ss:$48 sps:$4 sm:$0xff]  }
  0x5f   :  { %1952 = vmatprep.subr.bf16.mxu0 %v8413_v4  ;;  %2178 = vmatprep.subr.bf16.mxu1 %v8415_v5  ;;  %v8419_v8 = vld [vmem:[#allocation5 + $0xc4] ss:$48 sps:$4 sm:$0xff]   ;;  %v8421_v9 = vld [vmem:[#allocation5 + $0xcc] ss:$48 sps:$4 sm:$0xff]   ;;  %v8423_v10 = vld [vmem:[#allocation5 + $0xc0] ss:$48 sps:$4 sm:$0xff]  }
  0x60   :  { %v8424_v11 = vld [vmem:[#allocation5 + $0xc8] ss:$48 sps:$4 sm:$0xff]   ;;  %v8425_v12 = vld [vmem:[#allocation5 + $0x124] ss:$48 sps:$4 sm:$0xff]   ;;  %v8427_v13 = vld [vmem:[#allocation5 + $0x12c] ss:$48 sps:$4 sm:$0xff]  }
  0x61   :  { %v8429_v14 = vld [vmem:[#allocation5 + $0x120] ss:$48 sps:$4 sm:$0xff]   ;;  %v8430_v15 = vld [vmem:[#allocation5 + $0x128] ss:$48 sps:$4 sm:$0xff]   ;;  %v8431_v16 = vld [vmem:[#allocation5 + $0x184] ss:$48 sps:$4 sm:$0xff]  }
  0x62   :  { %1953 = vmatpush1.bf16.msra.mxu0 %v8417_v6  ;;  %2179 = vmatpush1.bf16.msra.mxu1 %v8418_v7  ;;  %v8433_v17 = vld [vmem:[#allocation5 + $0x18c] ss:$48 sps:$4 sm:$0xff]   ;;  %v8435_v18 = vld [vmem:[#allocation5 + $0x180] ss:$48 sps:$4 sm:$0xff]   ;;  %v8436_v19 = vld [vmem:[#allocation5 + $0x188] ss:$48 sps:$4 sm:$0xff]  }
  0x63   :  { %1954 = vmatprep.subr.bf16.mxu0 %v8419_v8  ;;  %2180 = vmatprep.subr.bf16.mxu1 %v8421_v9  ;;  %v8437_v20 = vld [vmem:[#allocation5 + $0x1e4] ss:$48 sps:$4 sm:$0xff]   ;;  %v8439_v21 = vld [vmem:[#allocation5 + $0x1ec] ss:$48 sps:$4 sm:$0xff]   ;;  %v8441_v22 = vld [vmem:[#allocation5 + $0x1e0] ss:$48 sps:$4 sm:$0xff]  }
  0x64   :  { %v8442_v23 = vld [vmem:[#allocation5 + $0x1e8] ss:$48 sps:$4 sm:$0xff]   ;;  %v8443_v24 = vld [vmem:[#allocation5 + $0x244] ss:$48 sps:$4 sm:$0xff]   ;;  %v8445_v25 = vld [vmem:[#allocation5 + $0x24c] ss:$48 sps:$4 sm:$0xff]  }
  0x65   :  { %v8447_v26 = vld [vmem:[#allocation5 + $0x240] ss:$48 sps:$4 sm:$0xff]   ;;  %v8448_v27 = vld [vmem:[#allocation5 + $0x248] ss:$48 sps:$4 sm:$0xff]   ;;  %v8449_v28 = vld [vmem:[#allocation5 + $0x2a4] ss:$48 sps:$4 sm:$0xff]  }
  0x66   :  { %1955 = vmatpush1.bf16.msra.mxu0 %v8423_v10  ;;  %2181 = vmatpush1.bf16.msra.mxu1 %v8424_v11  ;;  %v8451_v29 = vld [vmem:[#allocation5 + $0x2ac] ss:$48 sps:$4 sm:$0xff]   ;;  %v8453_v30 = vld [vmem:[#allocation5 + $0x2a0] ss:$48 sps:$4 sm:$0xff]   ;;  %v8454_v31 = vld [vmem:[#allocation5 + $0x2a8] ss:$48 sps:$4 sm:$0xff]  }
  0x67   :  { %1956 = vmatprep.subr.bf16.mxu0 %v8425_v12  ;;  %2182 = vmatprep.subr.bf16.mxu1 %v8427_v13  ;;  %v8455_v32 = vld [vmem:[#allocation5 + $0x304] ss:$48 sps:$4 sm:$0xff]   ;;  %v8457_v33 = vld [vmem:[#allocation5 + $0x30c] ss:$48 sps:$4 sm:$0xff]   ;;  %v8459_v34 = vld [vmem:[#allocation5 + $0x300] ss:$48 sps:$4 sm:$0xff]  }
  0x68   :  { %v8460_v35 = vld [vmem:[#allocation5 + $0x308] ss:$48 sps:$4 sm:$0xff]   ;;  %v8461_v36 = vld [vmem:[#allocation5 + $0x364] ss:$48 sps:$4 sm:$0xff]   ;;  %v8463_v37 = vld [vmem:[#allocation5 + $0x36c] ss:$48 sps:$4 sm:$0xff]  }
  0x69   :  { %v8465_v38 = vld [vmem:[#allocation5 + $0x360] ss:$48 sps:$4 sm:$0xff]   ;;  %v8466_v39 = vld [vmem:[#allocation5 + $0x368] ss:$48 sps:$4 sm:$0xff]   ;;  %v8467_v40 = vld [vmem:[#allocation5 + $0x3c4] ss:$48 sps:$4 sm:$0xff]  }
  0x6a   :  { %1957 = vmatpush1.bf16.msra.mxu0 %v8429_v14  ;;  %2183 = vmatpush1.bf16.msra.mxu1 %v8430_v15  ;;  %v8469_v41 = vld [vmem:[#allocation5 + $0x3cc] ss:$48 sps:$4 sm:$0xff]   ;;  %v8471_v42 = vld [vmem:[#allocation5 + $0x3c0] ss:$48 sps:$4 sm:$0xff]   ;;  %v8472_v43 = vld [vmem:[#allocation5 + $0x3c8] ss:$48 sps:$4 sm:$0xff]  }
  0x6b   :  { %1958 = vmatprep.subr.bf16.mxu0 %v8431_v16  ;;  %2184 = vmatprep.subr.bf16.mxu1 %v8433_v17  ;;  %v8473_v44 = vld [vmem:[#allocation5 + $0x424] ss:$48 sps:$4 sm:$0xff]   ;;  %v8475_v45 = vld [vmem:[#allocation5 + $0x42c] ss:$48 sps:$4 sm:$0xff]   ;;  %v8477_v47 = vld [vmem:[#allocation5 + $0x420] ss:$48 sps:$4 sm:$0xff]  }
  0x6c   :  { %v87_v46 = vld [vmem:[#allocation2 + $0x8] sm:$0xff]  ;;  %v90_v49 = vld [vmem:[#allocation2 + $0x20] sm:$0xff]  ;;  %v89_v4 = vld [vmem:[#allocation2 + $0x18] sm:$0xff]  ;;  %s9376_s4 = smov [#allocation11]  }
  0x6d   :  { %v8478_v48 = vld [vmem:[#allocation5 + $0x428] ss:$48 sps:$4 sm:$0xff]   ;;  %v8479_v50 = vld [vmem:[#allocation5 + $0x484] ss:$48 sps:$4 sm:$0xff]   ;;  %v9470_v51 = vpack.c.bf16 %v90_v49, %v87_v46  ;;  %v8481_v52 = vld [vmem:[#allocation5 + $0x48c] ss:$48 sps:$4 sm:$0xff]  }
  0x6e   :  { %1959 = vmatpush1.bf16.msra.mxu0 %v8435_v18  ;;  %2185 = vmatpush1.bf16.msra.mxu1 %v8436_v19  ;;  %v8483_v53 = vld [vmem:[#allocation5 + $0x480] ss:$48 sps:$4 sm:$0xff]   ;;  %v8484_v54 = vld [vmem:[#allocation5 + $0x488] ss:$48 sps:$4 sm:$0xff]   ;;  %v8485_v55 = vld [vmem:[#allocation5 + $0x4e4] ss:$48 sps:$4 sm:$0xff]  }
  0x6f   :  { %1960 = vmatprep.subr.bf16.mxu0 %v8437_v20  ;;  %2186 = vmatprep.subr.bf16.mxu1 %v8439_v21  ;;  %v8487_v56 = vld [vmem:[#allocation5 + $0x4ec] ss:$48 sps:$4 sm:$0xff]   ;;  %v8489_v57 = vld [vmem:[#allocation5 + $0x4e0] ss:$48 sps:$4 sm:$0xff]   ;;  %v8490_v58 = vld [vmem:[#allocation5 + $0x4e8] ss:$48 sps:$4 sm:$0xff]  }
  0x70   :  { %1982 = vmatprep.mubr.bf16.mxu0 %v9470_v51  ;;  %2208 = vmatprep.mubr.bf16.mxu1 %v9470_v51  ;;  %v8491_v59 = vld [vmem:[#allocation5 + $0x544] ss:$48 sps:$4 sm:$0xff]   ;;  %v8493_v60 = vld [vmem:[#allocation5 + $0x54c] ss:$48 sps:$4 sm:$0xff]   ;;  %v8495_v61 = vld [vmem:[#allocation5 + $0x540] ss:$48 sps:$4 sm:$0xff]  }
  0x71   :  { %v8496_v62 = vld [vmem:[#allocation5 + $0x548] ss:$48 sps:$4 sm:$0xff]   ;;  %v8497_v63 = vld [vmem:[#allocation5 + $0x5a4] ss:$48 sps:$4 sm:$0xff]   ;;  %v8499_v0 = vld [vmem:[#allocation5 + $0x5ac] ss:$48 sps:$4 sm:$0xff]  }
  0x72   :  { %1961 = vmatpush1.bf16.msra.mxu0 %v8441_v22  ;;  %2187 = vmatpush1.bf16.msra.mxu1 %v8442_v23  ;;  %v8501_v1 = vld [vmem:[#allocation5 + $0x5a0] ss:$48 sps:$4 sm:$0xff]   ;;  %v8502_v2 = vld [vmem:[#allocation5 + $0x5a8] ss:$48 sps:$4 sm:$0xff]   ;;  %v8505_v5 = vld [vmem:[#allocation5 + $0x60c] ss:$48 sps:$4 sm:$0xff]  }
  0x73   :  { %1962 = vmatprep.subr.bf16.mxu0 %v8443_v24  ;;  %2188 = vmatprep.subr.bf16.mxu1 %v8445_v25  ;;  %v86_v3 = vld [vmem:[#allocation2] sm:$0xff]  ;;  %v93_v7 = vld [vmem:[#allocation2 + $0x38] sm:$0xff]  ;;  %v96_v8 = vld [vmem:[#allocation2 + $0x50] sm:$0xff]  ;;  %s6844_s6 = sshll.u32 %s9376_s4, 4  ;;  %s6845_s6 = int_to_ptr.vmem [resolvable:$true] %s6844_s6 }
  0x74   :  { %v8508_v6 = vld [vmem:[#allocation5 + $0x604] ss:$48 sps:$4 sm:$0xff]   ;;  %v9474_v9 = vpack.c.bf16 %v89_v4, %v86_v3  ;;  %v8503_v10 = vld [vmem:[#allocation5 + $0x608] ss:$48 sps:$4 sm:$0xff]   ;;  %v8506_v11 = vld [vmem:[#allocation5 + $0x600] ss:$48 sps:$4 sm:$0xff]   ;;  %v9476_v12 = vpack.c.bf16 %v96_v8, %v93_v7  ;;  %p9339_p13 = scmp.lt.s32.totalorder %s6845_s6, %s6845_s6 }
  0x75   :  { %v92_v13 = vld [vmem:[#allocation2 + $0x30] sm:$0xff]  ;;  %v95_v14 = vld [vmem:[#allocation2 + $0x48] sm:$0xff]  ;;  %v102_v20 = vld [vmem:[#allocation2 + $0x80] sm:$0xff]  ;;  %s9334_s7 = scalar_lea.vmem %s6845_s6, 6144 }
  0x76   :  { %1963 = vmatpush1.bf16.msra.mxu0 %v8447_v26  ;;  %2189 = vmatpush1.bf16.msra.mxu1 %v8448_v27  ;;  %v8509_v15 = vld [vmem:[#allocation5 + $0x668] ss:$48 sps:$4 sm:$0xff]   ;;  %v8511_v16 = vld [vmem:[#allocation5 + $0x66c] ss:$48 sps:$4 sm:$0xff]   ;;  %v8514_v17 = vld [vmem:[#allocation5 + $0x664] ss:$48 sps:$4 sm:$0xff]   ;;  %v9482_v23 = vpack.c.bf16 %v95_v14, %v92_v13  ;;  %p9335_p12 = scmp.ne.s32.totalorder %s6845_s6, %s9334_s7  ;;  %p9340_p0 = scmp.lt.s32.totalorder %s9334_s7, %s9334_s7 }
  0x77   :  { %1964 = vmatprep.subr.bf16.mxu0 %v8449_v28  ;;  %2190 = vmatprep.subr.bf16.mxu1 %v8451_v29  ;;  %v8512_v18 = vld [vmem:[#allocation5 + $0x660] ss:$48 sps:$4 sm:$0xff]   ;;  %v99_v19 = vld [vmem:[#allocation2 + $0x68] sm:$0xff]  ;;  %v8520_v22 = vld [vmem:[#allocation5 + $0x6c4] ss:$48 sps:$4 sm:$0xff]  }
  0x78   :  { %v8517_v21 = vld [vmem:[#allocation5 + $0x6cc] ss:$48 sps:$4 sm:$0xff]   ;;  %v9484_v24 = vpack.c.bf16 %v102_v20, %v99_v19  ;;  %v8515_v25 = vld [vmem:[#allocation5 + $0x6c8] ss:$48 sps:$4 sm:$0xff]   ;;  %v8518_v26 = vld [vmem:[#allocation5 + $0x6c0] ss:$48 sps:$4 sm:$0xff]   ;;  %p9341_p1 = por %p9340_p0, %p9339_p13 }
  0x79   :  { %v98_v27 = vld [vmem:[#allocation2 + $0x60] sm:$0xff]  ;;  %v101_v28 = vld [vmem:[#allocation2 + $0x78] sm:$0xff]  ;;  %v116_v4 = vld [vmem:[#allocation2 + $0xf0] sm:$0xff] }
  0x7a   :  { %1965 = vmatpush1.bf16.msra.mxu0 %v8453_v30  ;;  %2191 = vmatpush1.bf16.msra.mxu1 %v8454_v31  ;;  %v8523_v29 = vld [vmem:[#allocation5 + $0x72c] ss:$48 sps:$4 sm:$0xff]   ;;  %v8526_v30 = vld [vmem:[#allocation5 + $0x724] ss:$48 sps:$4 sm:$0xff]   ;;  %p9342_p2 = pnand %p9341_p1, %p9335_p12 }
  0x7b   :  { %1966 = vmatprep.subr.bf16.mxu0 %v8455_v32  ;;  %2192 = vmatprep.subr.bf16.mxu1 %v8457_v33  ;;  %v105_v31 = vld [vmem:[#allocation2 + $0x98] sm:$0xff]  ;;  %v108_v32 = vld [vmem:[#allocation2 + $0xb0] sm:$0xff]  ;;  %v114_v46 = vld [vmem:[#allocation2 + $0xe0] sm:$0xff] }
  0x7c   :  { %v8521_v33 = vld [vmem:[#allocation5 + $0x728] ss:$48 sps:$4 sm:$0xff]   ;;  %v8541_v49 = vld [vmem:[#allocation5 + $0x84c] ss:$48 sps:$4 sm:$0xff]   ;;  %v126_v7 = vld [vmem:[#allocation2 + $0x140] sm:$0xff] }
  0x7d   :  { %v125_v13 = vld [vmem:[#allocation2 + $0x138] sm:$0xff]  ;;  %v131_v19 = vld [vmem:[#allocation2 + $0x168] sm:$0xff] }
  0x7e   :  { %1967 = vmatpush1.bf16.msra.mxu0 %v8459_v34  ;;  %2193 = vmatpush1.bf16.msra.mxu1 %v8460_v35  ;;  %v8524_v34 = vld [vmem:[#allocation5 + $0x720] ss:$48 sps:$4 sm:$0xff]   ;;  %v8529_v35 = vld [vmem:[#allocation5 + $0x78c] ss:$48 sps:$4 sm:$0xff]  }
  0x7f   :  { %1968 = vmatprep.subr.bf16.mxu0 %v8461_v36  ;;  %2194 = vmatprep.subr.bf16.mxu1 %v8463_v37  ;;  %v8532_v36 = vld [vmem:[#allocation5 + $0x784] ss:$48 sps:$4 sm:$0xff]   ;;  %v9490_v37 = vpack.c.bf16 %v101_v28, %v98_v27  ;;  %v129_v14 = vld [vmem:[#allocation2 + $0x158] sm:$0xff]  ;;  %v8551_v27 = vld [vmem:[#allocation5 + $0x10] ss:$48 sps:$4 sm:$0xff]  }
  0x80   :  { %v8554_v28 = vld [vmem:[#allocation5 + $0x18] ss:$48 sps:$4 sm:$0xff]  }
  0x82   :  { %1969 = vmatpush1.bf16.msra.mxu0 %v8465_v38  ;;  %2195 = vmatpush1.bf16.msra.mxu1 %v8466_v39  ;;  %v9492_v38 = vpack.c.bf16 %v108_v32, %v105_v31  ;;  %v8527_v39 = vld [vmem:[#allocation5 + $0x788] ss:$48 sps:$4 sm:$0xff]   ;;  %v8557_v31 = vld [vmem:[#allocation5 + $0x70] ss:$48 sps:$4 sm:$0xff]  }
  0x83   :  { %1970 = vmatprep.subr.bf16.mxu0 %v8467_v40  ;;  %2196 = vmatprep.subr.bf16.mxu1 %v8469_v41  ;;  %v8530_v40 = vld [vmem:[#allocation5 + $0x780] ss:$48 sps:$4 sm:$0xff]   ;;  %v8560_v32 = vld [vmem:[#allocation5 + $0x78] ss:$48 sps:$4 sm:$0xff]  }
  0x84   :  { %v104_v41 = vld [vmem:[#allocation2 + $0x90] sm:$0xff] }
  0x86   :  { %1971 = vmatpush1.bf16.msra.mxu0 %v8471_v42  ;;  %2197 = vmatpush1.bf16.msra.mxu1 %v8472_v43  ;;  %v107_v42 = vld [vmem:[#allocation2 + $0xa8] sm:$0xff] }
  0x87   :  { %1972 = vmatprep.subr.bf16.mxu0 %v8473_v44  ;;  %2198 = vmatprep.subr.bf16.mxu1 %v8475_v45  ;;  %v8535_v43 = vld [vmem:[#allocation5 + $0x7ec] ss:$48 sps:$4 sm:$0xff]   ;;  %v8538_v44 = vld [vmem:[#allocation5 + $0x7e4] ss:$48 sps:$4 sm:$0xff]  }
  0x88   :  { %v111_v45 = vld [vmem:[#allocation2 + $0xc8] sm:$0xff] }
  0x8a   :  { %1973 = vmatpush1.bf16.msra.mxu0 %v8477_v47  ;;  %2199 = vmatpush1.bf16.msra.mxu1 %v8478_v48  ;;  %v8533_v47 = vld [vmem:[#allocation5 + $0x7e8] ss:$48 sps:$4 sm:$0xff]   ;;  %v8536_v48 = vld [vmem:[#allocation5 + $0x7e0] ss:$48 sps:$4 sm:$0xff]  }
  0x8b   :  { %1974 = vmatprep.subr.bf16.mxu0 %v8479_v50  ;;  %2200 = vmatprep.subr.bf16.mxu1 %v8481_v52  ;;  %v8544_v50 = vld [vmem:[#allocation5 + $0x844] ss:$48 sps:$4 sm:$0xff]   ;;  %v9498_v52 = vpack.c.bf16 %v107_v42, %v104_v41  ;;  %v8566_v41 = vld [vmem:[#allocation5 + $0xd8] ss:$48 sps:$4 sm:$0xff]  }
  0x8c   :  { %v8571_v42 = vld [vmem:[#allocation5 + $0x134] ss:$48 sps:$4 sm:$0xff]  }
  0x8e   :  { %1975 = vmatpush1.bf16.msra.mxu0 %v8483_v53  ;;  %2201 = vmatpush1.bf16.msra.mxu1 %v8484_v54  ;;  %v9500_v53 = vpack.c.bf16 %v114_v46, %v111_v45  ;;  %v8539_v54 = vld [vmem:[#allocation5 + $0x848] ss:$48 sps:$4 sm:$0xff]   ;;  %v100_v46 = vld [vmem:[#allocation2 + $0x70] sm:$0xff] }
  0x8f   :  { %1976 = vmatprep.subr.bf16.mxu0 %v8485_v55  ;;  %2202 = vmatprep.subr.bf16.mxu1 %v8487_v56  ;;  %v8542_v55 = vld [vmem:[#allocation5 + $0x840] ss:$48 sps:$4 sm:$0xff]   ;;  %v8547_v56 = vld [vmem:[#allocation5 + $0x8ac] ss:$48 sps:$4 sm:$0xff]   ;;  %v8572_v45 = vld [vmem:[#allocation5 + $0x138] ss:$48 sps:$4 sm:$0xff]  }
  0x92   :  { %1977 = vmatpush1.bf16.msra.mxu0 %v8489_v57  ;;  %2203 = vmatpush1.bf16.msra.mxu1 %v8490_v58  ;;  %v110_v57 = vld [vmem:[#allocation2 + $0xc0] sm:$0xff] }
  0x93   :  { %1978 = vmatprep.subr.bf16.mxu0 %v8491_v59  ;;  %2204 = vmatprep.subr.bf16.mxu1 %v8493_v60  ;;  %v8550_v58 = vld [vmem:[#allocation5 + $0x8a4] ss:$48 sps:$4 sm:$0xff]   ;;  %v113_v59 = vld [vmem:[#allocation2 + $0xd8] sm:$0xff] }
  0x94   :  { %v117_v60 = vld [vmem:[#allocation2 + $0xf8] sm:$0xff] }
  0x96   :  { %1979 = vmatpush1.bf16.msra.mxu0 %v8495_v61  ;;  %2205 = vmatpush1.bf16.msra.mxu1 %v8496_v62  ;;  %v120_v61 = vld [vmem:[#allocation2 + $0x110] sm:$0xff]  ;;  %v8545_v62 = vld [vmem:[#allocation5 + $0x8a8] ss:$48 sps:$4 sm:$0xff]  }
  0x97   :  { %1980 = vmatprep.subr.bf16.mxu0 %v8497_v63  ;;  %2206 = vmatprep.subr.bf16.mxu1 %v8499_v0  ;;  %v8548_v63 = vld [vmem:[#allocation5 + $0x8a0] ss:$48 sps:$4 sm:$0xff]   ;;  %v8553_v0 = vld [vmem:[#allocation5 + $0x14] ss:$48 sps:$4 sm:$0xff]   ;;  %v9508_v3 = vpack.c.bf16 %v120_v61, %v117_v60  ;;  %v109_v61 = vld [vmem:[#allocation2 + $0xb8] sm:$0xff] }
  0x98   :  { %v106_v60 = vld [vmem:[#allocation2 + $0xa0] sm:$0xff] }
  0x9a   :  { %1981 = vmatpush1.bf16.msra.mxu0 %v8501_v1  ;;  %2207 = vmatpush1.bf16.msra.mxu1 %v8502_v2  ;;  %v8556_v1 = vld [vmem:[#allocation5 + $0x1c] ss:$48 sps:$4 sm:$0xff]   ;;  %v9506_v2 = vpack.c.bf16 %v113_v59, %v110_v57  ;;  %v8584_v59 = vld [vmem:[#allocation5 + $0x1f8] ss:$48 sps:$4 sm:$0xff]  }
  0x9b   :  { %2289 = vmatprep.subr.bf16.mxu1 %v8505_v5  ;;  %2063 = vmatprep.subr.bf16.mxu0 %v8508_v6  ;;  %v119_v5 = vld [vmem:[#allocation2 + $0x108] sm:$0xff] }
  0x9c   :  { %v123_v6 = vld [vmem:[#allocation2 + $0x128] sm:$0xff]  ;;  %v9514_v8 = vpack.c.bf16 %v119_v5, %v116_v4  ;;  %v8595_v5 = vld [vmem:[#allocation5 + $0x2b4] ss:$48 sps:$4 sm:$0xff]  }
  0x9d   :  { %1983 = vmatmul.mubr.bf16.vlgmr.msra.gmra.mrb[0].mxu0 %v9474_v9  ;;  %2209 = vmatmul.mubr.bf16.vlgmr.msra.gmra.mrb[0].mxu1 %v9474_v9  ;;  %v8586_v57 = vld [vmem:[#allocation5 + $0x1fc] ss:$48 sps:$4 sm:$0xff]   ;;  %v8590_v4 = vld [vmem:[#allocation5 + $0x258] ss:$48 sps:$4 sm:$0xff]  }
  0x9e   :  { %2290 = vmatpush1.bf16.msra.mxu1 %v8503_v10  ;;  %2064 = vmatpush1.bf16.msra.mxu0 %v8506_v11  ;;  %v9516_v10 = vpack.c.bf16 %v126_v7, %v123_v6  ;;  %v122_v11 = vld [vmem:[#allocation2 + $0x120] sm:$0xff]  ;;  %v8598_v6 = vld [vmem:[#allocation5 + $0x2bc] ss:$48 sps:$4 sm:$0xff]  }
  0x9f   :  { %1992 = vmatprep.mubr.bf16.mxu0 %v9476_v12  ;;  %2218 = vmatprep.mubr.bf16.mxu1 %v9476_v12  ;;  %v8593_v7 = vld [vmem:[#allocation5 + $0x2b0] ss:$48 sps:$4 sm:$0xff]  }
  0xa0   :  { %2291 = vmatprep.subr.bf16.mxu1 %v8511_v16  ;;  %2065 = vmatprep.subr.bf16.mxu0 %v8514_v17  ;;  %v9522_v16 = vpack.c.bf16 %v125_v13, %v122_v11  ;;  %v8596_v11 = vld [vmem:[#allocation5 + $0x2b8] ss:$48 sps:$4 sm:$0xff]   ;;  %v112_v13 = vld [vmem:[#allocation2 + $0xd0] sm:$0xff] }
  0xa2   :  { %2292 = vmatpush1.bf16.msra.mxu1 %v8509_v15  ;;  %2066 = vmatpush1.bf16.msra.mxu0 %v8512_v18  ;;  %v132_v15 = vld [vmem:[#allocation2 + $0x170] sm:$0xff] }
  0xa3   :  { %2293 = vmatprep.subr.bf16.mxu1 %v8517_v21  ;;  %2067 = vmatprep.subr.bf16.mxu0 %v8520_v22  ;;  %v9524_v17 = vpack.c.bf16 %v132_v15, %v129_v14  ;;  %v128_v18 = vld [vmem:[#allocation2 + $0x150] sm:$0xff]  ;;  %v10660_v22 = vmov 0   ;;  %v115_v14 = vld [vmem:[#allocation2 + $0xe8] sm:$0xff] }
  0xa4   :  { %v9530_v20 = vpack.c.bf16 %v131_v19, %v128_v18  ;;  %v88_v21 = vld [vmem:[#allocation2 + $0x10] sm:$0xff]  ;;  %v8604_v18 = vld [vmem:[#allocation5 + $0x31c] ss:$48 sps:$4 sm:$0xff]   ;;  %v9560_v19 = vpack.c.bf16 %v115_v14, %v112_v13  ;;  %v8644_v13 = vld [vmem:[#allocation5 + $0x5b8] ss:$48 sps:$4 sm:$0xff]  }
  0xa5   :  { %1993 = vmatmul.mubr.bf16.gmra.mrb[4].mxu0 %v9482_v23  ;;  %2219 = vmatmul.mubr.bf16.gmra.mrb[4].mxu1 %v9482_v23  ;;  %v8601_v15 = vld [vmem:[#allocation5 + $0x314] ss:$48 sps:$4 sm:$0xff]   ;;  %v8649_v14 = vld [vmem:[#allocation5 + $0x61c] ss:$48 sps:$4 sm:$0xff]  }
  0xa6   :  { %2002 = vmatprep.mubr.bf16.mxu0 %v9484_v24  ;;  %2228 = vmatprep.mubr.bf16.mxu1 %v9484_v24 }
  0xa7   :  { %2294 = vmatpush1.bf16.msra.mxu1 %v8515_v25  ;;  %2068 = vmatpush1.bf16.msra.mxu0 %v8518_v26  ;;  %v91_v25 = vld [vmem:[#allocation2 + $0x28] sm:$0xff] }
  0xa8   :  { %2295 = vmatprep.subr.bf16.mxu1 %v8523_v29  ;;  %2069 = vmatprep.subr.bf16.mxu0 %v8526_v30  ;;  %v9536_v26 = vpack.c.bf16 %v91_v25, %v88_v21  ;;  %v8559_v29 = vld [vmem:[#allocation5 + $0x74] ss:$48 sps:$4 sm:$0xff]   ;;  %v8562_v30 = vld [vmem:[#allocation5 + $0x7c] ss:$48 sps:$4 sm:$0xff]   ;;  %v8599_v21 = vld [vmem:[#allocation5 + $0x310] ss:$48 sps:$4 sm:$0xff]  }
  0xa9   :  { %v8602_v25 = vld [vmem:[#allocation5 + $0x318] ss:$48 sps:$4 sm:$0xff]  }
  0xab   :  { %2296 = vmatpush1.bf16.msra.mxu1 %v8521_v33  ;;  %2070 = vmatpush1.bf16.msra.mxu0 %v8524_v34  ;;  %v94_v33 = vld [vmem:[#allocation2 + $0x40] sm:$0xff]  ;;  %v97_v34 = vld [vmem:[#allocation2 + $0x58] sm:$0xff] }
  0xac   :  { %2297 = vmatprep.subr.bf16.mxu1 %v8529_v35  ;;  %2071 = vmatprep.subr.bf16.mxu0 %v8532_v36  ;;  %v8565_v35 = vld [vmem:[#allocation5 + $0xd4] ss:$48 sps:$4 sm:$0xff]   ;;  %v8568_v36 = vld [vmem:[#allocation5 + $0xdc] ss:$48 sps:$4 sm:$0xff]  }
  0xad   :  { %2003 = vmatmul.mubr.bf16.gmra.mrb[8].mxu0 %v9490_v37  ;;  %2229 = vmatmul.mubr.bf16.gmra.mrb[8].mxu1 %v9490_v37 }
  0xae   :  { %2012 = vmatprep.mubr.bf16.mxu0 %v9492_v38  ;;  %2238 = vmatprep.mubr.bf16.mxu1 %v9492_v38 }
  0xaf   :  { %2298 = vmatpush1.bf16.msra.mxu1 %v8527_v39  ;;  %2072 = vmatpush1.bf16.msra.mxu0 %v8530_v40  ;;  %v9542_v39 = vpack.c.bf16 %v97_v34, %v94_v33  ;;  %v8563_v40 = vld [vmem:[#allocation5 + $0xd0] ss:$48 sps:$4 sm:$0xff]   ;;  %v8613_v33 = vld [vmem:[#allocation5 + $0x3d4] ss:$48 sps:$4 sm:$0xff]   ;;  %v8616_v34 = vld [vmem:[#allocation5 + $0x3dc] ss:$48 sps:$4 sm:$0xff]  }
  0xb0   :  { %2299 = vmatprep.subr.bf16.mxu1 %v8535_v43  ;;  %2073 = vmatprep.subr.bf16.mxu0 %v8538_v44  ;;  %v8574_v43 = vld [vmem:[#allocation5 + $0x13c] ss:$48 sps:$4 sm:$0xff]   ;;  %v8569_v44 = vld [vmem:[#allocation5 + $0x130] ss:$48 sps:$4 sm:$0xff]  }
  0xb3   :  { %2300 = vmatpush1.bf16.msra.mxu1 %v8533_v47  ;;  %2074 = vmatpush1.bf16.msra.mxu0 %v8536_v48  ;;  %v103_v47 = vld [vmem:[#allocation2 + $0x88] sm:$0xff]  ;;  %v8577_v48 = vld [vmem:[#allocation5 + $0x194] ss:$48 sps:$4 sm:$0xff]  }
  0xb4   :  { %2301 = vmatprep.subr.bf16.mxu1 %v8541_v49  ;;  %2075 = vmatprep.subr.bf16.mxu0 %v8544_v50  ;;  %v8580_v49 = vld [vmem:[#allocation5 + $0x19c] ss:$48 sps:$4 sm:$0xff]   ;;  %v9548_v50 = vpack.c.bf16 %v103_v47, %v100_v46  ;;  %v8625_v47 = vld [vmem:[#allocation5 + $0x494] ss:$48 sps:$4 sm:$0xff]  }
  0xb5   :  { %2013 = vmatmul.mubr.bf16.gmra.mrb[12].mxu0 %v9498_v52  ;;  %2239 = vmatmul.mubr.bf16.gmra.mrb[12].mxu1 %v9498_v52  ;;  %v127_v46 = vld [vmem:[#allocation2 + $0x148] sm:$0xff] }
  0xb6   :  { %2022 = vmatprep.mubr.bf16.mxu0 %v9500_v53  ;;  %2248 = vmatprep.mubr.bf16.mxu1 %v9500_v53 }
  0xb7   :  { %2302 = vmatpush1.bf16.msra.mxu1 %v8539_v54  ;;  %2076 = vmatpush1.bf16.msra.mxu0 %v8542_v55  ;;  %v8575_v54 = vld [vmem:[#allocation5 + $0x190] ss:$48 sps:$4 sm:$0xff]   ;;  %v8578_v55 = vld [vmem:[#allocation5 + $0x198] ss:$48 sps:$4 sm:$0xff]  }
  0xb8   :  { %2303 = vmatprep.subr.bf16.mxu1 %v8547_v56  ;;  %2077 = vmatprep.subr.bf16.mxu0 %v8550_v58  ;;  %v8583_v56 = vld [vmem:[#allocation5 + $0x1f4] ss:$48 sps:$4 sm:$0xff]   ;;  %v8581_v58 = vld [vmem:[#allocation5 + $0x1f0] ss:$48 sps:$4 sm:$0xff]  }
  0xbb   :  { %2304 = vmatpush1.bf16.msra.mxu1 %v8545_v62  ;;  %2078 = vmatpush1.bf16.msra.mxu0 %v8548_v63  ;;  %v8589_v62 = vld [vmem:[#allocation5 + $0x254] ss:$48 sps:$4 sm:$0xff]   ;;  %v8592_v63 = vld [vmem:[#allocation5 + $0x25c] ss:$48 sps:$4 sm:$0xff]  }
  0xbc   :  { %2402 = vmatprep.subr.bf16.mxu0 %v8553_v0  ;;  %2628 = vmatprep.subr.bf16.mxu1 %v8556_v1  ;;  %v9554_v0 = vpack.c.bf16 %v109_v61, %v106_v60  ;;  %v8587_v1 = vld [vmem:[#allocation5 + $0x250] ss:$48 sps:$4 sm:$0xff]   ;;  %v133_v61 = vld [vmem:[#allocation2 + $0x178] sm:$0xff] }
  0xbd   :  { %2023 = vmatmul.mubr.bf16.gmra.mrb[16].mxu0 %v9506_v2  ;;  %2249 = vmatmul.mubr.bf16.gmra.mrb[16].mxu1 %v9506_v2  ;;  %v130_v60 = vld [vmem:[#allocation2 + $0x160] sm:$0xff] }
  0xbe   :  { %2032 = vmatprep.mubr.bf16.mxu0 %v9508_v3  ;;  %2258 = vmatprep.mubr.bf16.mxu1 %v9508_v3 }
  0xc5   :  { %2033 = vmatmul.mubr.bf16.gmra.mrb[20].mxu0 %v9514_v8  ;;  %2259 = vmatmul.mubr.bf16.gmra.mrb[20].mxu1 %v9514_v8 }
  0xc6   :  { %2042 = vmatprep.mubr.bf16.mxu0 %v9516_v10  ;;  %2268 = vmatprep.mubr.bf16.mxu1 %v9516_v10 }
  0xcd   :  { %2043 = vmatmul.mubr.bf16.gmra.mrb[24].mxu0 %v9522_v16  ;;  %2269 = vmatmul.mubr.bf16.gmra.mrb[24].mxu1 %v9522_v16 }
  0xce   :  { %2052 = vmatprep.mubr.bf16.mxu0 %v9524_v17  ;;  %2278 = vmatprep.mubr.bf16.mxu1 %v9524_v17 }
  0xd5   :  { %2053 = vmatmul.mubr.bf16.gmra.mrb[28].mxu0 %v9530_v20  ;;  %2279 = vmatmul.mubr.bf16.gmra.mrb[28].mxu1 %v9530_v20 }
  0xd6   :  { %2095 = vmatprep.mubr.bf16.mxu0 %v10660_v22  ;;  %2321 = vmatprep.mubr.bf16.mxu1 %v10660_v22 }
  0xdd   :  { %2096 = vmatmul.mubr.bf16.vlgmr.msra.gmra.mrb[0].mxu0 %v9536_v26  ;;  %2322 = vmatmul.mubr.bf16.vlgmr.msra.gmra.mrb[0].mxu1 %v9536_v26 }
  0xde   :  { %2403 = vmatpush1.bf16.msra.mxu0 %v8551_v27  ;;  %2629 = vmatpush1.bf16.msra.mxu1 %v8554_v28  ;;  %v8607_v27 = vld [vmem:[#allocation5 + $0x374] ss:$48 sps:$4 sm:$0xff]   ;;  %v8610_v28 = vld [vmem:[#allocation5 + $0x37c] ss:$48 sps:$4 sm:$0xff]  }
  0xdf   :  { %2404 = vmatprep.subr.bf16.mxu0 %v8559_v29  ;;  %2630 = vmatprep.subr.bf16.mxu1 %v8562_v30  ;;  %v8605_v29 = vld [vmem:[#allocation5 + $0x370] ss:$48 sps:$4 sm:$0xff]   ;;  %v8608_v30 = vld [vmem:[#allocation5 + $0x378] ss:$48 sps:$4 sm:$0xff]  }
  0xe0   :  { %2105 = vmatprep.mubr.bf16.mxu0 %v10660_v22  ;;  %2331 = vmatprep.mubr.bf16.mxu1 %v10660_v22 }
  0xe2   :  { %2405 = vmatpush1.bf16.msra.mxu0 %v8557_v31  ;;  %2631 = vmatpush1.bf16.msra.mxu1 %v8560_v32  ;;  %v118_v31 = vld [vmem:[#allocation2 + $0x100] sm:$0xff]  ;;  %v121_v32 = vld [vmem:[#allocation2 + $0x118] sm:$0xff] }
  0xe3   :  { %2406 = vmatprep.subr.bf16.mxu0 %v8565_v35  ;;  %2632 = vmatprep.subr.bf16.mxu1 %v8568_v36  ;;  %v9566_v35 = vpack.c.bf16 %v121_v32, %v118_v31  ;;  %v8611_v36 = vld [vmem:[#allocation5 + $0x3d0] ss:$48 sps:$4 sm:$0xff]   ;;  %v8664_v31 = vld [vmem:[#allocation5 + $0x6d4] ss:$48 sps:$4 sm:$0xff]   ;;  %v8659_v32 = vld [vmem:[#allocation5 + $0x6d8] ss:$48 sps:$4 sm:$0xff]  }
  0xe5   :  { %2106 = vmatmul.mubr.bf16.gmra.mrb[4].mxu0 %v9542_v39  ;;  %2332 = vmatmul.mubr.bf16.gmra.mrb[4].mxu1 %v9542_v39 }
  0xe6   :  { %2407 = vmatpush1.bf16.msra.mxu0 %v8563_v40  ;;  %2633 = vmatpush1.bf16.msra.mxu1 %v8566_v41  ;;  %v8614_v40 = vld [vmem:[#allocation5 + $0x3d8] ss:$48 sps:$4 sm:$0xff]   ;;  %v8619_v41 = vld [vmem:[#allocation5 + $0x434] ss:$48 sps:$4 sm:$0xff]  }
  0xe7   :  { %2408 = vmatprep.subr.bf16.mxu0 %v8571_v42  ;;  %2634 = vmatprep.subr.bf16.mxu1 %v8574_v43  ;;  %v8622_v42 = vld [vmem:[#allocation5 + $0x43c] ss:$48 sps:$4 sm:$0xff]   ;;  %v8617_v43 = vld [vmem:[#allocation5 + $0x430] ss:$48 sps:$4 sm:$0xff]  }
  0xe8   :  { %2115 = vmatprep.mubr.bf16.mxu0 %v10660_v22  ;;  %2341 = vmatprep.mubr.bf16.mxu1 %v10660_v22 }
  0xea   :  { %2409 = vmatpush1.bf16.msra.mxu0 %v8569_v44  ;;  %2635 = vmatpush1.bf16.msra.mxu1 %v8572_v45  ;;  %v8620_v44 = vld [vmem:[#allocation5 + $0x438] ss:$48 sps:$4 sm:$0xff]   ;;  %v124_v45 = vld [vmem:[#allocation2 + $0x130] sm:$0xff] }
  0xeb   :  { %2410 = vmatprep.subr.bf16.mxu0 %v8577_v48  ;;  %2636 = vmatprep.subr.bf16.mxu1 %v8580_v49  ;;  %v8628_v48 = vld [vmem:[#allocation5 + $0x49c] ss:$48 sps:$4 sm:$0xff]   ;;  %v9572_v49 = vpack.c.bf16 %v127_v46, %v124_v45  ;;  %v8674_v45 = vld [vmem:[#allocation5 + $0x790] ss:$48 sps:$4 sm:$0xff]  }
  0xec   :  { %v8679_v46 = vld [vmem:[#allocation5 + $0x7fc] ss:$48 sps:$4 sm:$0xff]  }
  0xed   :  { %2116 = vmatmul.mubr.bf16.gmra.mrb[8].mxu0 %v9548_v50  ;;  %2342 = vmatmul.mubr.bf16.gmra.mrb[8].mxu1 %v9548_v50 }
  0xee   :  { %2411 = vmatpush1.bf16.msra.mxu0 %v8575_v54  ;;  %2637 = vmatpush1.bf16.msra.mxu1 %v8578_v55  ;;  %v8623_v54 = vld [vmem:[#allocation5 + $0x490] ss:$48 sps:$4 sm:$0xff]   ;;  %v8626_v55 = vld [vmem:[#allocation5 + $0x498] ss:$48 sps:$4 sm:$0xff]  }
  0xef   :  { %2412 = vmatprep.subr.bf16.mxu0 %v8583_v56  ;;  %2638 = vmatprep.subr.bf16.mxu1 %v8586_v57  ;;  %v8631_v56 = vld [vmem:[#allocation5 + $0x4f4] ss:$48 sps:$4 sm:$0xff]   ;;  %v8634_v57 = vld [vmem:[#allocation5 + $0x4fc] ss:$48 sps:$4 sm:$0xff]  }
  0xf0   :  { %2125 = vmatprep.mubr.bf16.mxu0 %v10660_v22  ;;  %2351 = vmatprep.mubr.bf16.mxu1 %v10660_v22 }
  0xf2   :  { %2413 = vmatpush1.bf16.msra.mxu0 %v8581_v58  ;;  %2639 = vmatpush1.bf16.msra.mxu1 %v8584_v59  ;;  %v8629_v58 = vld [vmem:[#allocation5 + $0x4f0] ss:$48 sps:$4 sm:$0xff]   ;;  %v8632_v59 = vld [vmem:[#allocation5 + $0x4f8] ss:$48 sps:$4 sm:$0xff]  }
  0xf3   :  { %2414 = vmatprep.subr.bf16.mxu0 %v8589_v62  ;;  %2640 = vmatprep.subr.bf16.mxu1 %v8592_v63  ;;  %v8637_v62 = vld [vmem:[#allocation5 + $0x554] ss:$48 sps:$4 sm:$0xff]   ;;  %v8640_v63 = vld [vmem:[#allocation5 + $0x55c] ss:$48 sps:$4 sm:$0xff]  }
  0xf5   :  { %2126 = vmatmul.mubr.bf16.gmra.mrb[12].mxu0 %v9554_v0  ;;  %2352 = vmatmul.mubr.bf16.gmra.mrb[12].mxu1 %v9554_v0 }
  0xf6   :  { %2415 = vmatpush1.bf16.msra.mxu0 %v8587_v1  ;;  %2641 = vmatpush1.bf16.msra.mxu1 %v8590_v4  ;;  %v8635_v1 = vld [vmem:[#allocation5 + $0x550] ss:$48 sps:$4 sm:$0xff]   ;;  %v8638_v4 = vld [vmem:[#allocation5 + $0x558] ss:$48 sps:$4 sm:$0xff]  }
  0xf7   :  { %2416 = vmatprep.subr.bf16.mxu0 %v8595_v5  ;;  %2642 = vmatprep.subr.bf16.mxu1 %v8598_v6  ;;  %v9578_v5 = vpack.c.bf16 %v133_v61, %v130_v60  ;;  %v8643_v6 = vld [vmem:[#allocation5 + $0x5b4] ss:$48 sps:$4 sm:$0xff]   ;;  %v8689_v61 = vld [vmem:[#allocation5 + $0x8b8] ss:$48 sps:$4 sm:$0xff]  }
  0xf8   :  { %2135 = vmatprep.mubr.bf16.mxu0 %v10660_v22  ;;  %2361 = vmatprep.mubr.bf16.mxu1 %v10660_v22  ;;  %v8694_v60 = vld [vmem:[#allocation5 + $0x8b4] ss:$48 sps:$4 sm:$0xff]  }
  0xfa   :  { %2417 = vmatpush1.bf16.msra.mxu0 %v8593_v7  ;;  %2643 = vmatpush1.bf16.msra.mxu1 %v8596_v11  ;;  %v8646_v7 = vld [vmem:[#allocation5 + $0x5bc] ss:$48 sps:$4 sm:$0xff]   ;;  %v8641_v11 = vld [vmem:[#allocation5 + $0x5b0] ss:$48 sps:$4 sm:$0xff]  }
  0xfb   :  { %2418 = vmatprep.subr.bf16.mxu0 %v8601_v15  ;;  %2644 = vmatprep.subr.bf16.mxu1 %v8604_v18  ;;  %v8652_v15 = vld [vmem:[#allocation5 + $0x614] ss:$48 sps:$4 sm:$0xff]   ;;  %v8647_v18 = vld [vmem:[#allocation5 + $0x618] ss:$48 sps:$4 sm:$0xff]  }
  0xfd   :  { %2136 = vmatmul.mubr.bf16.gmra.mrb[16].mxu0 %v9560_v19  ;;  %2362 = vmatmul.mubr.bf16.gmra.mrb[16].mxu1 %v9560_v19 }
  0xfe   :  { %2419 = vmatpush1.bf16.msra.mxu0 %v8599_v21  ;;  %2645 = vmatpush1.bf16.msra.mxu1 %v8602_v25  ;;  %v8650_v21 = vld [vmem:[#allocation5 + $0x610] ss:$48 sps:$4 sm:$0xff]   ;;  %v8655_v25 = vld [vmem:[#allocation5 + $0x67c] ss:$48 sps:$4 sm:$0xff]  }
  0xff   :  { %2420 = vmatprep.subr.bf16.mxu0 %v8607_v27  ;;  %2646 = vmatprep.subr.bf16.mxu1 %v8610_v28  ;;  %v8658_v27 = vld [vmem:[#allocation5 + $0x674] ss:$48 sps:$4 sm:$0xff]   ;;  %v8653_v28 = vld [vmem:[#allocation5 + $0x678] ss:$48 sps:$4 sm:$0xff]  }
 0x100   :  { %2145 = vmatprep.mubr.bf16.mxu0 %v10660_v22  ;;  %2371 = vmatprep.mubr.bf16.mxu1 %v10660_v22 }
 0x102   :  { %2421 = vmatpush1.bf16.msra.mxu0 %v8605_v29  ;;  %2647 = vmatpush1.bf16.msra.mxu1 %v8608_v30  ;;  %v8656_v29 = vld [vmem:[#allocation5 + $0x670] ss:$48 sps:$4 sm:$0xff]   ;;  %v8661_v30 = vld [vmem:[#allocation5 + $0x6dc] ss:$48 sps:$4 sm:$0xff]  }
 0x103   :  { %2422 = vmatprep.subr.bf16.mxu0 %v8613_v33  ;;  %2648 = vmatprep.subr.bf16.mxu1 %v8616_v34  ;;  %v8662_v33 = vld [vmem:[#allocation5 + $0x6d0] ss:$48 sps:$4 sm:$0xff]   ;;  %v8667_v34 = vld [vmem:[#allocation5 + $0x73c] ss:$48 sps:$4 sm:$0xff]  }
 0x105   :  { %2146 = vmatmul.mubr.bf16.gmra.mrb[20].mxu0 %v9566_v35  ;;  %2372 = vmatmul.mubr.bf16.gmra.mrb[20].mxu1 %v9566_v35 }
 0x106   :  { %2423 = vmatpush1.bf16.msra.mxu0 %v8611_v36  ;;  %2649 = vmatpush1.bf16.msra.mxu1 %v8614_v40  ;;  %v8670_v36 = vld [vmem:[#allocation5 + $0x734] ss:$48 sps:$4 sm:$0xff]   ;;  %v8665_v40 = vld [vmem:[#allocation5 + $0x738] ss:$48 sps:$4 sm:$0xff]  }
 0x107   :  { %2424 = vmatprep.subr.bf16.mxu0 %v8619_v41  ;;  %2650 = vmatprep.subr.bf16.mxu1 %v8622_v42  ;;  %v8668_v41 = vld [vmem:[#allocation5 + $0x730] ss:$48 sps:$4 sm:$0xff]   ;;  %v8673_v42 = vld [vmem:[#allocation5 + $0x79c] ss:$48 sps:$4 sm:$0xff]  }
 0x108   :  { %2155 = vmatprep.mubr.bf16.mxu0 %v10660_v22  ;;  %2381 = vmatprep.mubr.bf16.mxu1 %v10660_v22 }
 0x10a   :  { %2425 = vmatpush1.bf16.msra.mxu0 %v8617_v43  ;;  %2651 = vmatpush1.bf16.msra.mxu1 %v8620_v44  ;;  %v8676_v43 = vld [vmem:[#allocation5 + $0x794] ss:$48 sps:$4 sm:$0xff]   ;;  %v8671_v44 = vld [vmem:[#allocation5 + $0x798] ss:$48 sps:$4 sm:$0xff]  }
 0x10b   :  { %2426 = vmatprep.subr.bf16.mxu0 %v8625_v47  ;;  %2652 = vmatprep.subr.bf16.mxu1 %v8628_v48  ;;  %v8682_v47 = vld [vmem:[#allocation5 + $0x7f4] ss:$48 sps:$4 sm:$0xff]   ;;  %v8677_v48 = vld [vmem:[#allocation5 + $0x7f8] ss:$48 sps:$4 sm:$0xff]  }
 0x10d   :  { %2156 = vmatmul.mubr.bf16.gmra.mrb[24].mxu0 %v9572_v49  ;;  %2382 = vmatmul.mubr.bf16.gmra.mrb[24].mxu1 %v9572_v49 }
 0x10e   :  { %2427 = vmatpush1.bf16.msra.mxu0 %v8623_v54  ;;  %2653 = vmatpush1.bf16.msra.mxu1 %v8626_v55  ;;  %v8680_v54 = vld [vmem:[#allocation5 + $0x7f0] ss:$48 sps:$4 sm:$0xff]   ;;  %v8685_v55 = vld [vmem:[#allocation5 + $0x85c] ss:$48 sps:$4 sm:$0xff]  }
 0x10f   :  { %2428 = vmatprep.subr.bf16.mxu0 %v8631_v56  ;;  %2654 = vmatprep.subr.bf16.mxu1 %v8634_v57  ;;  %v8688_v56 = vld [vmem:[#allocation5 + $0x854] ss:$48 sps:$4 sm:$0xff]   ;;  %v8683_v57 = vld [vmem:[#allocation5 + $0x858] ss:$48 sps:$4 sm:$0xff]  }
 0x110   :  { %2165 = vmatprep.mubr.bf16.mxu0 %v10660_v22  ;;  %2391 = vmatprep.mubr.bf16.mxu1 %v10660_v22 }
 0x112   :  { %2429 = vmatpush1.bf16.msra.mxu0 %v8629_v58  ;;  %2655 = vmatpush1.bf16.msra.mxu1 %v8632_v59  ;;  %v8686_v58 = vld [vmem:[#allocation5 + $0x850] ss:$48 sps:$4 sm:$0xff]   ;;  %v8691_v59 = vld [vmem:[#allocation5 + $0x8bc] ss:$48 sps:$4 sm:$0xff]  }
 0x113   :  { %2430 = vmatprep.subr.bf16.mxu0 %v8637_v62  ;;  %2656 = vmatprep.subr.bf16.mxu1 %v8640_v63  ;;  %v8692_v62 = vld [vmem:[#allocation5 + $0x8b0] ss:$48 sps:$4 sm:$0xff]   ;;  %v8697_v63 = vld [vmem:[#allocation5 + $0x24] ss:$48 sps:$4 sm:$0xff]  }
 0x115   :  { %2166 = vmatmul.mubr.bf16.gmra.mrb[28].mxu0 %v9578_v5  ;;  %2392 = vmatmul.mubr.bf16.gmra.mrb[28].mxu1 %v9578_v5 }
 0x116   :  { %2431 = vmatpush1.bf16.msra.mxu0 %v8635_v1  ;;  %2657 = vmatpush1.bf16.msra.mxu1 %v8638_v4  ;;  %v8700_v1 = vld [vmem:[#allocation5 + $0x2c] ss:$48 sps:$4 sm:$0xff]   ;;  %v8695_v4 = vld [vmem:[#allocation5 + $0x20] ss:$48 sps:$4 sm:$0xff]  }
 0x117   :  { %2432 = vmatprep.subr.bf16.mxu0 %v8643_v6  ;;  %2658 = vmatprep.subr.bf16.mxu1 %v8646_v7  ;;  %v8698_v6 = vld [vmem:[#allocation5 + $0x28] ss:$48 sps:$4 sm:$0xff]   ;;  %v8703_v7 = vld [vmem:[#allocation5 + $0x84] ss:$48 sps:$4 sm:$0xff]  }
 0x118   :  { %2434 = vmatprep.mubr.bf16.mxu0 %v9470_v51  ;;  %2660 = vmatprep.mubr.bf16.mxu1 %v9470_v51 }
 0x11a   :  { %2433 = vmatpush1.bf16.msra.mxu0 %v8641_v11  ;;  %2659 = vmatpush1.bf16.msra.mxu1 %v8644_v13  ;;  %v8706_v11 = vld [vmem:[#allocation5 + $0x8c] ss:$48 sps:$4 sm:$0xff]   ;;  %v8701_v13 = vld [vmem:[#allocation5 + $0x80] ss:$48 sps:$4 sm:$0xff]  }
 0x11b   :  { %2741 = vmatprep.subr.bf16.mxu1 %v8649_v14  ;;  %2515 = vmatprep.subr.bf16.mxu0 %v8652_v15  ;;  %v8704_v14 = vld [vmem:[#allocation5 + $0x88] ss:$48 sps:$4 sm:$0xff]   ;;  %v8709_v15 = vld [vmem:[#allocation5 + $0xe4] ss:$48 sps:$4 sm:$0xff]  }
 0x11d   :  { %2435 = vmatmul.mubr.bf16.vlgmr.msra.gmra.mrb[32].mxu0 %v9474_v9  ;;  %2661 = vmatmul.mubr.bf16.vlgmr.msra.gmra.mrb[32].mxu1 %v9474_v9 }
 0x11e   :  { %2742 = vmatpush1.bf16.msra.mxu1 %v8647_v18  ;;  %2516 = vmatpush1.bf16.msra.mxu0 %v8650_v21  ;;  %v8712_v18 = vld [vmem:[#allocation5 + $0xec] ss:$48 sps:$4 sm:$0xff]   ;;  %v8707_v21 = vld [vmem:[#allocation5 + $0xe0] ss:$48 sps:$4 sm:$0xff]  }
 0x11f   :  { %2444 = vmatprep.mubr.bf16.mxu0 %v9476_v12  ;;  %2670 = vmatprep.mubr.bf16.mxu1 %v9476_v12 }
 0x120   :  { %2743 = vmatprep.subr.bf16.mxu1 %v8655_v25  ;;  %2517 = vmatprep.subr.bf16.mxu0 %v8658_v27  ;;  %v8710_v25 = vld [vmem:[#allocation5 + $0xe8] ss:$48 sps:$4 sm:$0xff]   ;;  %v8715_v27 = vld [vmem:[#allocation5 + $0x144] ss:$48 sps:$4 sm:$0xff]  }
 0x122   :  { %2744 = vmatpush1.bf16.msra.mxu1 %v8653_v28  ;;  %2518 = vmatpush1.bf16.msra.mxu0 %v8656_v29  ;;  %v8718_v28 = vld [vmem:[#allocation5 + $0x14c] ss:$48 sps:$4 sm:$0xff]   ;;  %v8713_v29 = vld [vmem:[#allocation5 + $0x140] ss:$48 sps:$4 sm:$0xff]  }
 0x123   :  { %2745 = vmatprep.subr.bf16.mxu1 %v8661_v30  ;;  %2519 = vmatprep.subr.bf16.mxu0 %v8664_v31  ;;  %v8716_v30 = vld [vmem:[#allocation5 + $0x148] ss:$48 sps:$4 sm:$0xff]   ;;  %v8721_v31 = vld [vmem:[#allocation5 + $0x1a4] ss:$48 sps:$4 sm:$0xff]  }
 0x125   :  { %2445 = vmatmul.mubr.bf16.gmra.mrb[36].mxu0 %v9482_v23  ;;  %2671 = vmatmul.mubr.bf16.gmra.mrb[36].mxu1 %v9482_v23 }
 0x126   :  { %2454 = vmatprep.mubr.bf16.mxu0 %v9484_v24  ;;  %2680 = vmatprep.mubr.bf16.mxu1 %v9484_v24 }
 0x127   :  { %2746 = vmatpush1.bf16.msra.mxu1 %v8659_v32  ;;  %2520 = vmatpush1.bf16.msra.mxu0 %v8662_v33  ;;  %v8724_v32 = vld [vmem:[#allocation5 + $0x1ac] ss:$48 sps:$4 sm:$0xff]   ;;  %v8719_v33 = vld [vmem:[#allocation5 + $0x1a0] ss:$48 sps:$4 sm:$0xff]  }
 0x128   :  { %2747 = vmatprep.subr.bf16.mxu1 %v8667_v34  ;;  %2521 = vmatprep.subr.bf16.mxu0 %v8670_v36  ;;  %v8722_v34 = vld [vmem:[#allocation5 + $0x1a8] ss:$48 sps:$4 sm:$0xff]   ;;  %v8727_v36 = vld [vmem:[#allocation5 + $0x204] ss:$48 sps:$4 sm:$0xff]  }
 0x12b   :  { %2748 = vmatpush1.bf16.msra.mxu1 %v8665_v40  ;;  %2522 = vmatpush1.bf16.msra.mxu0 %v8668_v41  ;;  %v8730_v40 = vld [vmem:[#allocation5 + $0x20c] ss:$48 sps:$4 sm:$0xff]   ;;  %v8725_v41 = vld [vmem:[#allocation5 + $0x200] ss:$48 sps:$4 sm:$0xff]  }
 0x12c   :  { %2749 = vmatprep.subr.bf16.mxu1 %v8673_v42  ;;  %2523 = vmatprep.subr.bf16.mxu0 %v8676_v43  ;;  %v8728_v42 = vld [vmem:[#allocation5 + $0x208] ss:$48 sps:$4 sm:$0xff]   ;;  %v8733_v43 = vld [vmem:[#allocation5 + $0x264] ss:$48 sps:$4 sm:$0xff]  }
 0x12d   :  { %2455 = vmatmul.mubr.bf16.gmra.mrb[40].mxu0 %v9490_v37  ;;  %2681 = vmatmul.mubr.bf16.gmra.mrb[40].mxu1 %v9490_v37 }
 0x12e   :  { %2464 = vmatprep.mubr.bf16.mxu0 %v9492_v38  ;;  %2690 = vmatprep.mubr.bf16.mxu1 %v9492_v38 }
 0x12f   :  { %2750 = vmatpush1.bf16.msra.mxu1 %v8671_v44  ;;  %2524 = vmatpush1.bf16.msra.mxu0 %v8674_v45  ;;  %v8736_v44 = vld [vmem:[#allocation5 + $0x26c] ss:$48 sps:$4 sm:$0xff]   ;;  %v8731_v45 = vld [vmem:[#allocation5 + $0x260] ss:$48 sps:$4 sm:$0xff]  }
 0x130   :  { %2751 = vmatprep.subr.bf16.mxu1 %v8679_v46  ;;  %2525 = vmatprep.subr.bf16.mxu0 %v8682_v47  ;;  %v8734_v46 = vld [vmem:[#allocation5 + $0x268] ss:$48 sps:$4 sm:$0xff]   ;;  %v8739_v47 = vld [vmem:[#allocation5 + $0x2c4] ss:$48 sps:$4 sm:$0xff]  }
 0x133   :  { %2752 = vmatpush1.bf16.msra.mxu1 %v8677_v48  ;;  %2526 = vmatpush1.bf16.msra.mxu0 %v8680_v54  ;;  %v8742_v48 = vld [vmem:[#allocation5 + $0x2cc] ss:$48 sps:$4 sm:$0xff]   ;;  %v8737_v54 = vld [vmem:[#allocation5 + $0x2c0] ss:$48 sps:$4 sm:$0xff]  }
 0x134   :  { %2753 = vmatprep.subr.bf16.mxu1 %v8685_v55  ;;  %2527 = vmatprep.subr.bf16.mxu0 %v8688_v56  ;;  %v8740_v55 = vld [vmem:[#allocation5 + $0x2c8] ss:$48 sps:$4 sm:$0xff]   ;;  %v8745_v56 = vld [vmem:[#allocation5 + $0x324] ss:$48 sps:$4 sm:$0xff]  }
 0x135   :  { %2465 = vmatmul.mubr.bf16.gmra.mrb[44].mxu0 %v9498_v52  ;;  %2691 = vmatmul.mubr.bf16.gmra.mrb[44].mxu1 %v9498_v52 }
 0x136   :  { %2474 = vmatprep.mubr.bf16.mxu0 %v9500_v53  ;;  %2700 = vmatprep.mubr.bf16.mxu1 %v9500_v53 }
 0x137   :  { %2754 = vmatpush1.bf16.msra.mxu1 %v8683_v57  ;;  %2528 = vmatpush1.bf16.msra.mxu0 %v8686_v58  ;;  %v8748_v57 = vld [vmem:[#allocation5 + $0x32c] ss:$48 sps:$4 sm:$0xff]   ;;  %v8743_v58 = vld [vmem:[#allocation5 + $0x320] ss:$48 sps:$4 sm:$0xff]  }
 0x138   :  { %2755 = vmatprep.subr.bf16.mxu1 %v8691_v59  ;;  %2529 = vmatprep.subr.bf16.mxu0 %v8694_v60  ;;  %v8746_v59 = vld [vmem:[#allocation5 + $0x328] ss:$48 sps:$4 sm:$0xff]   ;;  %v8751_v60 = vld [vmem:[#allocation5 + $0x384] ss:$48 sps:$4 sm:$0xff]  }
 0x13b   :  { %2756 = vmatpush1.bf16.msra.mxu1 %v8689_v61  ;;  %2530 = vmatpush1.bf16.msra.mxu0 %v8692_v62  ;;  %v8754_v61 = vld [vmem:[#allocation5 + $0x38c] ss:$48 sps:$4 sm:$0xff]   ;;  %v8749_v62 = vld [vmem:[#allocation5 + $0x380] ss:$48 sps:$4 sm:$0xff]  }
 0x13c   :  { %2854 = vmatprep.subr.bf16.mxu0 %v8697_v63  ;;  %3080 = vmatprep.subr.bf16.mxu1 %v8700_v1  ;;  %v8752_v63 = vld [vmem:[#allocation5 + $0x388] ss:$48 sps:$4 sm:$0xff]   ;;  %v8757_v1 = vld [vmem:[#allocation5 + $0x3e4] ss:$48 sps:$4 sm:$0xff]  }
 0x13d   :  { %2475 = vmatmul.mubr.bf16.gmra.mrb[48].mxu0 %v9506_v2  ;;  %2701 = vmatmul.mubr.bf16.gmra.mrb[48].mxu1 %v9506_v2 }
 0x13e   :  { %2484 = vmatprep.mubr.bf16.mxu0 %v9508_v3  ;;  %2710 = vmatprep.mubr.bf16.mxu1 %v9508_v3 }
 0x145   :  { %2485 = vmatmul.mubr.bf16.gmra.mrb[52].mxu0 %v9514_v8  ;;  %2711 = vmatmul.mubr.bf16.gmra.mrb[52].mxu1 %v9514_v8 }
 0x146   :  { %2494 = vmatprep.mubr.bf16.mxu0 %v9516_v10  ;;  %2720 = vmatprep.mubr.bf16.mxu1 %v9516_v10 }
 0x14d   :  { %2495 = vmatmul.mubr.bf16.gmra.mrb[56].mxu0 %v9522_v16  ;;  %2721 = vmatmul.mubr.bf16.gmra.mrb[56].mxu1 %v9522_v16 }
 0x14e   :  { %2504 = vmatprep.mubr.bf16.mxu0 %v9524_v17  ;;  %2730 = vmatprep.mubr.bf16.mxu1 %v9524_v17 }
 0x155   :  { %2505 = vmatmul.mubr.bf16.gmra.mrb[60].mxu0 %v9530_v20  ;;  %2731 = vmatmul.mubr.bf16.gmra.mrb[60].mxu1 %v9530_v20 }
 0x156   :  { %2547 = vmatprep.mubr.bf16.mxu0 %v10660_v22  ;;  %2773 = vmatprep.mubr.bf16.mxu1 %v10660_v22 }
 0x15d   :  { %2548 = vmatmul.mubr.bf16.vlgmr.msra.gmra.mrb[32].mxu0 %v9536_v26  ;;  %2774 = vmatmul.mubr.bf16.vlgmr.msra.gmra.mrb[32].mxu1 %v9536_v26 }
 0x15e   :  { %2855 = vmatpush1.bf16.msra.mxu0 %v8695_v4  ;;  %3081 = vmatpush1.bf16.msra.mxu1 %v8698_v6  ;;  %v8760_v4 = vld [vmem:[#allocation5 + $0x3ec] ss:$48 sps:$4 sm:$0xff]   ;;  %v8755_v6 = vld [vmem:[#allocation5 + $0x3e0] ss:$48 sps:$4 sm:$0xff]  }
 0x15f   :  { %2856 = vmatprep.subr.bf16.mxu0 %v8703_v7  ;;  %3082 = vmatprep.subr.bf16.mxu1 %v8706_v11  ;;  %v8758_v7 = vld [vmem:[#allocation5 + $0x3e8] ss:$48 sps:$4 sm:$0xff]   ;;  %v8763_v11 = vld [vmem:[#allocation5 + $0x444] ss:$48 sps:$4 sm:$0xff]  }
 0x160   :  { %2557 = vmatprep.mubr.bf16.mxu0 %v10660_v22  ;;  %2783 = vmatprep.mubr.bf16.mxu1 %v10660_v22 }
 0x162   :  { %2857 = vmatpush1.bf16.msra.mxu0 %v8701_v13  ;;  %3083 = vmatpush1.bf16.msra.mxu1 %v8704_v14  ;;  %v8766_v13 = vld [vmem:[#allocation5 + $0x44c] ss:$48 sps:$4 sm:$0xff]   ;;  %v8761_v14 = vld [vmem:[#allocation5 + $0x440] ss:$48 sps:$4 sm:$0xff]  }
 0x163   :  { %2858 = vmatprep.subr.bf16.mxu0 %v8709_v15  ;;  %3084 = vmatprep.subr.bf16.mxu1 %v8712_v18  ;;  %v8764_v15 = vld [vmem:[#allocation5 + $0x448] ss:$48 sps:$4 sm:$0xff]   ;;  %v8769_v18 = vld [vmem:[#allocation5 + $0x4a4] ss:$48 sps:$4 sm:$0xff]  }
 0x165   :  { %2558 = vmatmul.mubr.bf16.gmra.mrb[36].mxu0 %v9542_v39  ;;  %2784 = vmatmul.mubr.bf16.gmra.mrb[36].mxu1 %v9542_v39 }
 0x166   :  { %2859 = vmatpush1.bf16.msra.mxu0 %v8707_v21  ;;  %3085 = vmatpush1.bf16.msra.mxu1 %v8710_v25  ;;  %v8772_v21 = vld [vmem:[#allocation5 + $0x4ac] ss:$48 sps:$4 sm:$0xff]   ;;  %v8767_v25 = vld [vmem:[#allocation5 + $0x4a0] ss:$48 sps:$4 sm:$0xff]  }
 0x167   :  { %2860 = vmatprep.subr.bf16.mxu0 %v8715_v27  ;;  %3086 = vmatprep.subr.bf16.mxu1 %v8718_v28  ;;  %v8770_v27 = vld [vmem:[#allocation5 + $0x4a8] ss:$48 sps:$4 sm:$0xff]   ;;  %v8775_v28 = vld [vmem:[#allocation5 + $0x504] ss:$48 sps:$4 sm:$0xff]  }
 0x168   :  { %2567 = vmatprep.mubr.bf16.mxu0 %v10660_v22  ;;  %2793 = vmatprep.mubr.bf16.mxu1 %v10660_v22 }
 0x16a   :  { %2861 = vmatpush1.bf16.msra.mxu0 %v8713_v29  ;;  %3087 = vmatpush1.bf16.msra.mxu1 %v8716_v30  ;;  %v8778_v29 = vld [vmem:[#allocation5 + $0x50c] ss:$48 sps:$4 sm:$0xff]   ;;  %v8773_v30 = vld [vmem:[#allocation5 + $0x500] ss:$48 sps:$4 sm:$0xff]  }
 0x16b   :  { %2862 = vmatprep.subr.bf16.mxu0 %v8721_v31  ;;  %3088 = vmatprep.subr.bf16.mxu1 %v8724_v32  ;;  %v8776_v31 = vld [vmem:[#allocation5 + $0x508] ss:$48 sps:$4 sm:$0xff]   ;;  %v8781_v32 = vld [vmem:[#allocation5 + $0x564] ss:$48 sps:$4 sm:$0xff]  }
 0x16d   :  { %2568 = vmatmul.mubr.bf16.gmra.mrb[40].mxu0 %v9548_v50  ;;  %2794 = vmatmul.mubr.bf16.gmra.mrb[40].mxu1 %v9548_v50 }
 0x16e   :  { %2863 = vmatpush1.bf16.msra.mxu0 %v8719_v33  ;;  %3089 = vmatpush1.bf16.msra.mxu1 %v8722_v34  ;;  %v8784_v33 = vld [vmem:[#allocation5 + $0x56c] ss:$48 sps:$4 sm:$0xff]   ;;  %v8779_v34 = vld [vmem:[#allocation5 + $0x560] ss:$48 sps:$4 sm:$0xff]  }
 0x16f   :  { %2864 = vmatprep.subr.bf16.mxu0 %v8727_v36  ;;  %3090 = vmatprep.subr.bf16.mxu1 %v8730_v40  ;;  %v8782_v36 = vld [vmem:[#allocation5 + $0x568] ss:$48 sps:$4 sm:$0xff]   ;;  %v8787_v40 = vld [vmem:[#allocation5 + $0x5c4] ss:$48 sps:$4 sm:$0xff]  }
 0x170   :  { %2577 = vmatprep.mubr.bf16.mxu0 %v10660_v22  ;;  %2803 = vmatprep.mubr.bf16.mxu1 %v10660_v22 }
 0x172   :  { %2865 = vmatpush1.bf16.msra.mxu0 %v8725_v41  ;;  %3091 = vmatpush1.bf16.msra.mxu1 %v8728_v42  ;;  %v8790_v41 = vld [vmem:[#allocation5 + $0x5cc] ss:$48 sps:$4 sm:$0xff]   ;;  %v8785_v42 = vld [vmem:[#allocation5 + $0x5c0] ss:$48 sps:$4 sm:$0xff]  }
 0x173   :  { %2866 = vmatprep.subr.bf16.mxu0 %v8733_v43  ;;  %3092 = vmatprep.subr.bf16.mxu1 %v8736_v44  ;;  %v8788_v43 = vld [vmem:[#allocation5 + $0x5c8] ss:$48 sps:$4 sm:$0xff]   ;;  %v8793_v44 = vld [vmem:[#allocation5 + $0x62c] ss:$48 sps:$4 sm:$0xff]  }
 0x175   :  { %2578 = vmatmul.mubr.bf16.gmra.mrb[44].mxu0 %v9554_v0  ;;  %2804 = vmatmul.mubr.bf16.gmra.mrb[44].mxu1 %v9554_v0 }
 0x176   :  { %2867 = vmatpush1.bf16.msra.mxu0 %v8731_v45  ;;  %3093 = vmatpush1.bf16.msra.mxu1 %v8734_v46  ;;  %v8796_v45 = vld [vmem:[#allocation5 + $0x624] ss:$48 sps:$4 sm:$0xff]   ;;  %v8791_v46 = vld [vmem:[#allocation5 + $0x628] ss:$48 sps:$4 sm:$0xff]  }
 0x177   :  { %2868 = vmatprep.subr.bf16.mxu0 %v8739_v47  ;;  %3094 = vmatprep.subr.bf16.mxu1 %v8742_v48  ;;  %v8794_v47 = vld [vmem:[#allocation5 + $0x620] ss:$48 sps:$4 sm:$0xff]   ;;  %v8799_v48 = vld [vmem:[#allocation5 + $0x68c] ss:$48 sps:$4 sm:$0xff]  }
 0x178   :  { %2587 = vmatprep.mubr.bf16.mxu0 %v10660_v22  ;;  %2813 = vmatprep.mubr.bf16.mxu1 %v10660_v22 }
 0x17a   :  { %2869 = vmatpush1.bf16.msra.mxu0 %v8737_v54  ;;  %3095 = vmatpush1.bf16.msra.mxu1 %v8740_v55  ;;  %v8802_v54 = vld [vmem:[#allocation5 + $0x684] ss:$48 sps:$4 sm:$0xff]   ;;  %v8797_v55 = vld [vmem:[#allocation5 + $0x688] ss:$48 sps:$4 sm:$0xff]  }
 0x17b   :  { %2870 = vmatprep.subr.bf16.mxu0 %v8745_v56  ;;  %3096 = vmatprep.subr.bf16.mxu1 %v8748_v57  ;;  %v8800_v56 = vld [vmem:[#allocation5 + $0x680] ss:$48 sps:$4 sm:$0xff]   ;;  %v8808_v57 = vld [vmem:[#allocation5 + $0x6e4] ss:$48 sps:$4 sm:$0xff]  }
 0x17d   :  { %2588 = vmatmul.mubr.bf16.gmra.mrb[48].mxu0 %v9560_v19  ;;  %2814 = vmatmul.mubr.bf16.gmra.mrb[48].mxu1 %v9560_v19 }
 0x17e   :  { %2871 = vmatpush1.bf16.msra.mxu0 %v8743_v58  ;;  %3097 = vmatpush1.bf16.msra.mxu1 %v8746_v59  ;;  %v450_v58 = vlaneseq  ;;  %v8803_v59 = vld [vmem:[#allocation5 + $0x6e8] ss:$48 sps:$4 sm:$0xff]  }
 0x17f   :  { %2872 = vmatprep.subr.bf16.mxu0 %v8751_v60  ;;  %3098 = vmatprep.subr.bf16.mxu1 %v8754_v61  ;;  %v8806_v60 = vld [vmem:[#allocation5 + $0x6e0] ss:$48 sps:$4 sm:$0xff]   ;;  %v8811_v61 = vld [vmem:[#allocation5 + $0x74c] ss:$48 sps:$4 sm:$0xff]  }
 0x180   :  { %2597 = vmatprep.mubr.bf16.mxu0 %v10660_v22  ;;  %2823 = vmatprep.mubr.bf16.mxu1 %v10660_v22 }
 0x182   :  { %2873 = vmatpush1.bf16.msra.mxu0 %v8749_v62  ;;  %3099 = vmatpush1.bf16.msra.mxu1 %v8752_v63  ;;  %v8814_v62 = vld [vmem:[#allocation5 + $0x744] ss:$48 sps:$4 sm:$0xff]   ;;  %v8812_v63 = vld [vmem:[#allocation5 + $0x740] ss:$48 sps:$4 sm:$0xff]  }
 0x183   :  { %2874 = vmatprep.subr.bf16.mxu0 %v8757_v1  ;;  %3100 = vmatprep.subr.bf16.mxu1 %v8760_v4  ;;  %v8817_v1 = vld [vmem:[#allocation5 + $0x7ac] ss:$48 sps:$4 sm:$0xff]   ;;  %v8820_v4 = vld [vmem:[#allocation5 + $0x7a4] ss:$48 sps:$4 sm:$0xff]  }
 0x185   :  { %2598 = vmatmul.mubr.bf16.gmra.mrb[52].mxu0 %v9566_v35  ;;  %2824 = vmatmul.mubr.bf16.gmra.mrb[52].mxu1 %v9566_v35 }
 0x186   :  { %2875 = vmatpush1.bf16.msra.mxu0 %v8755_v6  ;;  %3101 = vmatpush1.bf16.msra.mxu1 %v8758_v7  ;;  %v446_v6 = vld [vmem:[#allocation7] sm:$0xff] }
 0x187   :  { %2876 = vmatprep.subr.bf16.mxu0 %v8763_v11  ;;  %3102 = vmatprep.subr.bf16.mxu1 %v8766_v13 }
 0x188   :  { %2607 = vmatprep.mubr.bf16.mxu0 %v10660_v22  ;;  %2833 = vmatprep.mubr.bf16.mxu1 %v10660_v22 }
 0x18a   :  { %2877 = vmatpush1.bf16.msra.mxu0 %v8761_v14  ;;  %3103 = vmatpush1.bf16.msra.mxu1 %v8764_v15  ;;  %v8818_v14 = vld [vmem:[#allocation5 + $0x7a0] ss:$48 sps:$4 sm:$0xff]   ;;  %v8823_v15 = vld [vmem:[#allocation5 + $0x80c] ss:$48 sps:$4 sm:$0xff]  }
 0x18b   :  { %2878 = vmatprep.subr.bf16.mxu0 %v8769_v18  ;;  %3104 = vmatprep.subr.bf16.mxu1 %v8772_v21  ;;  %v8826_v18 = vld [vmem:[#allocation5 + $0x804] ss:$48 sps:$4 sm:$0xff]  }
 0x18d   :  { %2608 = vmatmul.mubr.bf16.gmra.mrb[56].mxu0 %v9572_v49  ;;  %2834 = vmatmul.mubr.bf16.gmra.mrb[56].mxu1 %v9572_v49 }
 0x18e   :  { %2879 = vmatpush1.bf16.msra.mxu0 %v8767_v25  ;;  %3105 = vmatpush1.bf16.msra.mxu1 %v8770_v27 }
 0x18f   :  { %2880 = vmatprep.subr.bf16.mxu0 %v8775_v28  ;;  %3106 = vmatprep.subr.bf16.mxu1 %v8778_v29  ;;  %v8821_v29 = vld [vmem:[#allocation5 + $0x808] ss:$48 sps:$4 sm:$0xff]  }
 0x190   :  { %2617 = vmatprep.mubr.bf16.mxu0 %v10660_v22  ;;  %2843 = vmatprep.mubr.bf16.mxu1 %v10660_v22 }
 0x192   :  { %2881 = vmatpush1.bf16.msra.mxu0 %v8773_v30  ;;  %3107 = vmatpush1.bf16.msra.mxu1 %v8776_v31  ;;  %v8829_v30 = vld [vmem:[#allocation5 + $0x86c] ss:$48 sps:$4 sm:$0xff]  }
 0x193   :  { %2882 = vmatprep.subr.bf16.mxu0 %v8781_v32  ;;  %3108 = vmatprep.subr.bf16.mxu1 %v8784_v33  ;;  %v8832_v33 = vld [vmem:[#allocation5 + $0x864] ss:$48 sps:$4 sm:$0xff]  }
 0x195   :  { %2618 = vmatmul.mubr.bf16.gmra.mrb[60].mxu0 %v9578_v5  ;;  %2844 = vmatmul.mubr.bf16.gmra.mrb[60].mxu1 %v9578_v5 }
 0x196   :  { %2883 = vmatpush1.bf16.msra.mxu0 %v8779_v34  ;;  %3109 = vmatpush1.bf16.msra.mxu1 %v8782_v36 }
 0x197   :  { %2884 = vmatprep.subr.bf16.mxu0 %v8787_v40  ;;  %3110 = vmatprep.subr.bf16.mxu1 %v8790_v41 }
 0x198   :  { %2886 = vmatprep.mubr.bf16.mxu0 %v9470_v51  ;;  %3112 = vmatprep.mubr.bf16.mxu1 %v9470_v51  ;;  %v8805_v51 = vld [vmem:[#allocation5 + $0x6ec] ss:$48 sps:$4 sm:$0xff]  }
 0x19a   :  { %2885 = vmatpush1.bf16.msra.mxu0 %v8785_v42  ;;  %3111 = vmatpush1.bf16.msra.mxu1 %v8788_v43  ;;  %v8827_v42 = vld [vmem:[#allocation5 + $0x868] ss:$48 sps:$4 sm:$0xff]   ;;  %v8830_v43 = vld [vmem:[#allocation5 + $0x860] ss:$48 sps:$4 sm:$0xff]  }
 0x19b   :  { %3193 = vmatprep.subr.bf16.mxu1 %v8793_v44  ;;  %2967 = vmatprep.subr.bf16.mxu0 %v8796_v45 }
 0x19d   :  { %2887 = vmatmul.mubr.bf16.vlgmr.msra.gmra.mrb[64].mxu0 %v9474_v9  ;;  %3113 = vmatmul.mubr.bf16.vlgmr.msra.gmra.mrb[64].mxu1 %v9474_v9  ;;  %v9652_v9 = vshrl.u32 %v450_v58, 7 }
 0x19e   :  { %3194 = vmatpush1.bf16.msra.mxu1 %v8791_v46  ;;  %2968 = vmatpush1.bf16.msra.mxu0 %v8794_v47 }
 0x19f   :  { %2896 = vmatprep.mubr.bf16.mxu0 %v9476_v12  ;;  %3122 = vmatprep.mubr.bf16.mxu1 %v9476_v12  ;;  %v8809_v12 = vld [vmem:[#allocation5 + $0x748] ss:$48 sps:$4 sm:$0xff]   ;;  %v9659_v7 = vsub.s32 0, %v9652_v9  ;;  %v9662_v11 = vsub.s32 2, %v9652_v9  ;;  %v10659_v13 = vsub.s32 3, %v9652_v9 }
 0x1a0   :  { %3195 = vmatprep.subr.bf16.mxu1 %v8799_v48  ;;  %2969 = vmatprep.subr.bf16.mxu0 %v8802_v54 }
 0x1a1   :  { %v9671_v21 = vrot.slane %v446_v6, %v9659_v7  ;;  %v9674_v25 = vrot.slane %v446_v6, %v9662_v11  ;;  %v9681_v28 = vrot.slane %v446_v6, %v10659_v13 }
 0x1a2   :  { %3196 = vmatpush1.bf16.msra.mxu1 %v8797_v55  ;;  %2970 = vmatpush1.bf16.msra.mxu0 %v8800_v56  ;;  %v8835_v56 = vld [vmem:[#allocation5 + $0x8cc] ss:$48 sps:$4 sm:$0xff]  }
 0x1a3   :  { %3197 = vmatprep.subr.bf16.mxu1 %v8805_v51  ;;  %2971 = vmatprep.subr.bf16.mxu0 %v8808_v57 }
 0x1a5   :  { %2897 = vmatmul.mubr.bf16.gmra.mrb[68].mxu0 %v9482_v23  ;;  %3123 = vmatmul.mubr.bf16.gmra.mrb[68].mxu1 %v9482_v23  ;;  %v9665_v23 = vsub.s32 1, %v9652_v9 }
 0x1a6   :  { %2906 = vmatprep.mubr.bf16.mxu0 %v9484_v24  ;;  %3132 = vmatprep.mubr.bf16.mxu1 %v9484_v24  ;;  %v8815_v24 = vld [vmem:[#allocation5 + $0x7a8] ss:$48 sps:$4 sm:$0xff]  }
 0x1a7   :  { %3198 = vmatpush1.bf16.msra.mxu1 %v8803_v59  ;;  %2972 = vmatpush1.bf16.msra.mxu0 %v8806_v60  ;;  %v9677_v27 = vrot.slane %v446_v6, %v9665_v23  ;;  %v8838_v60 = vld [vmem:[#allocation5 + $0x8c4] ss:$48 sps:$4 sm:$0xff]  }
 0x1a8   :  { %3199 = vmatprep.subr.bf16.mxu1 %v8811_v61  ;;  %2973 = vmatprep.subr.bf16.mxu0 %v8814_v62 }
 0x1ab   :  { %3200 = vmatpush1.bf16.msra.mxu1 %v8809_v12  ;;  %2974 = vmatpush1.bf16.msra.mxu0 %v8812_v63 }
 0x1ac   :  { %3201 = vmatprep.subr.bf16.mxu1 %v8817_v1  ;;  %2975 = vmatprep.subr.bf16.mxu0 %v8820_v4  ;;  %v8833_v1 = vld [vmem:[#allocation5 + $0x8c8] ss:$48 sps:$4 sm:$0xff]   ;;  %v8836_v4 = vld [vmem:[#allocation5 + $0x8c0] ss:$48 sps:$4 sm:$0xff]  }
 0x1ad   :  { %2907 = vmatmul.mubr.bf16.gmra.mrb[72].mxu0 %v9490_v37  ;;  %3133 = vmatmul.mubr.bf16.gmra.mrb[72].mxu1 %v9490_v37  ;;  %v8824_v37 = vld [vmem:[#allocation5 + $0x800] ss:$48 sps:$4 sm:$0xff]  }
 0x1ae   :  { %2916 = vmatprep.mubr.bf16.mxu0 %v9492_v38  ;;  %3142 = vmatprep.mubr.bf16.mxu1 %v9492_v38 }
 0x1af   :  { %3202 = vmatpush1.bf16.msra.mxu1 %v8815_v24  ;;  %2976 = vmatpush1.bf16.msra.mxu0 %v8818_v14 }
 0x1b0   :  { %v2097_v31 = vpop.f32.mrb[0].mxu0  ;;  %v2323_v32 = vpop.f32.mrb[0].mxu1  ;;  %3203 = vmatprep.subr.bf16.mxu1 %v8823_v15  ;;  %2977 = vmatprep.subr.bf16.mxu0 %v8826_v18 }
 0x1b1   :  { %v7818_v34 = vadd.f32 %v2097_v31, %v9671_v21  ;;  %v7850_v36 = vadd.f32 %v2323_v32, %v9674_v25  ;;  %v2099_v40 = vpop.f32.mrb[1].mxu0  ;;  %v2325_v41 = vpop.f32.mrb[1].mxu1 }
 0x1b2   :  { %v7819_v38 = vadd.f32 %v2099_v40, %v9677_v27  ;;  %v7851_v44 = vadd.f32 %v2325_v41, %v9681_v28  ;;  %v2101_v45 = vpop.f32.mrb[2].mxu0  ;;  %v2327_v46 = vpop.f32.mrb[2].mxu1 }
 0x1b3   :  { %v7820_v47 = vadd.f32 %v2101_v45, %v9671_v21  ;;  %v7852_v48 = vadd.f32 %v2327_v46, %v9674_v25  ;;  %v2103_v54 = vpop.f32.mrb[3].mxu0  ;;  %v2329_v55 = vpop.f32.mrb[3].mxu1  ;;  %3204 = vmatpush1.bf16.msra.mxu1 %v8821_v29  ;;  %2978 = vmatpush1.bf16.msra.mxu0 %v8824_v37  ;;  %v3306_v51 = vmax.f32 %v7818_v34, 0.0  ;;  %v3308_v57 = vmax.f32 %v7850_v36, 0.0 }
 0x1b4   :  { %v7821_v58 = vadd.f32 %v2103_v54, %v9677_v27  ;;  %v7853_v59 = vadd.f32 %v2329_v55, %v9681_v28  ;;  %3205 = vmatprep.subr.bf16.mxu1 %v8829_v30  ;;  %2979 = vmatprep.subr.bf16.mxu0 %v8832_v33  ;;  %v3307_v61 = vmax.f32 %v7819_v38, 0.0  ;;  %v3309_v62 = vmax.f32 %v7851_v44, 0.0  ;;  %v8842_v30 = vld [vmem:[#allocation8 + $0xc8] ss:$12 sps:$4 sm:$0xff]  }
 0x1b5   :  { %v3318_v12 = vmax.f32 %v7820_v47, 0.0  ;;  %v3320_v63 = vmax.f32 %v7852_v48, 0.0  ;;  %2917 = vmatmul.mubr.bf16.gmra.mrb[76].mxu0 %v9498_v52  ;;  %3143 = vmatmul.mubr.bf16.gmra.mrb[76].mxu1 %v9498_v52  ;;  %v8841_v52 = vld [vmem:[#allocation8 + $0x4] ss:$12 sps:$4 sm:$0xff]  }
 0x1b6   :  { %v3319_v6 = vmax.f32 %v7821_v58, 0.0  ;;  %v3321_v24 = vmax.f32 %v7853_v59, 0.0  ;;  %2926 = vmatprep.mubr.bf16.mxu0 %v9500_v53  ;;  %3152 = vmatprep.mubr.bf16.mxu1 %v9500_v53 }
 0x1b7   :  { %v9697_v14 = vpack.c.bf16 %v3318_v12, %v3306_v51  ;;  %v9699_v15 = vpack.c.bf16 %v3320_v63, %v3308_v57  ;;  %3206 = vmatpush1.bf16.msra.mxu1 %v8827_v42  ;;  %2980 = vmatpush1.bf16.msra.mxu0 %v8830_v43 }
 0x1b8   :  { %v9701_v18 = vpack.c.bf16 %v3319_v6, %v3307_v61  ;;  %v2107_v29 = vpop.f32.mrb[4].mxu0  ;;  %v2333_v37 = vpop.f32.mrb[4].mxu1  ;;  %3207 = vmatprep.subr.bf16.mxu1 %v8835_v56  ;;  %2981 = vmatprep.subr.bf16.mxu0 %v8838_v60  ;;  %v9703_v31 = vpack.c.bf16 %v3321_v24, %v3309_v62 }
 0x1b9   :  { %v7822_v32 = vadd.f32 %v2107_v29, %v9671_v21  ;;  %v7854_v53 = vadd.f32 %v2333_v37, %v9674_v25  ;;  %v2109_v33 = vpop.f32.mrb[5].mxu0  ;;  %v2335_v34 = vpop.f32.mrb[5].mxu1 }
 0x1ba   :  { %v7823_v36 = vadd.f32 %v2109_v33, %v9677_v27  ;;  %v7855_v40 = vadd.f32 %v2335_v34, %v9681_v28  ;;  %v2111_v41 = vpop.f32.mrb[6].mxu0  ;;  %v2337_v42 = vpop.f32.mrb[6].mxu1 }
 0x1bb   :  { %v7824_v43 = vadd.f32 %v2111_v41, %v9671_v21  ;;  %v7856_v38 = vadd.f32 %v2337_v42, %v9674_v25  ;;  %v2113_v44 = vpop.f32.mrb[7].mxu0  ;;  %v2339_v45 = vpop.f32.mrb[7].mxu1  ;;  %3208 = vmatpush1.bf16.msra.mxu1 %v8833_v1  ;;  %2982 = vmatpush1.bf16.msra.mxu0 %v8836_v4  ;;  %v3330_v46 = vmax.f32 %v7822_v32, 0.0  ;;  %v3332_v47 = vmax.f32 %v7854_v53, 0.0 }
 0x1bc   :  { %v7825_v48 = vadd.f32 %v2113_v44, %v9677_v27  ;;  %v7857_v54 = vadd.f32 %v2339_v45, %v9681_v28  ;;  %5531 = vmatprep.subr.bf16.mxu0 %v8841_v52  ;;  %7434 = vmatprep.subr.bf16.mxu1 %v8842_v30  ;;  %v3331_v55 = vmax.f32 %v7823_v36, 0.0  ;;  %v3333_v56 = vmax.f32 %v7855_v40, 0.0 }
 0x1bd   :  { %v3342_v51 = vmax.f32 %v7824_v43, 0.0  ;;  %v3344_v57 = vmax.f32 %v7856_v38, 0.0  ;;  %2927 = vmatmul.mubr.bf16.gmra.mrb[80].mxu0 %v9506_v2  ;;  %3153 = vmatmul.mubr.bf16.gmra.mrb[80].mxu1 %v9506_v2 }
 0x1be   :  { %v3343_v58 = vmax.f32 %v7825_v48, 0.0  ;;  %v3345_v59 = vmax.f32 %v7857_v54, 0.0  ;;  %2936 = vmatprep.mubr.bf16.mxu0 %v9508_v3  ;;  %3162 = vmatprep.mubr.bf16.mxu1 %v9508_v3 }
 0x1bf   :  { %v9717_v60 = vpack.c.bf16 %v3342_v51, %v3330_v46  ;;  %v9719_v61 = vpack.c.bf16 %v3344_v57, %v3332_v47 }
 0x1c0   :  { %v9721_v62 = vpack.c.bf16 %v3343_v58, %v3331_v55  ;;  %v2117_v12 = vpop.f32.mrb[8].mxu0  ;;  %v2343_v63 = vpop.f32.mrb[8].mxu1  ;;  %v9723_v1 = vpack.c.bf16 %v3345_v59, %v3333_v56 }
 0x1c1   :  { %v7826_v4 = vadd.f32 %v2117_v12, %v9671_v21  ;;  %v7858_v2 = vadd.f32 %v2343_v63, %v9674_v25  ;;  %v2119_v6 = vpop.f32.mrb[9].mxu0  ;;  %v2345_v24 = vpop.f32.mrb[9].mxu1 }
 0x1c2   :  { %v7827_v29 = vadd.f32 %v2119_v6, %v9677_v27  ;;  %v7859_v3 = vadd.f32 %v2345_v24, %v9681_v28  ;;  %v2121_v37 = vpop.f32.mrb[10].mxu0  ;;  %v2347_v52 = vpop.f32.mrb[10].mxu1 }
 0x1c3   :  { %v7828_v30 = vadd.f32 %v2121_v37, %v9671_v21  ;;  %v7860_v32 = vadd.f32 %v2347_v52, %v9674_v25  ;;  %v2123_v53 = vpop.f32.mrb[11].mxu0  ;;  %v2349_v33 = vpop.f32.mrb[11].mxu1  ;;  %v3354_v34 = vmax.f32 %v7826_v4, 0.0  ;;  %v3356_v36 = vmax.f32 %v7858_v2, 0.0 }
 0x1c4   :  { %v7829_v40 = vadd.f32 %v2123_v53, %v9677_v27  ;;  %v7861_v41 = vadd.f32 %v2349_v33, %v9681_v28  ;;  %v3355_v42 = vmax.f32 %v7827_v29, 0.0  ;;  %v3357_v43 = vmax.f32 %v7859_v3, 0.0 }
 0x1c5   :  { %v3366_v38 = vmax.f32 %v7828_v30, 0.0  ;;  %v3368_v44 = vmax.f32 %v7860_v32, 0.0  ;;  %2937 = vmatmul.mubr.bf16.gmra.mrb[84].mxu0 %v9514_v8  ;;  %3163 = vmatmul.mubr.bf16.gmra.mrb[84].mxu1 %v9514_v8 }
 0x1c6   :  { %v3367_v45 = vmax.f32 %v7829_v40, 0.0  ;;  %v3369_v46 = vmax.f32 %v7861_v41, 0.0  ;;  %2946 = vmatprep.mubr.bf16.mxu0 %v9516_v10  ;;  %3172 = vmatprep.mubr.bf16.mxu1 %v9516_v10 }
 0x1c7   :  { %v9737_v47 = vpack.c.bf16 %v3366_v38, %v3354_v34  ;;  %v9739_v48 = vpack.c.bf16 %v3368_v44, %v3356_v36 }
 0x1c8   :  { %v9741_v54 = vpack.c.bf16 %v3367_v45, %v3355_v42  ;;  %v2127_v55 = vpop.f32.mrb[12].mxu0  ;;  %v2353_v56 = vpop.f32.mrb[12].mxu1  ;;  %v9743_v51 = vpack.c.bf16 %v3369_v46, %v3357_v43 }
 0x1c9   :  { %v7830_v57 = vadd.f32 %v2127_v55, %v9671_v21  ;;  %v7862_v8 = vadd.f32 %v2353_v56, %v9674_v25  ;;  %v2129_v58 = vpop.f32.mrb[13].mxu0  ;;  %v2355_v59 = vpop.f32.mrb[13].mxu1 }
 0x1ca   :  { %v7831_v12 = vadd.f32 %v2129_v58, %v9677_v27  ;;  %v7863_v10 = vadd.f32 %v2355_v59, %v9681_v28  ;;  %v2131_v63 = vpop.f32.mrb[14].mxu0  ;;  %v2357_v4 = vpop.f32.mrb[14].mxu1 }
 0x1cb   :  { %v7832_v2 = vadd.f32 %v2131_v63, %v9671_v21  ;;  %v7864_v6 = vadd.f32 %v2357_v4, %v9674_v25  ;;  %v2133_v24 = vpop.f32.mrb[15].mxu0  ;;  %v2359_v29 = vpop.f32.mrb[15].mxu1  ;;  %v3378_v3 = vmax.f32 %v7830_v57, 0.0  ;;  %v3380_v37 = vmax.f32 %v7862_v8, 0.0 }
 0x1cc   :  { %v7833_v52 = vadd.f32 %v2133_v24, %v9677_v27  ;;  %v7865_v30 = vadd.f32 %v2359_v29, %v9681_v28  ;;  %v3379_v32 = vmax.f32 %v7831_v12, 0.0  ;;  %v3381_v53 = vmax.f32 %v7863_v10, 0.0 }
 0x1cd   :  { %v3390_v33 = vmax.f32 %v7832_v2, 0.0  ;;  %v3392_v34 = vmax.f32 %v7864_v6, 0.0  ;;  %2947 = vmatmul.mubr.bf16.gmra.mrb[88].mxu0 %v9522_v16  ;;  %3173 = vmatmul.mubr.bf16.gmra.mrb[88].mxu1 %v9522_v16 }
 0x1ce   :  { %v3391_v36 = vmax.f32 %v7833_v52, 0.0  ;;  %v3393_v40 = vmax.f32 %v7865_v30, 0.0  ;;  %2956 = vmatprep.mubr.bf16.mxu0 %v9524_v17  ;;  %3182 = vmatprep.mubr.bf16.mxu1 %v9524_v17 }
 0x1cf   :  { %v9757_v41 = vpack.c.bf16 %v3390_v33, %v3378_v3  ;;  %v9759_v42 = vpack.c.bf16 %v3392_v34, %v3380_v37 }
 0x1d0   :  { %v9761_v43 = vpack.c.bf16 %v3391_v36, %v3379_v32  ;;  %v2137_v38 = vpop.f32.mrb[16].mxu0  ;;  %v2363_v44 = vpop.f32.mrb[16].mxu1  ;;  %v9763_v45 = vpack.c.bf16 %v3393_v40, %v3381_v53 }
 0x1d1   :  { %v7834_v46 = vadd.f32 %v2137_v38, %v9671_v21  ;;  %v7866_v16 = vadd.f32 %v2363_v44, %v9674_v25  ;;  %v2139_v55 = vpop.f32.mrb[17].mxu0  ;;  %v2365_v56 = vpop.f32.mrb[17].mxu1 }
 0x1d2   :  { %v7835_v57 = vadd.f32 %v2139_v55, %v9677_v27  ;;  %v7867_v17 = vadd.f32 %v2365_v56, %v9681_v28  ;;  %v2141_v8 = vpop.f32.mrb[18].mxu0  ;;  %v2367_v58 = vpop.f32.mrb[18].mxu1 }
 0x1d3   :  { %v7836_v59 = vadd.f32 %v2141_v8, %v9671_v21  ;;  %v7868_v12 = vadd.f32 %v2367_v58, %v9674_v25  ;;  %v2143_v10 = vpop.f32.mrb[19].mxu0  ;;  %v2369_v63 = vpop.f32.mrb[19].mxu1  ;;  %v3402_v6 = vmax.f32 %v7834_v46, 0.0  ;;  %v3404_v24 = vmax.f32 %v7866_v16, 0.0  ;;  %v8839_v8 = vld [vmem:[#allocation8] ss:$12 sps:$4 sm:$0xff]  }
 0x1d4   :  { %v7837_v4 = vadd.f32 %v2143_v10, %v9677_v27  ;;  %v7869_v2 = vadd.f32 %v2369_v63, %v9681_v28  ;;  %v3403_v37 = vmax.f32 %v7835_v57, 0.0  ;;  %v3405_v52 = vmax.f32 %v7867_v17, 0.0  ;;  %v8843_v58 = vld [vmem:[#allocation8 + $0x8] ss:$12 sps:$4 sm:$0xff]  }
 0x1d5   :  { %v3414_v29 = vmax.f32 %v7836_v59, 0.0  ;;  %v3416_v3 = vmax.f32 %v7868_v12, 0.0  ;;  %2957 = vmatmul.mubr.bf16.gmra.mrb[92].mxu0 %v9530_v20  ;;  %3183 = vmatmul.mubr.bf16.gmra.mrb[92].mxu1 %v9530_v20 }
 0x1d6   :  { %v3415_v30 = vmax.f32 %v7837_v4, 0.0  ;;  %v3417_v32 = vmax.f32 %v7869_v2, 0.0  ;;  %2999 = vmatprep.mubr.bf16.mxu0 %v10660_v22  ;;  %3225 = vmatprep.mubr.bf16.mxu1 %v10660_v22  ;;  %v8846_v4 = vld [vmem:[#allocation8 + $0x1c] ss:$12 sps:$4 sm:$0xff]  }
 0x1d7   :  { %v9777_v53 = vpack.c.bf16 %v3414_v29, %v3402_v6  ;;  %v9779_v33 = vpack.c.bf16 %v3416_v3, %v3404_v24  ;;  %v8850_v24 = vld [vmem:[#allocation8 + $0xe0] ss:$12 sps:$4 sm:$0xff]  }
 0x1d8   :  { %v9781_v34 = vpack.c.bf16 %v3415_v30, %v3403_v37  ;;  %v2147_v36 = vpop.f32.mrb[20].mxu0  ;;  %v2373_v40 = vpop.f32.mrb[20].mxu1  ;;  %v9783_v38 = vpack.c.bf16 %v3417_v32, %v3405_v52  ;;  %v8844_v30 = vld [vmem:[#allocation8 + $0x18] ss:$12 sps:$4 sm:$0xff]  }
 0x1d9   :  { %v7838_v20 = vadd.f32 %v2147_v36, %v9671_v21  ;;  %v7870_v44 = vadd.f32 %v2373_v40, %v9674_v25  ;;  %v2149_v46 = vpop.f32.mrb[21].mxu0  ;;  %v2375_v16 = vpop.f32.mrb[21].mxu1 }
 0x1da   :  { %v7839_v55 = vadd.f32 %v2149_v46, %v9677_v27  ;;  %v7871_v56 = vadd.f32 %v2375_v16, %v9681_v28  ;;  %v2151_v57 = vpop.f32.mrb[22].mxu0  ;;  %v2377_v17 = vpop.f32.mrb[22].mxu1  ;;  %v8851_v16 = vld [vmem:[#allocation8 + $0x20] ss:$12 sps:$4 sm:$0xff]  }
 0x1db   :  { %v7840_v59 = vadd.f32 %v2151_v57, %v9671_v21  ;;  %v7872_v12 = vadd.f32 %v2377_v17, %v9674_v25  ;;  %v2153_v10 = vpop.f32.mrb[23].mxu0  ;;  %v2379_v63 = vpop.f32.mrb[23].mxu1  ;;  %v3426_v29 = vmax.f32 %v7838_v20, 0.0  ;;  %v3428_v3 = vmax.f32 %v7870_v44, 0.0  ;;  %v8849_v20 = vld [vmem:[#allocation8 + $0x34] ss:$12 sps:$4 sm:$0xff]  }
 0x1dc   :  { %v7841_v2 = vadd.f32 %v2153_v10, %v9677_v27  ;;  %v7873_v6 = vadd.f32 %v2379_v63, %v9681_v28  ;;  %v3427_v32 = vmax.f32 %v7839_v55, 0.0  ;;  %v3429_v36 = vmax.f32 %v7871_v56, 0.0  ;;  %v8858_v44 = vld [vmem:[#allocation8 + $0xf8] ss:$12 sps:$4 sm:$0xff]  }
 0x1dd   :  { %v3438_v37 = vmax.f32 %v7840_v59, 0.0  ;;  %v3440_v52 = vmax.f32 %v7872_v12, 0.0  ;;  %3000 = vmatmul.mubr.bf16.vlgmr.msra.gmra.mrb[64].mxu0 %v9536_v26  ;;  %3226 = vmatmul.mubr.bf16.vlgmr.msra.gmra.mrb[64].mxu1 %v9536_v26 }
 0x1de   :  { %v3439_v40 = vmax.f32 %v7841_v2, 0.0  ;;  %v3441_v46 = vmax.f32 %v7873_v6, 0.0  ;;  %5532 = vmatpush1.bf16.msra.mxu0 %v8839_v8  ;;  %7435 = vmatpush3.bf16.msra.mxu1 %v8843_v58 }
 0x1df   :  { %v9795_v57 = vpack.c.bf16 %v3438_v37, %v3426_v29  ;;  %5533 = vmatprep.subr.bf16.mxu0 %v8846_v4  ;;  %3009 = vmatprep.mubr.bf16.mxu0 %v10660_v22  ;;  %v9798_v17 = vpack.c.bf16 %v3440_v52, %v3428_v3  ;;  %v8847_v29 = vld [vmem:[#allocation8 + $0x30] ss:$12 sps:$4 sm:$0xff]  }
 0x1e0   :  { %v9800_v59 = vpack.c.bf16 %v3439_v40, %v3427_v32  ;;  %v2157_v26 = vpop.f32.mrb[24].mxu0  ;;  %v2383_v12 = vpop.f32.mrb[24].mxu1  ;;  %3235 = vmatprep.mubr.bf16.mxu1 %v10660_v22  ;;  %7436 = vmatprep.subr.bf16.mxu1 %v8850_v24  ;;  %v9803_v55 = vpack.c.bf16 %v3441_v46, %v3429_v36  ;;  %v8854_v32 = vld [vmem:[#allocation8 + $0x4c] ss:$12 sps:$4 sm:$0xff]  }
 0x1e1   :  { %v7842_v56 = vadd.f32 %v2157_v26, %v9671_v21  ;;  %v7874_v8 = vadd.f32 %v2383_v12, %v9674_v25  ;;  %v2159_v58 = vpop.f32.mrb[25].mxu0  ;;  %v2385_v10 = vpop.f32.mrb[25].mxu1  ;;  %v8859_v46 = vld [vmem:[#allocation8 + $0x38] ss:$12 sps:$4 sm:$0xff]  }
 0x1e2   :  { %v7843_v63 = vadd.f32 %v2159_v58, %v9677_v27  ;;  %v7875_v4 = vadd.f32 %v2385_v10, %v9681_v28  ;;  %v2161_v2 = vpop.f32.mrb[26].mxu0  ;;  %v2387_v6 = vpop.f32.mrb[26].mxu1  ;;  %5534 = vmatpush1.bf16.msra.mxu0 %v8844_v30  ;;  %7437 = vmatpush3.bf16.msra.mxu1 %v8851_v16  ;;  %v8866_v16 = vld [vmem:[#allocation8 + $0x110] ss:$12 sps:$4 sm:$0xff]  }
 0x1e3   :  { %v7844_v3 = vadd.f32 %v2161_v2, %v9671_v21  ;;  %v7876_v24 = vadd.f32 %v2387_v6, %v9674_v25  ;;  %v2163_v37 = vpop.f32.mrb[27].mxu0  ;;  %v2389_v52 = vpop.f32.mrb[27].mxu1  ;;  %5535 = vmatprep.subr.bf16.mxu0 %v8849_v20  ;;  %7438 = vmatprep.subr.bf16.mxu1 %v8858_v44  ;;  %v3450_v26 = vmax.f32 %v7842_v56, 0.0  ;;  %v3452_v12 = vmax.f32 %v7874_v8, 0.0  ;;  %v8852_v44 = vld [vmem:[#allocation8 + $0x48] ss:$12 sps:$4 sm:$0xff]  }
 0x1e4   :  { %v7845_v36 = vadd.f32 %v2163_v37, %v9677_v27  ;;  %v7877_v40 = vadd.f32 %v2389_v52, %v9681_v28  ;;  %v3451_v10 = vmax.f32 %v7843_v63, 0.0  ;;  %v3453_v2 = vmax.f32 %v7875_v4, 0.0  ;;  %v8857_v56 = vld [vmem:[#allocation8 + $0x64] ss:$12 sps:$4 sm:$0xff]  }
 0x1e5   :  { %v3462_v58 = vmax.f32 %v7844_v3, 0.0  ;;  %v3464_v30 = vmax.f32 %v7876_v24, 0.0  ;;  %3010 = vmatmul.mubr.bf16.gmra.mrb[68].mxu0 %v9542_v39  ;;  %3236 = vmatmul.mubr.bf16.gmra.mrb[68].mxu1 %v9542_v39  ;;  %v8867_v63 = vld [vmem:[#allocation8 + $0x50] ss:$12 sps:$4 sm:$0xff]  }
 0x1e6   :  { %v3463_v6 = vmax.f32 %v7845_v36, 0.0  ;;  %v3465_v20 = vmax.f32 %v7877_v40, 0.0  ;;  %5536 = vmatpush1.bf16.msra.mxu0 %v8847_v29  ;;  %3019 = vmatprep.mubr.bf16.mxu0 %v10660_v22 }
 0x1e7   :  { %v9816_v37 = vpack.c.bf16 %v3462_v58, %v3450_v26  ;;  %5537 = vmatprep.subr.bf16.mxu0 %v8854_v32  ;;  %3245 = vmatprep.mubr.bf16.mxu1 %v10660_v22  ;;  %v9819_v8 = vpack.c.bf16 %v3464_v30, %v3452_v12  ;;  %v8855_v30 = vld [vmem:[#allocation8 + $0x60] ss:$12 sps:$4 sm:$0xff]  }
 0x1e8   :  { %v9821_v3 = vpack.c.bf16 %v3463_v6, %v3451_v10  ;;  %v2167_v39 = vpop.f32.mrb[28].mxu0  ;;  %v2393_v24 = vpop.f32.mrb[28].mxu1  ;;  %7439 = vmatpush3.bf16.msra.mxu1 %v8859_v46  ;;  %v9823_v4 = vpack.c.bf16 %v3465_v20, %v3453_v2  ;;  %v8862_v20 = vld [vmem:[#allocation8 + $0x7c] ss:$12 sps:$4 sm:$0xff]  }
 0x1e9   :  { %v7846_v29 = vadd.f32 %v2167_v39, %v9671_v21  ;;  %v7878_v52 = vadd.f32 %v2393_v24, %v9674_v25  ;;  %v2169_v36 = vpop.f32.mrb[29].mxu0  ;;  %v2395_v40 = vpop.f32.mrb[29].mxu1  ;;  %7440 = vmatprep.subr.bf16.mxu1 %v8866_v16  ;;  %v8860_v24 = vld [vmem:[#allocation8 + $0x78] ss:$12 sps:$4 sm:$0xff]  }
 0x1ea   :  { %v7847_v32 = vadd.f32 %v2169_v36, %v9677_v27  ;;  %v7879_v26 = vadd.f32 %v2395_v40, %v9681_v28  ;;  %v2171_v12 = vpop.f32.mrb[30].mxu0  ;;  %v2397_v58 = vpop.f32.mrb[30].mxu1  ;;  %5538 = vmatpush1.bf16.msra.mxu0 %v8852_v44  ;;  %v8874_v36 = vld [vmem:[#allocation8 + $0x128] ss:$12 sps:$4 sm:$0xff]  }
 0x1eb   :  { %v7848_v46 = vadd.f32 %v2171_v12, %v9671_v21  ;;  %v7880_v10 = vadd.f32 %v2397_v58, %v9674_v25  ;;  %v2173_v2 = vpop.f32.mrb[31].mxu0  ;;  %v2399_v6 = vpop.f32.mrb[31].mxu1  ;;  %5539 = vmatprep.subr.bf16.mxu0 %v8857_v56  ;;  %v3474_v40 = vmax.f32 %v7846_v29, 0.0  ;;  %v3476_v13 = vmax.f32 %v7878_v52, 0.0  ;;  %v8875_v21 = vld [vmem:[#allocation8 + $0x68] ss:$12 sps:$4 sm:$0xff]  }
 0x1ec   :  { %v7849_v39 = vadd.f32 %v2173_v2, %v9677_v27  ;;  %v7881_v16 = vadd.f32 %v2399_v6, %v9681_v28  ;;  %7441 = vmatpush3.bf16.msra.mxu1 %v8867_v63  ;;  %v3475_v25 = vmax.f32 %v7847_v32, 0.0  ;;  %v3477_v12 = vmax.f32 %v7879_v26, 0.0  ;;  %v8882_v28 = vld [vmem:[#allocation8 + $0x140] ss:$12 sps:$4 sm:$0xff]   ;;  %v8863_v32 = vld [vmem:[#allocation8 + $0x90] ss:$12 sps:$4 sm:$0xff]  }
 0x1ed   :  { %v3486_v22 = vmax.f32 %v7848_v46, 0.0  ;;  %v3488_v44 = vmax.f32 %v7880_v10, 0.0  ;;  %3020 = vmatmul.mubr.bf16.gmra.mrb[72].mxu0 %v9548_v50  ;;  %3246 = vmatmul.mubr.bf16.gmra.mrb[72].mxu1 %v9548_v50  ;;  %v10667_v27 = vmov 0   ;;  %v8865_v63 = vld [vmem:[#allocation8 + $0x94] ss:$12 sps:$4 sm:$0xff]  }
 0x1ee   :  { %v3487_v56 = vmax.f32 %v7849_v39, 0.0  ;;  %v3489_v58 = vmax.f32 %v7881_v16, 0.0  ;;  %5540 = vmatpush1.bf16.msra.mxu0 %v8855_v30  ;;  %3029 = vmatprep.mubr.bf16.mxu0 %v10667_v27  ;;  %v8870_v26 = vld [vmem:[#allocation8 + $0xac] ss:$12 sps:$4 sm:$0xff]   ;;  %v8873_v46 = vld [vmem:[#allocation8 + $0xc4] ss:$12 sps:$4 sm:$0xff]  }
 0x1ef   :  { %v9836_v2 = vpack.c.bf16 %v3486_v22, %v3474_v40  ;;  %5541 = vmatprep.subr.bf16.mxu0 %v8862_v20  ;;  %3255 = vmatprep.mubr.bf16.mxu1 %v10667_v27  ;;  %v9839_v29 = vpack.c.bf16 %v3488_v44, %v3476_v13  ;;  %v8883_v30 = vld [vmem:[#allocation8 + $0x80] ss:$12 sps:$4 sm:$0xff]   ;;  %v8890_v22 = vld [vmem:[#allocation8 + $0x158] ss:$12 sps:$4 sm:$0xff]   ;;  %v8868_v13 = vld [vmem:[#allocation8 + $0xa8] ss:$12 sps:$4 sm:$0xff]  }
 0x1f0   :  { %v9841_v52 = vpack.c.bf16 %v3487_v56, %v3475_v25  ;;  %7442 = vmatprep.subr.bf16.mxu1 %v8874_v36  ;;  %v9843_v50 = vpack.c.bf16 %v3489_v58, %v3477_v12  ;;  %v8891_v10 = vld [vmem:[#allocation8 + $0x98] ss:$12 sps:$4 sm:$0xff]   ;;  %v8871_v6 = vld [vmem:[#allocation8 + $0xc0] ss:$12 sps:$4 sm:$0xff]   ;;  %v8878_v20 = vld [vmem:[#allocation8 + $0xdc] ss:$12 sps:$4 sm:$0xff]  }
 0x1f1   :  { %7443 = vmatpush3.bf16.msra.mxu1 %v8875_v21  ;;  %v8898_v39 = vld [vmem:[#allocation8 + $0x170] ss:$12 sps:$4 sm:$0xff]   ;;  %v8876_v16 = vld [vmem:[#allocation8 + $0xd8] ss:$12 sps:$4 sm:$0xff]   ;;  %v8881_v36 = vld [vmem:[#allocation8 + $0xf4] ss:$12 sps:$4 sm:$0xff]  }
 0x1f2   :  { %5542 = vmatpush1.bf16.msra.mxu0 %v8860_v24  ;;  %7444 = vmatprep.subr.bf16.mxu1 %v8882_v28  ;;  %v8906_v24 = vld [vmem:[#allocation8 + $0x248] ss:$12 sps:$4 sm:$0xff]   ;;  %v8879_v40 = vld [vmem:[#allocation8 + $0xf0] ss:$12 sps:$4 sm:$0xff]   ;;  %v8886_v44 = vld [vmem:[#allocation8 + $0x10c] ss:$12 sps:$4 sm:$0xff]  }
 0x1f3   :  { %5543 = vmatprep.subr.bf16.mxu0 %v8865_v63  ;;  %v8889_v21 = vld [vmem:[#allocation8 + $0x124] ss:$12 sps:$4 sm:$0xff]   ;;  %v8887_v25 = vld [vmem:[#allocation8 + $0x120] ss:$12 sps:$4 sm:$0xff]   ;;  %v8894_v12 = vld [vmem:[#allocation8 + $0x13c] ss:$12 sps:$4 sm:$0xff]  }
 0x1f4   :  { %v8892_v56 = vld [vmem:[#allocation8 + $0x138] ss:$12 sps:$4 sm:$0xff]   ;;  %v8895_v58 = vld [vmem:[#allocation8 + $0x150] ss:$12 sps:$4 sm:$0xff]  }
 0x1f5   :  { %3030 = vmatmul.mubr.bf16.gmra.mrb[76].mxu0 %v9554_v0  ;;  %3256 = vmatmul.mubr.bf16.gmra.mrb[76].mxu1 %v9554_v0  ;;  %v8899_v0 = vld [vmem:[#allocation8 + $0xb0] ss:$12 sps:$4 sm:$0xff]   ;;  %v8902_v28 = vld [vmem:[#allocation8 + $0x16c] ss:$12 sps:$4 sm:$0xff]  }
 0x1f6   :  { %5544 = vmatpush1.bf16.msra.mxu0 %v8863_v32  ;;  %3039 = vmatprep.mubr.bf16.mxu0 %v10667_v27  ;;  %v8905_v63 = vld [vmem:[#allocation8 + $0x184] ss:$12 sps:$4 sm:$0xff]   ;;  %v8903_v32 = vld [vmem:[#allocation8 + $0x180] ss:$12 sps:$4 sm:$0xff]  }
 0x1f7   :  { %5545 = vmatprep.subr.bf16.mxu0 %v8870_v26  ;;  %3265 = vmatprep.mubr.bf16.mxu1 %v10667_v27  ;;  %v8910_v26 = vld [vmem:[#allocation8 + $0x19c] ss:$12 sps:$4 sm:$0xff]  }
 0x1f8   :  { %7445 = vmatpush3.bf16.msra.mxu1 %v8883_v30  ;;  %v8914_v30 = vld [vmem:[#allocation8 + $0x260] ss:$12 sps:$4 sm:$0xff]  }
 0x1f9   :  { %7446 = vmatprep.subr.bf16.mxu1 %v8890_v22  ;;  %v8915_v22 = vld [vmem:[#allocation8 + $0x1a0] ss:$12 sps:$4 sm:$0xff]  }
 0x1fa   :  { %5546 = vmatpush1.bf16.msra.mxu0 %v8868_v13  ;;  %v8922_v13 = vld [vmem:[#allocation8 + $0x278] ss:$12 sps:$4 sm:$0xff]  }
 0x1fb   :  { %5547 = vmatprep.subr.bf16.mxu0 %v8873_v46  ;;  %v8911_v46 = vld [vmem:[#allocation8 + $0x1b0] ss:$12 sps:$4 sm:$0xff]  }
 0x1fc   :  { %7447 = vmatpush3.bf16.msra.mxu1 %v8891_v10  ;;  %v8918_v10 = vld [vmem:[#allocation8 + $0x1cc] ss:$12 sps:$4 sm:$0xff]  }
 0x1fd   :  { %3040 = vmatmul.mubr.bf16.gmra.mrb[80].mxu0 %v9560_v19  ;;  %3266 = vmatmul.mubr.bf16.gmra.mrb[80].mxu1 %v9560_v19  ;;  %v8884_v19 = vld [vmem:[#allocation8 + $0x108] ss:$12 sps:$4 sm:$0xff]  }
 0x1fe   :  { %5548 = vmatpush1.bf16.msra.mxu0 %v8871_v6  ;;  %3049 = vmatprep.mubr.bf16.mxu0 %v10667_v27  ;;  %v8923_v6 = vld [vmem:[#allocation8 + $0x1b8] ss:$12 sps:$4 sm:$0xff]  }
 0x1ff   :  { %5549 = vmatprep.subr.bf16.mxu0 %v8878_v20  ;;  %3275 = vmatprep.mubr.bf16.mxu1 %v10667_v27  ;;  %v8921_v20 = vld [vmem:[#allocation8 + $0x1e4] ss:$12 sps:$4 sm:$0xff]  }
 0x200   :  { %7448 = vmatprep.subr.bf16.mxu1 %v8898_v39  ;;  %v8931_v39 = vld [vmem:[#allocation8 + $0x1d0] ss:$12 sps:$4 sm:$0xff]  }
 0x201   :  { %7449 = vmatpush3.bf16.msra.mxu1 %v8899_v0  ;;  %v468_v0 = vsub.s32 4, %v9652_v9 }
 0x202   :  { %5550 = vmatpush1.bf16.msra.mxu0 %v8876_v16  ;;  %7498 = vmatprep.subr.bf16.mxu1 %v8906_v24  ;;  %v476_v16 = vsub.s32 6, %v9652_v9  ;;  %v8919_v24 = vld [vmem:[#allocation8 + $0x1e0] ss:$12 sps:$4 sm:$0xff]  }
 0x203   :  { %5551 = vmatprep.subr.bf16.mxu0 %v8881_v36  ;;  %v480_v36 = vsub.s32 7, %v9652_v9 }
 0x205   :  { %3050 = vmatmul.mubr.bf16.gmra.mrb[84].mxu0 %v9566_v35  ;;  %3276 = vmatmul.mubr.bf16.gmra.mrb[84].mxu1 %v9566_v35  ;;  %v8897_v35 = vld [vmem:[#allocation8 + $0x154] ss:$12 sps:$4 sm:$0xff]  }
 0x206   :  { %5552 = vmatpush1.bf16.msra.mxu0 %v8879_v40  ;;  %3059 = vmatprep.mubr.bf16.mxu0 %v10667_v27  ;;  %v8926_v40 = vld [vmem:[#allocation8 + $0x1fc] ss:$12 sps:$4 sm:$0xff]  }
 0x207   :  { %5553 = vmatprep.subr.bf16.mxu0 %v8886_v44  ;;  %3285 = vmatprep.mubr.bf16.mxu1 %v10667_v27  ;;  %v8938_v44 = vld [vmem:[#allocation8 + $0x2a8] ss:$12 sps:$4 sm:$0xff]  }
 0x20a   :  { %5554 = vmatpush1.bf16.msra.mxu0 %v8884_v19 }
 0x20b   :  { %5555 = vmatprep.subr.bf16.mxu0 %v8889_v21 }
 0x20d   :  { %3060 = vmatmul.mubr.bf16.gmra.mrb[88].mxu0 %v9572_v49  ;;  %3286 = vmatmul.mubr.bf16.gmra.mrb[88].mxu1 %v9572_v49  ;;  %v8900_v49 = vld [vmem:[#allocation8 + $0x168] ss:$12 sps:$4 sm:$0xff]  }
 0x20e   :  { %5556 = vmatpush1.bf16.msra.mxu0 %v8887_v25  ;;  %3069 = vmatprep.mubr.bf16.mxu0 %v10667_v27  ;;  %v8939_v25 = vld [vmem:[#allocation8 + $0x1e8] ss:$12 sps:$4 sm:$0xff]  }
 0x20f   :  { %5557 = vmatprep.subr.bf16.mxu0 %v8894_v12  ;;  %3295 = vmatprep.mubr.bf16.mxu1 %v10667_v27  ;;  %v8907_v27 = vld [vmem:[#allocation8 + $0x188] ss:$12 sps:$4 sm:$0xff]  }
 0x212   :  { %5558 = vmatpush1.bf16.msra.mxu0 %v8892_v56 }
 0x213   :  { %5559 = vmatprep.subr.bf16.mxu0 %v8897_v35  ;;  %v8924_v35 = vld [vmem:[#allocation8 + $0x1f8] ss:$12 sps:$4 sm:$0xff]  }
 0x215   :  { %3070 = vmatmul.mubr.bf16.gmra.mrb[92].mxu0 %v9578_v5  ;;  %3296 = vmatmul.mubr.bf16.gmra.mrb[92].mxu1 %v9578_v5  ;;  %v8908_v5 = vld [vmem:[#allocation8 + $0x198] ss:$12 sps:$4 sm:$0xff]  }
 0x216   :  { %5560 = vmatpush1.bf16.msra.mxu0 %v8895_v58  ;;  %5563 = vmatprep.mubr.bf16.mxu0 %v9701_v18  ;;  %v8946_v58 = vld [vmem:[#allocation8 + $0x2c0] ss:$12 sps:$4 sm:$0xff]  }
 0x217   :  { %6241 = vmatprep.mubr.bf16.mxu1 %v9701_v18  ;;  %5561 = vmatprep.subr.bf16.mxu0 %v8902_v28  ;;  %v8913_v18 = vld [vmem:[#allocation8 + $0x1b4] ss:$12 sps:$4 sm:$0xff]  }
 0x218   :  { %v8929_v28 = vld [vmem:[#allocation8 + $0x214] ss:$12 sps:$4 sm:$0xff]  }
 0x21a   :  { %5562 = vmatpush1.bf16.msra.mxu0 %v8900_v49 }
 0x21b   :  { %5644 = vmatprep.subr.bf16.mxu0 %v8905_v63 }
 0x21d   :  { %5564 = vmatmul.mubr.bf16.vlgmr.msra.gmra.mrb[96].mxu0 %v9697_v14  ;;  %6242 = vmatmul.mubr.bf16.vlgmr.msra.gmra.mrb[96].mxu1 %v9697_v14  ;;  %v8930_v14 = vld [vmem:[#allocation8 + $0x290] ss:$12 sps:$4 sm:$0xff]  }
 0x21e   :  { %5573 = vmatprep.mubr.bf16.mxu0 %v9721_v62  ;;  %5645 = vmatpush1.bf16.msra.mxu0 %v8903_v32 }
 0x21f   :  { %6249 = vmatprep.mubr.bf16.mxu1 %v9721_v62  ;;  %7499 = vmatpush3.bf16.msra.mxu1 %v8907_v27  ;;  %v8916_v62 = vld [vmem:[#allocation8 + $0x1c8] ss:$12 sps:$4 sm:$0xff]  }
 0x220   :  { %5646 = vmatprep.subr.bf16.mxu0 %v8910_v26  ;;  %7500 = vmatprep.subr.bf16.mxu1 %v8914_v30 }
 0x222   :  { %5647 = vmatpush1.bf16.msra.mxu0 %v8908_v5 }
 0x223   :  { %5648 = vmatprep.subr.bf16.mxu0 %v8913_v18  ;;  %7501 = vmatpush3.bf16.msra.mxu1 %v8915_v22 }
 0x224   :  { %7502 = vmatprep.subr.bf16.mxu1 %v8922_v13 }
 0x225   :  { %5574 = vmatmul.mubr.bf16.gmra.mrb[100].mxu0 %v9717_v60  ;;  %6250 = vmatmul.mubr.bf16.gmra.mrb[100].mxu1 %v9717_v60  ;;  %v472_v60 = vsub.s32 5, %v9652_v9 }
 0x226   :  { %5583 = vmatprep.mubr.bf16.mxu0 %v9741_v54  ;;  %5649 = vmatpush1.bf16.msra.mxu0 %v8911_v46 }
 0x227   :  { %6257 = vmatprep.mubr.bf16.mxu1 %v9741_v54  ;;  %5650 = vmatprep.subr.bf16.mxu0 %v8918_v10  ;;  %v9223_v54 = vld [vmem:[#allocation7] sm:$0xff] }
 0x228   :  { %7503 = vmatpush3.bf16.msra.mxu1 %v8923_v6  ;;  %v9879_v19 = vrot.slane %v9223_v54, %v468_v0  ;;  %v9881_v21 = vrot.slane %v9223_v54, %v476_v16  ;;  %v9884_v12 = vrot.slane %v9223_v54, %v472_v60  ;;  %v9886_v56 = vrot.slane %v9223_v54, %v480_v36  ;;  %v8954_v36 = vld [vmem:[#allocation8 + $0x2d8] ss:$12 sps:$4 sm:$0xff]  }
 0x229   :  { %7504 = vmatprep.subr.bf16.mxu1 %v8930_v14  ;;  %v8934_v14 = vld [vmem:[#allocation8 + $0x22c] ss:$12 sps:$4 sm:$0xff]  }
 0x22a   :  { %5651 = vmatpush1.bf16.msra.mxu0 %v8916_v62 }
 0x22b   :  { %5652 = vmatprep.subr.bf16.mxu0 %v8921_v20 }
 0x22c   :  { %7505 = vmatpush3.bf16.msra.mxu1 %v8931_v39  ;;  %v8947_v39 = vld [vmem:[#allocation8 + $0x200] ss:$12 sps:$4 sm:$0xff]  }
 0x22d   :  { %5584 = vmatmul.mubr.bf16.gmra.mrb[104].mxu0 %v9737_v47  ;;  %6258 = vmatmul.mubr.bf16.gmra.mrb[104].mxu1 %v9737_v47 }
 0x22e   :  { %5593 = vmatprep.mubr.bf16.mxu0 %v9761_v43  ;;  %5653 = vmatpush1.bf16.msra.mxu0 %v8919_v24 }
 0x22f   :  { %6265 = vmatprep.mubr.bf16.mxu1 %v9761_v43  ;;  %5654 = vmatprep.subr.bf16.mxu0 %v8926_v40  ;;  %v8927_v43 = vld [vmem:[#allocation8 + $0x210] ss:$12 sps:$4 sm:$0xff]  }
 0x230   :  { %v2549_v47 = vpop.f32.mrb[32].mxu0  ;;  %v2775_v49 = vpop.f32.mrb[32].mxu1  ;;  %7506 = vmatprep.subr.bf16.mxu1 %v8938_v44 }
 0x231   :  { %v7882_v63 = vadd.f32 %v2549_v47, %v9879_v19  ;;  %v7914_v32 = vadd.f32 %v2775_v49, %v9881_v21  ;;  %v2551_v27 = vpop.f32.mrb[33].mxu0  ;;  %v2777_v26 = vpop.f32.mrb[33].mxu1  ;;  %7507 = vmatpush3.bf16.msra.mxu1 %v8939_v25  ;;  %v8937_v47 = vld [vmem:[#allocation8 + $0x244] ss:$12 sps:$4 sm:$0xff]  }
 0x232   :  { %v7883_v30 = vadd.f32 %v2551_v27, %v9884_v12  ;;  %v7915_v5 = vadd.f32 %v2777_v26, %v9886_v56  ;;  %v2553_v18 = vpop.f32.mrb[34].mxu0  ;;  %v2779_v22 = vpop.f32.mrb[34].mxu1  ;;  %5655 = vmatpush1.bf16.msra.mxu0 %v8924_v35  ;;  %7508 = vmatprep.subr.bf16.mxu1 %v8946_v58  ;;  %v8932_v35 = vld [vmem:[#allocation8 + $0x228] ss:$12 sps:$4 sm:$0xff]   ;;  %v8955_v27 = vld [vmem:[#allocation8 + $0x218] ss:$12 sps:$4 sm:$0xff]  }
 0x233   :  { %v7884_v13 = vadd.f32 %v2553_v18, %v9879_v19  ;;  %v7916_v46 = vadd.f32 %v2779_v22, %v9881_v21  ;;  %v2555_v10 = vpop.f32.mrb[35].mxu0  ;;  %v2781_v6 = vpop.f32.mrb[35].mxu1  ;;  %5656 = vmatprep.subr.bf16.mxu0 %v8929_v28  ;;  %v3310_v0 = vmax.f32 %v7882_v63, 0.0  ;;  %v3312_v16 = vmax.f32 %v7914_v32, 0.0 }
 0x234   :  { %v7885_v62 = vadd.f32 %v2555_v10, %v9884_v12  ;;  %v7917_v20 = vadd.f32 %v2781_v6, %v9886_v56  ;;  %v3311_v40 = vmax.f32 %v7883_v30, 0.0  ;;  %v3313_v44 = vmax.f32 %v7915_v5, 0.0 }
 0x235   :  { %v3322_v24 = vmax.f32 %v7884_v13, 0.0  ;;  %v3324_v60 = vmax.f32 %v7916_v46, 0.0  ;;  %5594 = vmatmul.mubr.bf16.gmra.mrb[108].mxu0 %v9757_v41  ;;  %6266 = vmatmul.mubr.bf16.gmra.mrb[108].mxu1 %v9757_v41  ;;  %v8935_v46 = vld [vmem:[#allocation8 + $0x240] ss:$12 sps:$4 sm:$0xff]  }
 0x236   :  { %v3323_v54 = vmax.f32 %v7885_v62, 0.0  ;;  %v3325_v25 = vmax.f32 %v7917_v20, 0.0  ;;  %5603 = vmatprep.mubr.bf16.mxu0 %v9781_v34  ;;  %5657 = vmatpush1.bf16.msra.mxu0 %v8927_v43  ;;  %v8942_v20 = vld [vmem:[#allocation8 + $0x25c] ss:$12 sps:$4 sm:$0xff]  }
 0x237   :  { %v9900_v58 = vpack.c.bf16 %v3322_v24, %v3310_v0  ;;  %v9902_v28 = vpack.c.bf16 %v3324_v60, %v3312_v16  ;;  %6273 = vmatprep.mubr.bf16.mxu1 %v9781_v34  ;;  %5658 = vmatprep.subr.bf16.mxu0 %v8934_v14  ;;  %v8940_v16 = vld [vmem:[#allocation8 + $0x258] ss:$12 sps:$4 sm:$0xff]   ;;  %v8962_v24 = vld [vmem:[#allocation8 + $0x2f0] ss:$12 sps:$4 sm:$0xff]  }
 0x238   :  { %v9905_v49 = vpack.c.bf16 %v3323_v54, %v3311_v40  ;;  %v9907_v41 = vpack.c.bf16 %v3325_v25, %v3313_v44  ;;  %v2559_v63 = vpop.f32.mrb[36].mxu0  ;;  %v2785_v32 = vpop.f32.mrb[36].mxu1  ;;  %7509 = vmatpush3.bf16.msra.mxu1 %v8947_v39  ;;  %v8963_v54 = vld [vmem:[#allocation8 + $0x230] ss:$12 sps:$4 sm:$0xff]  }
 0x239   :  { %v7886_v26 = vadd.f32 %v2559_v63, %v9879_v19  ;;  %v7918_v30 = vadd.f32 %v2785_v32, %v9881_v21  ;;  %v2561_v5 = vpop.f32.mrb[37].mxu0  ;;  %v2787_v18 = vpop.f32.mrb[37].mxu1  ;;  %7510 = vmatprep.subr.bf16.mxu1 %v8954_v36  ;;  %v8970_v32 = vld [vmem:[#allocation8 + $0x3c8] ss:$12 sps:$4 sm:$0xff]  }
 0x23a   :  { %v7887_v22 = vadd.f32 %v2561_v5, %v9884_v12  ;;  %v7919_v34 = vadd.f32 %v2787_v18, %v9886_v56  ;;  %v2563_v43 = vpop.f32.mrb[38].mxu0  ;;  %v2789_v13 = vpop.f32.mrb[38].mxu1  ;;  %5659 = vmatpush1.bf16.msra.mxu0 %v8932_v35 }
 0x23b   :  { %v7888_v10 = vadd.f32 %v2563_v43, %v9879_v19  ;;  %v7920_v6 = vadd.f32 %v2789_v13, %v9881_v21  ;;  %v2565_v14 = vpop.f32.mrb[39].mxu0  ;;  %v2791_v62 = vpop.f32.mrb[39].mxu1  ;;  %5660 = vmatprep.subr.bf16.mxu0 %v8937_v47  ;;  %v3334_v60 = vmax.f32 %v7886_v26, 0.0  ;;  %v3336_v36 = vmax.f32 %v7918_v30, 0.0  ;;  %v8945_v26 = vld [vmem:[#allocation8 + $0x274] ss:$12 sps:$4 sm:$0xff]  }
 0x23c   :  { %v7889_v39 = vadd.f32 %v2565_v14, %v9884_v12  ;;  %v7921_v0 = vadd.f32 %v2791_v62, %v9886_v56  ;;  %7511 = vmatpush3.bf16.msra.mxu1 %v8955_v27  ;;  %v3335_v25 = vmax.f32 %v7887_v22, 0.0  ;;  %v3337_v35 = vmax.f32 %v7919_v34, 0.0  ;;  %v8943_v62 = vld [vmem:[#allocation8 + $0x270] ss:$12 sps:$4 sm:$0xff]  }
 0x23d   :  { %v3346_v40 = vmax.f32 %v7888_v10, 0.0  ;;  %v3348_v44 = vmax.f32 %v7920_v6, 0.0  ;;  %5604 = vmatmul.mubr.bf16.gmra.mrb[112].mxu0 %v9777_v53  ;;  %6274 = vmatmul.mubr.bf16.gmra.mrb[112].mxu1 %v9777_v53 }
 0x23e   :  { %v3347_v47 = vmax.f32 %v7889_v39, 0.0  ;;  %v3349_v63 = vmax.f32 %v7921_v0, 0.0  ;;  %5613 = vmatprep.mubr.bf16.mxu0 %v9800_v59  ;;  %5661 = vmatpush1.bf16.msra.mxu0 %v8935_v46 }
 0x23f   :  { %v9920_v5 = vpack.c.bf16 %v3346_v40, %v3334_v60  ;;  %v9922_v27 = vpack.c.bf16 %v3348_v44, %v3336_v36  ;;  %6281 = vmatprep.mubr.bf16.mxu1 %v9800_v59  ;;  %5662 = vmatprep.subr.bf16.mxu0 %v8942_v20  ;;  %v8950_v60 = vld [vmem:[#allocation8 + $0x28c] ss:$12 sps:$4 sm:$0xff]  }
 0x240   :  { %v9925_v30 = vpack.c.bf16 %v3347_v47, %v3335_v25  ;;  %v9927_v53 = vpack.c.bf16 %v3349_v63, %v3337_v35  ;;  %v2569_v18 = vpop.f32.mrb[40].mxu0  ;;  %v2795_v22 = vpop.f32.mrb[40].mxu1  ;;  %7512 = vmatprep.subr.bf16.mxu1 %v8962_v24 }
 0x241   :  { %v7890_v34 = vadd.f32 %v2569_v18, %v9879_v19  ;;  %v7922_v43 = vadd.f32 %v2795_v22, %v9881_v21  ;;  %v2571_v13 = vpop.f32.mrb[41].mxu0  ;;  %v2797_v46 = vpop.f32.mrb[41].mxu1  ;;  %7513 = vmatpush3.bf16.msra.mxu1 %v8963_v54 }
 0x242   :  { %v7891_v10 = vadd.f32 %v2571_v13, %v9884_v12  ;;  %v7923_v59 = vadd.f32 %v2797_v46, %v9886_v56  ;;  %v2573_v6 = vpop.f32.mrb[42].mxu0  ;;  %v2799_v14 = vpop.f32.mrb[42].mxu1  ;;  %5663 = vmatpush1.bf16.msra.mxu0 %v8940_v16  ;;  %7562 = vmatprep.subr.bf16.mxu1 %v8970_v32 }
 0x243   :  { %v7892_v20 = vadd.f32 %v2573_v6, %v9879_v19  ;;  %v7924_v39 = vadd.f32 %v2799_v14, %v9881_v21  ;;  %v2575_v0 = vpop.f32.mrb[43].mxu0  ;;  %v2801_v24 = vpop.f32.mrb[43].mxu1  ;;  %5664 = vmatprep.subr.bf16.mxu0 %v8945_v26  ;;  %v3358_v44 = vmax.f32 %v7890_v34, 0.0  ;;  %v3360_v54 = vmax.f32 %v7922_v43, 0.0  ;;  %v8948_v26 = vld [vmem:[#allocation8 + $0x288] ss:$12 sps:$4 sm:$0xff]  }
 0x244   :  { %v7893_v36 = vadd.f32 %v2575_v0, %v9884_v12  ;;  %v7925_v40 = vadd.f32 %v2801_v24, %v9886_v56  ;;  %v3359_v16 = vmax.f32 %v7891_v10, 0.0  ;;  %v3361_v47 = vmax.f32 %v7923_v59, 0.0  ;;  %v8953_v34 = vld [vmem:[#allocation8 + $0x2a4] ss:$12 sps:$4 sm:$0xff]   ;;  %v8951_v0 = vld [vmem:[#allocation8 + $0x2a0] ss:$12 sps:$4 sm:$0xff]  }
 0x245   :  { %v3370_v25 = vmax.f32 %v7892_v20, 0.0  ;;  %v3372_v35 = vmax.f32 %v7924_v39, 0.0  ;;  %5614 = vmatmul.mubr.bf16.gmra.mrb[116].mxu0 %v9795_v57  ;;  %6282 = vmatmul.mubr.bf16.gmra.mrb[116].mxu1 %v9795_v57 }
 0x246   :  { %v3371_v63 = vmax.f32 %v7893_v36, 0.0  ;;  %v3373_v32 = vmax.f32 %v7925_v40, 0.0  ;;  %5623 = vmatprep.mubr.bf16.mxu0 %v9821_v3  ;;  %5665 = vmatpush1.bf16.msra.mxu0 %v8943_v62 }
 0x247   :  { %v9940_v18 = vpack.c.bf16 %v3370_v25, %v3358_v44  ;;  %v9942_v22 = vpack.c.bf16 %v3372_v35, %v3360_v54  ;;  %6289 = vmatprep.mubr.bf16.mxu1 %v9821_v3  ;;  %5666 = vmatprep.subr.bf16.mxu0 %v8950_v60  ;;  %v8958_v44 = vld [vmem:[#allocation8 + $0x2bc] ss:$12 sps:$4 sm:$0xff]  }
 0x248   :  { %v9945_v43 = vpack.c.bf16 %v3371_v63, %v3359_v16  ;;  %v9947_v13 = vpack.c.bf16 %v3373_v32, %v3361_v47  ;;  %v2579_v57 = vpop.f32.mrb[44].mxu0  ;;  %v2805_v46 = vpop.f32.mrb[44].mxu1 }
 0x249   :  { %v7894_v10 = vadd.f32 %v2579_v57, %v9879_v19  ;;  %v7926_v59 = vadd.f32 %v2805_v46, %v9881_v21  ;;  %v2581_v6 = vpop.f32.mrb[45].mxu0  ;;  %v2807_v14 = vpop.f32.mrb[45].mxu1 }
 0x24a   :  { %v7895_v62 = vadd.f32 %v2581_v6, %v9884_v12  ;;  %v7927_v20 = vadd.f32 %v2807_v14, %v9886_v56  ;;  %v2583_v39 = vpop.f32.mrb[46].mxu0  ;;  %v2809_v3 = vpop.f32.mrb[46].mxu1  ;;  %5667 = vmatpush1.bf16.msra.mxu0 %v8948_v26 }
 0x24b   :  { %v7896_v24 = vadd.f32 %v2583_v39, %v9879_v19  ;;  %v7928_v60 = vadd.f32 %v2809_v3, %v9881_v21  ;;  %v2585_v36 = vpop.f32.mrb[47].mxu0  ;;  %v2811_v40 = vpop.f32.mrb[47].mxu1  ;;  %5668 = vmatprep.subr.bf16.mxu0 %v8953_v34  ;;  %v3382_v35 = vmax.f32 %v7894_v10, 0.0  ;;  %v3384_v16 = vmax.f32 %v7926_v59, 0.0  ;;  %v8956_v34 = vld [vmem:[#allocation8 + $0x2b8] ss:$12 sps:$4 sm:$0xff]  }
 0x24c   :  { %v7897_v54 = vadd.f32 %v2585_v36, %v9884_v12  ;;  %v7929_v25 = vadd.f32 %v2811_v40, %v9886_v56  ;;  %v3383_v32 = vmax.f32 %v7895_v62, 0.0  ;;  %v3385_v26 = vmax.f32 %v7927_v20, 0.0  ;;  %v8961_v10 = vld [vmem:[#allocation8 + $0x2d4] ss:$12 sps:$4 sm:$0xff]  }
 0x24d   :  { %v3394_v47 = vmax.f32 %v7896_v24, 0.0  ;;  %v3396_v63 = vmax.f32 %v7928_v60, 0.0  ;;  %5624 = vmatmul.mubr.bf16.gmra.mrb[120].mxu0 %v9816_v37  ;;  %6290 = vmatmul.mubr.bf16.gmra.mrb[120].mxu1 %v9816_v37 }
 0x24e   :  { %v3395_v57 = vmax.f32 %v7897_v54, 0.0  ;;  %v3397_v46 = vmax.f32 %v7929_v25, 0.0  ;;  %5633 = vmatprep.mubr.bf16.mxu0 %v9841_v52  ;;  %5669 = vmatpush1.bf16.msra.mxu0 %v8951_v0 }
 0x24f   :  { %v9960_v6 = vpack.c.bf16 %v3394_v47, %v3382_v35  ;;  %v9962_v14 = vpack.c.bf16 %v3396_v63, %v3384_v16  ;;  %6297 = vmatprep.mubr.bf16.mxu1 %v9841_v52  ;;  %5670 = vmatprep.subr.bf16.mxu0 %v8958_v44  ;;  %v8959_v44 = vld [vmem:[#allocation8 + $0x2d0] ss:$12 sps:$4 sm:$0xff]   ;;  %v8966_v47 = vld [vmem:[#allocation8 + $0x2ec] ss:$12 sps:$4 sm:$0xff]  }
 0x250   :  { %v9965_v59 = vpack.c.bf16 %v3395_v57, %v3383_v32  ;;  %v9967_v39 = vpack.c.bf16 %v3397_v46, %v3385_v26  ;;  %v2589_v37 = vpop.f32.mrb[48].mxu0  ;;  %v2815_v62 = vpop.f32.mrb[48].mxu1 }
 0x251   :  { %v7898_v20 = vadd.f32 %v2589_v37, %v9879_v19  ;;  %v7930_v3 = vadd.f32 %v2815_v62, %v9881_v21  ;;  %v2591_v0 = vpop.f32.mrb[49].mxu0  ;;  %v2817_v24 = vpop.f32.mrb[49].mxu1 }
 0x252   :  { %v7899_v60 = vadd.f32 %v2591_v0, %v9884_v12  ;;  %v7931_v36 = vadd.f32 %v2817_v24, %v9886_v56  ;;  %v2593_v40 = vpop.f32.mrb[50].mxu0  ;;  %v2819_v52 = vpop.f32.mrb[50].mxu1  ;;  %5671 = vmatpush1.bf16.msra.mxu0 %v8956_v34 }
 0x253   :  { %v7900_v54 = vadd.f32 %v2593_v40, %v9879_v19  ;;  %v7932_v25 = vadd.f32 %v2819_v52, %v9881_v21  ;;  %v2595_v35 = vpop.f32.mrb[51].mxu0  ;;  %v2821_v16 = vpop.f32.mrb[51].mxu1  ;;  %5672 = vmatprep.subr.bf16.mxu0 %v8961_v10  ;;  %v3406_v26 = vmax.f32 %v7898_v20, 0.0  ;;  %v3408_v57 = vmax.f32 %v7930_v3, 0.0  ;;  %v8964_v10 = vld [vmem:[#allocation8 + $0x2e8] ss:$12 sps:$4 sm:$0xff]  }
 0x254   :  { %v7901_v63 = vadd.f32 %v2595_v35, %v9884_v12  ;;  %v7933_v32 = vadd.f32 %v2821_v16, %v9886_v56  ;;  %v3407_v34 = vmax.f32 %v7899_v60, 0.0  ;;  %v3409_v62 = vmax.f32 %v7931_v36, 0.0  ;;  %v8969_v20 = vld [vmem:[#allocation8 + $0x304] ss:$12 sps:$4 sm:$0xff]  }
 0x255   :  { %v3418_v46 = vmax.f32 %v7900_v54, 0.0  ;;  %v3420_v37 = vmax.f32 %v7932_v25, 0.0  ;;  %5634 = vmatmul.mubr.bf16.gmra.mrb[124].mxu0 %v9836_v2  ;;  %6298 = vmatmul.mubr.bf16.gmra.mrb[124].mxu1 %v9836_v2 }
 0x256   :  { %v3419_v0 = vmax.f32 %v7901_v63, 0.0  ;;  %v3421_v24 = vmax.f32 %v7933_v32, 0.0  ;;  %5673 = vmatpush1.bf16.msra.mxu0 %v8959_v44  ;;  %5676 = vmatprep.mubr.bf16.mxu0 %v9703_v31 }
 0x257   :  { %v9980_v40 = vpack.c.bf16 %v3418_v46, %v3406_v26  ;;  %v9982_v52 = vpack.c.bf16 %v3420_v37, %v3408_v57  ;;  %6338 = vmatprep.mubr.bf16.mxu1 %v9703_v31  ;;  %5674 = vmatprep.subr.bf16.mxu0 %v8966_v47  ;;  %v8967_v47 = vld [vmem:[#allocation8 + $0x300] ss:$12 sps:$4 sm:$0xff]  }
 0x258   :  { %v9985_v3 = vpack.c.bf16 %v3419_v0, %v3407_v34  ;;  %v9987_v54 = vpack.c.bf16 %v3421_v24, %v3409_v62  ;;  %v2599_v2 = vpop.f32.mrb[52].mxu0  ;;  %v2825_v60 = vpop.f32.mrb[52].mxu1  ;;  %v8971_v34 = vld [vmem:[#allocation8 + $0x308] ss:$12 sps:$4 sm:$0xff]  }
 0x259   :  { %10668 = vst [vmem:[#allocation16_spill] sm:$0xff] %v9982_v52  ;;  %v7902_v36 = vadd.f32 %v2599_v2, %v9879_v19  ;;  %v7934_v44 = vadd.f32 %v2825_v60, %v9881_v21  ;;  %v2601_v25 = vpop.f32.mrb[53].mxu0  ;;  %v2827_v35 = vpop.f32.mrb[53].mxu1  ;;  %v8974_v24 = vld [vmem:[#allocation8 + $0x31c] ss:$12 sps:$4 sm:$0xff]  }
 0x25a   :  { %10669 = vst [vmem:[#allocation17_spill] sm:$0xff] %v9987_v54  ;;  %v7903_v16 = vadd.f32 %v2601_v25, %v9884_v12  ;;  %v7935_v63 = vadd.f32 %v2827_v35, %v9886_v56  ;;  %v2603_v32 = vpop.f32.mrb[54].mxu0  ;;  %v2829_v31 = vpop.f32.mrb[54].mxu1  ;;  %5675 = vmatpush1.bf16.msra.mxu0 %v8964_v10  ;;  %v8978_v2 = vld [vmem:[#allocation8 + $0x3e0] ss:$12 sps:$4 sm:$0xff]  }
 0x25b   :  { %v7904_v26 = vadd.f32 %v2603_v32, %v9879_v19  ;;  %v7936_v57 = vadd.f32 %v2829_v31, %v9881_v21  ;;  %v2605_v46 = vpop.f32.mrb[55].mxu0  ;;  %v2831_v37 = vpop.f32.mrb[55].mxu1  ;;  %5757 = vmatprep.subr.bf16.mxu0 %v8969_v20  ;;  %v3430_v60 = vmax.f32 %v7902_v36, 0.0  ;;  %v3432_v25 = vmax.f32 %v7934_v44, 0.0  ;;  %v8972_v20 = vld [vmem:[#allocation8 + $0x318] ss:$12 sps:$4 sm:$0xff]  }
 0x25c   :  { %v7905_v62 = vadd.f32 %v2605_v46, %v9884_v12  ;;  %v7937_v0 = vadd.f32 %v2831_v37, %v9886_v56  ;;  %v3431_v10 = vmax.f32 %v7903_v16, 0.0  ;;  %v3433_v32 = vmax.f32 %v7935_v63, 0.0  ;;  %v8977_v36 = vld [vmem:[#allocation8 + $0x334] ss:$12 sps:$4 sm:$0xff]  }
 0x25d   :  { %v3442_v35 = vmax.f32 %v7904_v26, 0.0  ;;  %v3444_v52 = vmax.f32 %v7936_v57, 0.0  ;;  %5677 = vmatmul.mubr.bf16.vlgmr.msra.gmra.mrb[96].mxu0 %v9699_v15  ;;  %6339 = vmatmul.mubr.bf16.vlgmr.msra.gmra.mrb[128].mxu1 %v9699_v15  ;;  %v8979_v44 = vld [vmem:[#allocation8 + $0x320] ss:$12 sps:$4 sm:$0xff]   ;;  %v8986_v57 = vld [vmem:[#allocation8 + $0x3f8] ss:$12 sps:$4 sm:$0xff]  }
 0x25e   :  { %v3443_v31 = vmax.f32 %v7905_v62, 0.0  ;;  %v3445_v54 = vmax.f32 %v7937_v0, 0.0  ;;  %5686 = vmatprep.mubr.bf16.mxu0 %v9723_v1  ;;  %5758 = vmatpush1.bf16.msra.mxu0 %v8967_v47 }
 0x25f   :  { %v10000_v46 = vpack.c.bf16 %v3442_v35, %v3430_v60  ;;  %v10002_v37 = vpack.c.bf16 %v3444_v52, %v3432_v25  ;;  %6346 = vmatprep.mubr.bf16.mxu1 %v9723_v1  ;;  %7563 = vmatpush3.bf16.msra.mxu1 %v8971_v34 }
 0x260   :  { %v10005_v26 = vpack.c.bf16 %v3443_v31, %v3431_v10  ;;  %v10007_v15 = vpack.c.bf16 %v3445_v54, %v3433_v32  ;;  %v2609_v16 = vpop.f32.mrb[56].mxu0  ;;  %v2835_v63 = vpop.f32.mrb[56].mxu1  ;;  %5759 = vmatprep.subr.bf16.mxu0 %v8974_v24  ;;  %7564 = vmatprep.subr.bf16.mxu1 %v8978_v2  ;;  %v8975_v54 = vld [vmem:[#allocation8 + $0x330] ss:$12 sps:$4 sm:$0xff]   ;;  %v8982_v32 = vld [vmem:[#allocation8 + $0x34c] ss:$12 sps:$4 sm:$0xff]  }
 0x261   :  { %10670 = vst [vmem:[#allocation18_spill] sm:$0xff] %v10002_v37  ;;  %v7906_v47 = vadd.f32 %v2609_v16, %v9879_v19  ;;  %v7938_v62 = vadd.f32 %v2835_v63, %v9881_v21  ;;  %v2611_v52 = vpop.f32.mrb[57].mxu0  ;;  %v2837_v0 = vpop.f32.mrb[57].mxu1  ;;  %v8987_v63 = vld [vmem:[#allocation8 + $0x338] ss:$12 sps:$4 sm:$0xff]  }
 0x262   :  { %10671 = vst [vmem:[#allocation19_spill] sm:$0xff] %v10007_v15  ;;  %v7907_v1 = vadd.f32 %v2611_v52, %v9884_v12  ;;  %v7939_v34 = vadd.f32 %v2837_v0, %v9886_v56  ;;  %v2613_v60 = vpop.f32.mrb[58].mxu0  ;;  %v2839_v25 = vpop.f32.mrb[58].mxu1  ;;  %5760 = vmatpush1.bf16.msra.mxu0 %v8972_v20 }
 0x263   :  { %v7908_v35 = vadd.f32 %v2613_v60, %v9879_v19  ;;  %v7940_v24 = vadd.f32 %v2839_v25, %v9881_v21  ;;  %v2615_v2 = vpop.f32.mrb[59].mxu0  ;;  %v2841_v10 = vpop.f32.mrb[59].mxu1  ;;  %5761 = vmatprep.subr.bf16.mxu0 %v8977_v36  ;;  %7565 = vmatpush3.bf16.msra.mxu1 %v8979_v44  ;;  %v3454_v52 = vmax.f32 %v7906_v47, 0.0  ;;  %v3456_v0 = vmax.f32 %v7938_v62, 0.0  ;;  %v8994_v60 = vld [vmem:[#allocation8 + $0x410] ss:$12 sps:$4 sm:$0xff]  }
 0x264   :  { %v7909_v31 = vadd.f32 %v2615_v2, %v9884_v12  ;;  %v7941_v16 = vadd.f32 %v2841_v10, %v9886_v56  ;;  %7566 = vmatprep.subr.bf16.mxu1 %v8986_v57  ;;  %v3455_v25 = vmax.f32 %v7907_v1, 0.0  ;;  %v3457_v15 = vmax.f32 %v7939_v34, 0.0  ;;  %v8980_v2 = vld [vmem:[#allocation8 + $0x348] ss:$12 sps:$4 sm:$0xff]   ;;  %v8985_v47 = vld [vmem:[#allocation8 + $0x364] ss:$12 sps:$4 sm:$0xff]  }
 0x265   :  { %v3466_v37 = vmax.f32 %v7908_v35, 0.0  ;;  %v3468_v20 = vmax.f32 %v7940_v24, 0.0  ;;  %5687 = vmatmul.mubr.bf16.gmra.mrb[100].mxu0 %v9719_v61  ;;  %6347 = vmatmul.mubr.bf16.gmra.mrb[132].mxu1 %v9719_v61  ;;  %v8995_v35 = vld [vmem:[#allocation8 + $0x350] ss:$12 sps:$4 sm:$0xff]  }
 0x266   :  { %v3467_v36 = vmax.f32 %v7909_v31, 0.0  ;;  %v3469_v44 = vmax.f32 %v7941_v16, 0.0  ;;  %5696 = vmatprep.mubr.bf16.mxu0 %v9743_v51  ;;  %5762 = vmatpush1.bf16.msra.mxu0 %v8975_v54 }
 0x267   :  { %v10020_v10 = vpack.c.bf16 %v3466_v37, %v3454_v52  ;;  %v10022_v57 = vpack.c.bf16 %v3468_v20, %v3456_v0  ;;  %6354 = vmatprep.mubr.bf16.mxu1 %v9743_v51  ;;  %5763 = vmatprep.subr.bf16.mxu0 %v8982_v32 }
 0x268   :  { %v10025_v62 = vpack.c.bf16 %v3467_v36, %v3455_v25  ;;  %v10027_v61 = vpack.c.bf16 %v3469_v44, %v3457_v15  ;;  %v2619_v1 = vpop.f32.mrb[60].mxu0  ;;  %v2845_v34 = vpop.f32.mrb[60].mxu1  ;;  %7567 = vmatpush3.bf16.msra.mxu1 %v8987_v63  ;;  %v8983_v15 = vld [vmem:[#allocation8 + $0x360] ss:$12 sps:$4 sm:$0xff]   ;;  %v8990_v36 = vld [vmem:[#allocation8 + $0x37c] ss:$12 sps:$4 sm:$0xff]  }
 0x269   :  { %10672 = vst [vmem:[#allocation20_spill] sm:$0xff] %v10022_v57  ;;  %v7910_v24 = vadd.f32 %v2619_v1, %v9879_v19  ;;  %v7942_v54 = vadd.f32 %v2845_v34, %v9881_v21  ;;  %v2621_v37 = vpop.f32.mrb[61].mxu0  ;;  %v2847_v31 = vpop.f32.mrb[61].mxu1  ;;  %7568 = vmatprep.subr.bf16.mxu1 %v8994_v60  ;;  %v8988_v1 = vld [vmem:[#allocation8 + $0x378] ss:$12 sps:$4 sm:$0xff]  }
 0x26a   :  { %v7911_v16 = vadd.f32 %v2621_v37, %v9884_v12  ;;  %v7943_v51 = vadd.f32 %v2847_v31, %v9886_v56  ;;  %v2623_v32 = vpop.f32.mrb[62].mxu0  ;;  %v2849_v52 = vpop.f32.mrb[62].mxu1  ;;  %5764 = vmatpush1.bf16.msra.mxu0 %v8980_v2  ;;  %v9002_v34 = vld [vmem:[#allocation8 + $0x428] ss:$12 sps:$4 sm:$0xff]  }
 0x26b   :  { %v7912_v0 = vadd.f32 %v2623_v32, %v9879_v19  ;;  %v7944_v63 = vadd.f32 %v2849_v52, %v9881_v21  ;;  %v2625_v20 = vpop.f32.mrb[63].mxu0  ;;  %v2851_v25 = vpop.f32.mrb[63].mxu1  ;;  %5765 = vmatprep.subr.bf16.mxu0 %v8985_v47  ;;  %v3478_v37 = vmax.f32 %v7910_v24, 0.0  ;;  %v3480_v31 = vmax.f32 %v7942_v54, 0.0  ;;  %v9003_v19 = vld [vmem:[#allocation8 + $0x368] ss:$12 sps:$4 sm:$0xff]  }
 0x26c   :  { %v7913_v44 = vadd.f32 %v2625_v20, %v9884_v12  ;;  %v7945_v60 = vadd.f32 %v2851_v25, %v9886_v56  ;;  %7569 = vmatpush3.bf16.msra.mxu1 %v8995_v35  ;;  %v3479_v21 = vmax.f32 %v7911_v16, 0.0  ;;  %v3481_v32 = vmax.f32 %v7943_v51, 0.0  ;;  %v9010_v12 = vld [vmem:[#allocation8 + $0x440] ss:$12 sps:$4 sm:$0xff]   ;;  %v8991_v16 = vld [vmem:[#allocation8 + $0x390] ss:$12 sps:$4 sm:$0xff]  }
 0x26d   :  { %v3490_v57 = vmax.f32 %v7912_v0, 0.0  ;;  %v3492_v2 = vmax.f32 %v7944_v63, 0.0  ;;  %5697 = vmatmul.mubr.bf16.gmra.mrb[104].mxu0 %v9739_v48  ;;  %6355 = vmatmul.mubr.bf16.gmra.mrb[136].mxu1 %v9739_v48  ;;  %v8993_v24 = vld [vmem:[#allocation8 + $0x394] ss:$12 sps:$4 sm:$0xff]   ;;  %v8998_v51 = vld [vmem:[#allocation8 + $0x3ac] ss:$12 sps:$4 sm:$0xff]  }
 0x26e   :  { %v3491_v47 = vmax.f32 %v7913_v44, 0.0  ;;  %v3493_v52 = vmax.f32 %v7945_v60, 0.0  ;;  %5706 = vmatprep.mubr.bf16.mxu0 %v9763_v45  ;;  %5766 = vmatpush1.bf16.msra.mxu0 %v8983_v15  ;;  %v9011_v15 = vld [vmem:[#allocation8 + $0x380] ss:$12 sps:$4 sm:$0xff]   ;;  %v9001_v0 = vld [vmem:[#allocation8 + $0x3c4] ss:$12 sps:$4 sm:$0xff]  }
 0x26f   :  { %v10040_v56 = vpack.c.bf16 %v3490_v57, %v3478_v37  ;;  %v10042_v35 = vpack.c.bf16 %v3492_v2, %v3480_v31  ;;  %6362 = vmatprep.mubr.bf16.mxu1 %v9763_v45  ;;  %5767 = vmatprep.subr.bf16.mxu0 %v8990_v36  ;;  %v9018_v57 = vld [vmem:[#allocation8 + $0x458] ss:$12 sps:$4 sm:$0xff]   ;;  %v8996_v45 = vld [vmem:[#allocation8 + $0x3a8] ss:$12 sps:$4 sm:$0xff]   ;;  %v8999_v20 = vld [vmem:[#allocation8 + $0x3c0] ss:$12 sps:$4 sm:$0xff]  }
 0x270   :  { %v10045_v54 = vpack.c.bf16 %v3491_v47, %v3479_v21  ;;  %v10047_v48 = vpack.c.bf16 %v3493_v52, %v3481_v32  ;;  %7570 = vmatprep.subr.bf16.mxu1 %v9002_v34  ;;  %v9019_v63 = vld [vmem:[#allocation8 + $0x398] ss:$12 sps:$4 sm:$0xff]   ;;  %v9006_v25 = vld [vmem:[#allocation8 + $0x3dc] ss:$12 sps:$4 sm:$0xff]   ;;  %v9009_v60 = vld [vmem:[#allocation8 + $0x3f4] ss:$12 sps:$4 sm:$0xff]  }
 0x271   :  { %7571 = vmatpush3.bf16.msra.mxu1 %v9003_v19  ;;  %v9026_v36 = vld [vmem:[#allocation8 + $0x470] ss:$12 sps:$4 sm:$0xff]   ;;  %v9034_v44 = vld [vmem:[#allocation8 + $0x548] ss:$12 sps:$4 sm:$0xff]   ;;  %v9014_v34 = vld [vmem:[#allocation8 + $0x40c] ss:$12 sps:$4 sm:$0xff]  }
 0x272   :  { %5768 = vmatpush1.bf16.msra.mxu0 %v8988_v1  ;;  %7572 = vmatprep.subr.bf16.mxu1 %v9010_v12  ;;  %v9007_v1 = vld [vmem:[#allocation8 + $0x3f0] ss:$12 sps:$4 sm:$0xff]   ;;  %v9015_v37 = vld [vmem:[#allocation8 + $0x420] ss:$12 sps:$4 sm:$0xff]   ;;  %v9035_v32 = vld [vmem:[#allocation8 + $0x488] ss:$12 sps:$4 sm:$0xff]  }
 0x273   :  { %5769 = vmatprep.subr.bf16.mxu0 %v8993_v24  ;;  %v9022_v31 = vld [vmem:[#allocation8 + $0x43c] ss:$12 sps:$4 sm:$0xff]   ;;  %v9025_v2 = vld [vmem:[#allocation8 + $0x454] ss:$12 sps:$4 sm:$0xff]   ;;  %v9030_v19 = vld [vmem:[#allocation8 + $0x46c] ss:$12 sps:$4 sm:$0xff]  }
 0x274   :  { %v9033_v21 = vld [vmem:[#allocation8 + $0x484] ss:$12 sps:$4 sm:$0xff]   ;;  %v9038_v47 = vld [vmem:[#allocation8 + $0x49c] ss:$12 sps:$4 sm:$0xff]   ;;  %v9042_v52 = vld [vmem:[#allocation8 + $0x560] ss:$12 sps:$4 sm:$0xff]  }
 0x275   :  { %5707 = vmatmul.mubr.bf16.gmra.mrb[108].mxu0 %v9759_v42  ;;  %6363 = vmatmul.mubr.bf16.gmra.mrb[140].mxu1 %v9759_v42  ;;  %v9027_v42 = vld [vmem:[#allocation8 + $0x3b0] ss:$12 sps:$4 sm:$0xff]   ;;  %v9043_v12 = vld [vmem:[#allocation8 + $0x4a0] ss:$12 sps:$4 sm:$0xff]   ;;  %v9050_v24 = vld [vmem:[#allocation8 + $0x578] ss:$12 sps:$4 sm:$0xff]  }
 0x276   :  { %5716 = vmatprep.mubr.bf16.mxu0 %v9783_v38  ;;  %5770 = vmatpush1.bf16.msra.mxu0 %v8991_v16  ;;  %v9039_v16 = vld [vmem:[#allocation8 + $0x4b0] ss:$12 sps:$4 sm:$0xff]  }
 0x277   :  { %6370 = vmatprep.mubr.bf16.mxu1 %v9783_v38  ;;  %5771 = vmatprep.subr.bf16.mxu0 %v8998_v51  ;;  %v9004_v38 = vld [vmem:[#allocation8 + $0x3d8] ss:$12 sps:$4 sm:$0xff]  }
 0x278   :  { %7573 = vmatpush3.bf16.msra.mxu1 %v9011_v15  ;;  %v9046_v51 = vld [vmem:[#allocation8 + $0x4cc] ss:$12 sps:$4 sm:$0xff]  }
 0x279   :  { %7574 = vmatprep.subr.bf16.mxu1 %v9018_v57  ;;  %v9051_v15 = vld [vmem:[#allocation8 + $0x4b8] ss:$12 sps:$4 sm:$0xff]  }
 0x27a   :  { %5772 = vmatpush1.bf16.msra.mxu0 %v8996_v45  ;;  %v9049_v57 = vld [vmem:[#allocation8 + $0x4e4] ss:$12 sps:$4 sm:$0xff]  }
 0x27b   :  { %5773 = vmatprep.subr.bf16.mxu0 %v9001_v0  ;;  %v9059_v45 = vld [vmem:[#allocation8 + $0x4d0] ss:$12 sps:$4 sm:$0xff]   ;;  %v9047_v0 = vld [vmem:[#allocation8 + $0x4e0] ss:$12 sps:$4 sm:$0xff]  }
 0x27c   :  { %7575 = vmatpush3.bf16.msra.mxu1 %v9019_v63  ;;  %v447_v63 = vld [vmem:[#allocation7 + $0x8] sm:$0xf] }
 0x27d   :  { %5717 = vmatmul.mubr.bf16.gmra.mrb[112].mxu0 %v9779_v33  ;;  %6371 = vmatmul.mubr.bf16.gmra.mrb[144].mxu1 %v9779_v33  ;;  %v9012_v33 = vld [vmem:[#allocation8 + $0x408] ss:$12 sps:$4 sm:$0xff]  }
 0x27e   :  { %5726 = vmatprep.mubr.bf16.mxu0 %v9803_v55  ;;  %5774 = vmatpush1.bf16.msra.mxu0 %v8999_v20  ;;  %v9054_v20 = vld [vmem:[#allocation8 + $0x4fc] ss:$12 sps:$4 sm:$0xff]  }
 0x27f   :  { %6378 = vmatprep.mubr.bf16.mxu1 %v9803_v55  ;;  %5775 = vmatprep.subr.bf16.mxu0 %v9006_v25  ;;  %v9017_v55 = vld [vmem:[#allocation8 + $0x424] ss:$12 sps:$4 sm:$0xff]   ;;  %v9066_v25 = vld [vmem:[#allocation8 + $0x5a8] ss:$12 sps:$4 sm:$0xff]  }
 0x280   :  { %7576 = vmatprep.subr.bf16.mxu1 %v9026_v36  ;;  %v9067_v36 = vld [vmem:[#allocation8 + $0x4e8] ss:$12 sps:$4 sm:$0xff]  }
 0x281   :  { %7577 = vmatpush3.bf16.msra.mxu1 %v9027_v42  ;;  %v10087_v42 = vrot.slane %v447_v63, %v9665_v23 }
 0x282   :  { %5776 = vmatpush1.bf16.msra.mxu0 %v9004_v38  ;;  %7626 = vmatprep.subr.bf16.mxu1 %v9034_v44  ;;  %v10673_v38 = vsub.s32 3, %v9652_v9 }
 0x283   :  { %5777 = vmatprep.subr.bf16.mxu0 %v9009_v60  ;;  %v9052_v60 = vld [vmem:[#allocation8 + $0x4f8] ss:$12 sps:$4 sm:$0xff]  }
 0x284   :  { %v10091_v44 = vrot.slane %v447_v63, %v10673_v38 }
 0x285   :  { %5727 = vmatmul.mubr.bf16.gmra.mrb[116].mxu0 %v9798_v17  ;;  %6379 = vmatmul.mubr.bf16.gmra.mrb[148].mxu1 %v9798_v17  ;;  %v9020_v17 = vld [vmem:[#allocation8 + $0x438] ss:$12 sps:$4 sm:$0xff]  }
 0x286   :  { %5736 = vmatprep.mubr.bf16.mxu0 %v9823_v4  ;;  %5778 = vmatpush1.bf16.msra.mxu0 %v9007_v1  ;;  %v9074_v1 = vld [vmem:[#allocation8 + $0x5c0] ss:$12 sps:$4 sm:$0xff]  }
 0x287   :  { %6386 = vmatprep.mubr.bf16.mxu1 %v9823_v4  ;;  %5779 = vmatprep.subr.bf16.mxu0 %v9014_v34  ;;  %v9023_v4 = vld [vmem:[#allocation8 + $0x450] ss:$12 sps:$4 sm:$0xff]  }
 0x28a   :  { %5780 = vmatpush1.bf16.msra.mxu0 %v9012_v33 }
 0x28b   :  { %5781 = vmatprep.subr.bf16.mxu0 %v9017_v55 }
 0x28d   :  { %5737 = vmatmul.mubr.bf16.gmra.mrb[120].mxu0 %v9819_v8  ;;  %6387 = vmatmul.mubr.bf16.gmra.mrb[152].mxu1 %v9819_v8  ;;  %v9028_v8 = vld [vmem:[#allocation8 + $0x468] ss:$12 sps:$4 sm:$0xff]  }
 0x28e   :  { %5746 = vmatprep.mubr.bf16.mxu0 %v9843_v50  ;;  %5782 = vmatpush1.bf16.msra.mxu0 %v9015_v37 }
 0x28f   :  { %6394 = vmatprep.mubr.bf16.mxu1 %v9843_v50  ;;  %5783 = vmatprep.subr.bf16.mxu0 %v9022_v31  ;;  %v9031_v50 = vld [vmem:[#allocation8 + $0x480] ss:$12 sps:$4 sm:$0xff]  }
 0x292   :  { %5784 = vmatpush1.bf16.msra.mxu0 %v9020_v17 }
 0x293   :  { %5785 = vmatprep.subr.bf16.mxu0 %v9025_v2 }
 0x295   :  { %5747 = vmatmul.mubr.bf16.gmra.mrb[124].mxu0 %v9839_v29  ;;  %6395 = vmatmul.mubr.bf16.gmra.mrb[156].mxu1 %v9839_v29  ;;  %v9036_v29 = vld [vmem:[#allocation8 + $0x498] ss:$12 sps:$4 sm:$0xff]  }
 0x296   :  { %5786 = vmatpush1.bf16.msra.mxu0 %v9023_v4  ;;  %5789 = vmatprep.mubr.bf16.mxu0 %v9905_v49 }
 0x297   :  { %6435 = vmatprep.mubr.bf16.mxu1 %v9905_v49  ;;  %5787 = vmatprep.subr.bf16.mxu0 %v9030_v19  ;;  %v9041_v49 = vld [vmem:[#allocation8 + $0x4b4] ss:$12 sps:$4 sm:$0xff]  }
 0x29a   :  { %5788 = vmatpush1.bf16.msra.mxu0 %v9028_v8 }
 0x29b   :  { %5870 = vmatprep.subr.bf16.mxu0 %v9033_v21 }
 0x29d   :  { %5790 = vmatmul.mubr.bf16.vlgmr.msra.gmra.mrb[96].mxu0 %v9900_v58  ;;  %6436 = vmatmul.mubr.bf16.vlgmr.msra.gmra.mrb[160].mxu1 %v9900_v58  ;;  %v9058_v58 = vld [vmem:[#allocation8 + $0x590] ss:$12 sps:$4 sm:$0xff]  }
 0x29e   :  { %5799 = vmatprep.mubr.bf16.mxu0 %v9925_v30  ;;  %5871 = vmatpush1.bf16.msra.mxu0 %v9031_v50 }
 0x29f   :  { %6443 = vmatprep.mubr.bf16.mxu1 %v9925_v30  ;;  %7627 = vmatpush3.bf16.msra.mxu1 %v9035_v32  ;;  %v9044_v30 = vld [vmem:[#allocation8 + $0x4c8] ss:$12 sps:$4 sm:$0xff]  }
 0x2a0   :  { %5872 = vmatprep.subr.bf16.mxu0 %v9038_v47  ;;  %7628 = vmatprep.subr.bf16.mxu1 %v9042_v52  ;;  %v9062_v47 = vld [vmem:[#allocation8 + $0x52c] ss:$12 sps:$4 sm:$0xff]  }
 0x2a2   :  { %5873 = vmatpush1.bf16.msra.mxu0 %v9036_v29 }
 0x2a3   :  { %5874 = vmatprep.subr.bf16.mxu0 %v9041_v49  ;;  %7629 = vmatpush3.bf16.msra.mxu1 %v9043_v12  ;;  %v9075_v49 = vld [vmem:[#allocation8 + $0x500] ss:$12 sps:$4 sm:$0xff]  }
 0x2a4   :  { %7630 = vmatprep.subr.bf16.mxu1 %v9050_v24 }
 0x2a5   :  { %5800 = vmatmul.mubr.bf16.gmra.mrb[100].mxu0 %v9920_v5  ;;  %6444 = vmatmul.mubr.bf16.gmra.mrb[164].mxu1 %v9920_v5  ;;  %v10080_v5 = vrot.slane %v447_v63, %v9659_v7 }
 0x2a6   :  { %5809 = vmatprep.mubr.bf16.mxu0 %v9945_v43  ;;  %5875 = vmatpush1.bf16.msra.mxu0 %v9039_v16 }
 0x2a7   :  { %6451 = vmatprep.mubr.bf16.mxu1 %v9945_v43  ;;  %5876 = vmatprep.subr.bf16.mxu0 %v9046_v51  ;;  %v10083_v43 = vrot.slane %v447_v63, %v9662_v11 }
 0x2a8   :  { %7631 = vmatpush3.bf16.msra.mxu1 %v9051_v15  ;;  %v9082_v15 = vld [vmem:[#allocation8 + $0x5d8] ss:$12 sps:$4 sm:$0xff]  }
 0x2a9   :  { %7632 = vmatprep.subr.bf16.mxu1 %v9058_v58 }
 0x2aa   :  { %5877 = vmatpush1.bf16.msra.mxu0 %v9044_v30 }
 0x2ab   :  { %5878 = vmatprep.subr.bf16.mxu0 %v9049_v57 }
 0x2ac   :  { %7633 = vmatpush3.bf16.msra.mxu1 %v9059_v45 }
 0x2ad   :  { %5810 = vmatmul.mubr.bf16.gmra.mrb[104].mxu0 %v9940_v18  ;;  %6452 = vmatmul.mubr.bf16.gmra.mrb[168].mxu1 %v9940_v18  ;;  %v9057_v18 = vld [vmem:[#allocation8 + $0x514] ss:$12 sps:$4 sm:$0xff]  }
 0x2ae   :  { %5819 = vmatprep.mubr.bf16.mxu0 %v9965_v59  ;;  %5879 = vmatpush1.bf16.msra.mxu0 %v9047_v0  ;;  %v9060_v0 = vld [vmem:[#allocation8 + $0x528] ss:$12 sps:$4 sm:$0xff]  }
 0x2af   :  { %6459 = vmatprep.mubr.bf16.mxu1 %v9965_v59  ;;  %5880 = vmatprep.subr.bf16.mxu0 %v9054_v20  ;;  %v9055_v59 = vld [vmem:[#allocation8 + $0x510] ss:$12 sps:$4 sm:$0xff]  }
 0x2b0   :  { %v3001_v34 = vpop.f32.mrb[64].mxu0  ;;  %v3227_v33 = vpop.f32.mrb[64].mxu1  ;;  %7634 = vmatprep.subr.bf16.mxu1 %v9066_v25  ;;  %v9065_v25 = vld [vmem:[#allocation8 + $0x544] ss:$12 sps:$4 sm:$0xff]  }
 0x2b1   :  { %v7946_v55 = vadd.f32 %v3001_v34, %v10080_v5  ;;  %v7978_v37 = vadd.f32 %v3227_v33, %v10083_v43  ;;  %v3003_v31 = vpop.f32.mrb[65].mxu0  ;;  %v3229_v17 = vpop.f32.mrb[65].mxu1  ;;  %7635 = vmatpush3.bf16.msra.mxu1 %v9067_v36 }
 0x2b2   :  { %v7947_v9 = vadd.f32 %v3003_v31, %v10087_v42  ;;  %v7979_v2 = vadd.f32 %v3229_v17, %v10091_v44  ;;  %v3005_v4 = vpop.f32.mrb[66].mxu0  ;;  %v3231_v19 = vpop.f32.mrb[66].mxu1  ;;  %5881 = vmatpush1.bf16.msra.mxu0 %v9052_v60  ;;  %7636 = vmatprep.subr.bf16.mxu1 %v9074_v1  ;;  %v9083_v1 = vld [vmem:[#allocation8 + $0x518] ss:$12 sps:$4 sm:$0xff]  }
 0x2b3   :  { %v7948_v8 = vadd.f32 %v3005_v4, %v10080_v5  ;;  %v7980_v21 = vadd.f32 %v3231_v19, %v10083_v43  ;;  %v3007_v50 = vpop.f32.mrb[67].mxu0  ;;  %v3233_v32 = vpop.f32.mrb[67].mxu1  ;;  %5882 = vmatprep.subr.bf16.mxu0 %v9057_v18  ;;  %v3314_v12 = vmax.f32 %v7946_v55, 0.0  ;;  %v3316_v24 = vmax.f32 %v7978_v37, 0.0 }
 0x2b4   :  { %v7949_v52 = vadd.f32 %v3007_v50, %v10087_v42  ;;  %v7981_v29 = vadd.f32 %v3233_v32, %v10091_v44  ;;  %v3315_v58 = vmax.f32 %v7947_v9, 0.0  ;;  %v3317_v30 = vmax.f32 %v7979_v2, 0.0  ;;  %v9063_v9 = vld [vmem:[#allocation8 + $0x540] ss:$12 sps:$4 sm:$0xff]   ;;  %v9068_v32 = vld [vmem:[#allocation8 + $0x558] ss:$12 sps:$4 sm:$0xff]  }
 0x2b5   :  { %v3326_v16 = vmax.f32 %v7948_v8, 0.0  ;;  %v3328_v51 = vmax.f32 %v7980_v21, 0.0  ;;  %5820 = vmatmul.mubr.bf16.gmra.mrb[108].mxu0 %v9960_v6  ;;  %6460 = vmatmul.mubr.bf16.gmra.mrb[172].mxu1 %v9960_v6  ;;  %v9070_v8 = vld [vmem:[#allocation8 + $0x55c] ss:$12 sps:$4 sm:$0xff]  }
 0x2b6   :  { %v3327_v57 = vmax.f32 %v7949_v52, 0.0  ;;  %v3329_v45 = vmax.f32 %v7981_v29, 0.0  ;;  %5829 = vmatprep.mubr.bf16.mxu0 %v9985_v3  ;;  %5883 = vmatpush1.bf16.msra.mxu0 %v9055_v59 }
 0x2b7   :  { %v10105_v63 = vpack.c.bf16 %v3326_v16, %v3314_v12  ;;  %v10107_v20 = vpack.c.bf16 %v3328_v51, %v3316_v24  ;;  %6467 = vmatprep.mubr.bf16.mxu1 %v9985_v3  ;;  %5884 = vmatprep.subr.bf16.mxu0 %v9062_v47  ;;  %v9090_v47 = vld [vmem:[#allocation8 + $0x5f0] ss:$12 sps:$4 sm:$0xff]  }
 0x2b8   :  { %v10110_v36 = vpack.c.bf16 %v3327_v57, %v3315_v58  ;;  %v10112_v6 = vpack.c.bf16 %v3329_v45, %v3317_v30  ;;  %v3011_v38 = vpop.f32.mrb[68].mxu0  ;;  %v3237_v60 = vpop.f32.mrb[68].mxu1  ;;  %7637 = vmatpush3.bf16.msra.mxu1 %v9075_v49  ;;  %v9091_v24 = vld [vmem:[#allocation8 + $0x530] ss:$12 sps:$4 sm:$0xff]   ;;  %v9098_v30 = vld [vmem:[#allocation8 + $0x6c8] ss:$12 sps:$4 sm:$0xff]  }
 0x2b9   :  { %v7950_v18 = vadd.f32 %v3011_v38, %v10080_v5  ;;  %v7982_v34 = vadd.f32 %v3237_v60, %v10083_v43  ;;  %v3013_v33 = vpop.f32.mrb[69].mxu0  ;;  %v3239_v55 = vpop.f32.mrb[69].mxu1  ;;  %7638 = vmatprep.subr.bf16.mxu1 %v9082_v15 }
 0x2ba   :  { %v7951_v37 = vadd.f32 %v3013_v33, %v10087_v42  ;;  %v7983_v3 = vadd.f32 %v3239_v55, %v10091_v44  ;;  %v3015_v31 = vpop.f32.mrb[70].mxu0  ;;  %v3241_v17 = vpop.f32.mrb[70].mxu1  ;;  %5885 = vmatpush1.bf16.msra.mxu0 %v9060_v0  ;;  %v9073_v0 = vld [vmem:[#allocation8 + $0x574] ss:$12 sps:$4 sm:$0xff]  }
 0x2bb   :  { %v7952_v2 = vadd.f32 %v3015_v31, %v10080_v5  ;;  %v7984_v4 = vadd.f32 %v3241_v17, %v10083_v43  ;;  %v3017_v19 = vpop.f32.mrb[71].mxu0  ;;  %v3243_v59 = vpop.f32.mrb[71].mxu1  ;;  %5886 = vmatprep.subr.bf16.mxu0 %v9065_v25  ;;  %v3338_v52 = vmax.f32 %v7950_v18, 0.0  ;;  %v3340_v29 = vmax.f32 %v7982_v34, 0.0  ;;  %v9071_v31 = vld [vmem:[#allocation8 + $0x570] ss:$12 sps:$4 sm:$0xff]  }
 0x2bc   :  { %v7953_v21 = vadd.f32 %v3017_v19, %v10087_v42  ;;  %v7985_v50 = vadd.f32 %v3243_v59, %v10091_v44  ;;  %7639 = vmatpush3.bf16.msra.mxu1 %v9083_v1  ;;  %v3339_v16 = vmax.f32 %v7951_v37, 0.0  ;;  %v3341_v51 = vmax.f32 %v7983_v3, 0.0  ;;  %v9078_v19 = vld [vmem:[#allocation8 + $0x58c] ss:$12 sps:$4 sm:$0xff]  }
 0x2bd   :  { %v3350_v49 = vmax.f32 %v7952_v2, 0.0  ;;  %v3352_v12 = vmax.f32 %v7984_v4, 0.0  ;;  %5830 = vmatmul.mubr.bf16.gmra.mrb[112].mxu0 %v9980_v40  ;;  %6468 = vmatmul.mubr.bf16.gmra.mrb[176].mxu1 %v9980_v40 }
 0x2be   :  { %v3351_v15 = vmax.f32 %v7953_v21, 0.0  ;;  %v3353_v58 = vmax.f32 %v7985_v50, 0.0  ;;  %5839 = vmatprep.mubr.bf16.mxu0 %v10005_v26  ;;  %5887 = vmatpush1.bf16.msra.mxu0 %v9063_v9 }
 0x2bf   :  { %v10125_v57 = vpack.c.bf16 %v3350_v49, %v3338_v52  ;;  %v10127_v45 = vpack.c.bf16 %v3352_v12, %v3340_v29  ;;  %6475 = vmatprep.mubr.bf16.mxu1 %v10005_v26  ;;  %5888 = vmatprep.subr.bf16.mxu0 %v9070_v8 }
 0x2c0   :  { %v10130_v25 = vpack.c.bf16 %v3351_v15, %v3339_v16  ;;  %v10132_v40 = vpack.c.bf16 %v3353_v58, %v3341_v51  ;;  %v3021_v38 = vpop.f32.mrb[72].mxu0  ;;  %v3247_v60 = vpop.f32.mrb[72].mxu1  ;;  %7640 = vmatprep.subr.bf16.mxu1 %v9090_v47  ;;  %v9081_v15 = vld [vmem:[#allocation8 + $0x5a4] ss:$12 sps:$4 sm:$0xff]  }
 0x2c1   :  { %v7954_v1 = vadd.f32 %v3021_v38, %v10080_v5  ;;  %v7986_v18 = vadd.f32 %v3247_v60, %v10083_v43  ;;  %v3023_v34 = vpop.f32.mrb[73].mxu0  ;;  %v3249_v33 = vpop.f32.mrb[73].mxu1  ;;  %7641 = vmatpush3.bf16.msra.mxu1 %v9091_v24  ;;  %v9076_v24 = vld [vmem:[#allocation8 + $0x588] ss:$12 sps:$4 sm:$0xff]  }
 0x2c2   :  { %v7955_v55 = vadd.f32 %v3023_v34, %v10087_v42  ;;  %v7987_v26 = vadd.f32 %v3249_v33, %v10091_v44  ;;  %v3025_v37 = vpop.f32.mrb[74].mxu0  ;;  %v3251_v3 = vpop.f32.mrb[74].mxu1  ;;  %5889 = vmatpush1.bf16.msra.mxu0 %v9068_v32  ;;  %7690 = vmatprep.subr.bf16.mxu1 %v9098_v30 }
 0x2c3   :  { %v7956_v17 = vadd.f32 %v3025_v37, %v10080_v5  ;;  %v7988_v9 = vadd.f32 %v3251_v3, %v10083_v43  ;;  %v3027_v2 = vpop.f32.mrb[75].mxu0  ;;  %v3253_v4 = vpop.f32.mrb[75].mxu1  ;;  %5890 = vmatprep.subr.bf16.mxu0 %v9073_v0  ;;  %v3362_v21 = vmax.f32 %v7954_v1, 0.0  ;;  %v3364_v50 = vmax.f32 %v7986_v18, 0.0 }
 0x2c4   :  { %v7957_v59 = vadd.f32 %v3027_v2, %v10087_v42  ;;  %v7989_v8 = vadd.f32 %v3253_v4, %v10091_v44  ;;  %v3363_v32 = vmax.f32 %v7955_v55, 0.0  ;;  %v3365_v29 = vmax.f32 %v7987_v26, 0.0  ;;  %v9079_v26 = vld [vmem:[#allocation8 + $0x5a0] ss:$12 sps:$4 sm:$0xff]  }
 0x2c5   :  { %v3374_v47 = vmax.f32 %v7956_v17, 0.0  ;;  %v3376_v52 = vmax.f32 %v7988_v9, 0.0  ;;  %5840 = vmatmul.mubr.bf16.gmra.mrb[116].mxu0 %v10000_v46  ;;  %6476 = vmatmul.mubr.bf16.gmra.mrb[180].mxu1 %v10000_v46  ;;  %v9086_v9 = vld [vmem:[#allocation8 + $0x5bc] ss:$12 sps:$4 sm:$0xff]  }
 0x2c6   :  { %v3375_v49 = vmax.f32 %v7957_v59, 0.0  ;;  %v3377_v12 = vmax.f32 %v7989_v8, 0.0  ;;  %5849 = vmatprep.mubr.bf16.mxu0 %v10025_v62  ;;  %5891 = vmatpush1.bf16.msra.mxu0 %v9071_v31 }
 0x2c7   :  { %v10145_v16 = vpack.c.bf16 %v3374_v47, %v3362_v21  ;;  %v10147_v51 = vpack.c.bf16 %v3376_v52, %v3364_v50  ;;  %6483 = vmatprep.mubr.bf16.mxu1 %v10025_v62  ;;  %5892 = vmatprep.subr.bf16.mxu0 %v9078_v19 }
 0x2c8   :  { %v10150_v58 = vpack.c.bf16 %v3375_v49, %v3363_v32  ;;  %v10152_v30 = vpack.c.bf16 %v3377_v12, %v3365_v29  ;;  %v3031_v46 = vpop.f32.mrb[76].mxu0  ;;  %v3257_v0 = vpop.f32.mrb[76].mxu1  ;;  %v9084_v29 = vld [vmem:[#allocation8 + $0x5b8] ss:$12 sps:$4 sm:$0xff]  }
 0x2c9   :  { %v7958_v38 = vadd.f32 %v3031_v46, %v10080_v5  ;;  %v7990_v60 = vadd.f32 %v3257_v0, %v10083_v43  ;;  %v3033_v1 = vpop.f32.mrb[77].mxu0  ;;  %v3259_v18 = vpop.f32.mrb[77].mxu1 }
 0x2ca   :  { %v7959_v34 = vadd.f32 %v3033_v1, %v10087_v42  ;;  %v7991_v33 = vadd.f32 %v3259_v18, %v10091_v44  ;;  %v3035_v55 = vpop.f32.mrb[78].mxu0  ;;  %v3261_v62 = vpop.f32.mrb[78].mxu1  ;;  %5893 = vmatpush1.bf16.msra.mxu0 %v9076_v24  ;;  %v9089_v24 = vld [vmem:[#allocation8 + $0x5d4] ss:$12 sps:$4 sm:$0xff]  }
 0x2cb   :  { %v7960_v37 = vadd.f32 %v3035_v55, %v10080_v5  ;;  %v7992_v3 = vadd.f32 %v3261_v62, %v10083_v43  ;;  %v3037_v31 = vpop.f32.mrb[79].mxu0  ;;  %v3263_v17 = vpop.f32.mrb[79].mxu1  ;;  %5894 = vmatprep.subr.bf16.mxu0 %v9081_v15  ;;  %v3386_v19 = vmax.f32 %v7958_v38, 0.0  ;;  %v3388_v59 = vmax.f32 %v7990_v60, 0.0  ;;  %v9087_v62 = vld [vmem:[#allocation8 + $0x5d0] ss:$12 sps:$4 sm:$0xff]  }
 0x2cc   :  { %v7961_v2 = vadd.f32 %v3037_v31, %v10087_v42  ;;  %v7993_v4 = vadd.f32 %v3263_v17, %v10091_v44  ;;  %v3387_v50 = vmax.f32 %v7959_v34, 0.0  ;;  %v3389_v47 = vmax.f32 %v7991_v33, 0.0  ;;  %v9094_v17 = vld [vmem:[#allocation8 + $0x5ec] ss:$12 sps:$4 sm:$0xff]  }
 0x2cd   :  { %v3398_v8 = vmax.f32 %v7960_v37, 0.0  ;;  %v3400_v21 = vmax.f32 %v7992_v3, 0.0  ;;  %5850 = vmatmul.mubr.bf16.gmra.mrb[120].mxu0 %v10020_v10  ;;  %6484 = vmatmul.mubr.bf16.gmra.mrb[184].mxu1 %v10020_v10 }
 0x2ce   :  { %v3399_v52 = vmax.f32 %v7961_v2, 0.0  ;;  %v3401_v32 = vmax.f32 %v7993_v4, 0.0  ;;  %5859 = vmatprep.mubr.bf16.mxu0 %v10045_v54  ;;  %5895 = vmatpush1.bf16.msra.mxu0 %v9079_v26 }
 0x2cf   :  { %v10165_v49 = vpack.c.bf16 %v3398_v8, %v3386_v19  ;;  %v10167_v12 = vpack.c.bf16 %v3400_v21, %v3388_v59  ;;  %6491 = vmatprep.mubr.bf16.mxu1 %v10045_v54  ;;  %5896 = vmatprep.subr.bf16.mxu0 %v9086_v9 }
 0x2d0   :  { %v10170_v15 = vpack.c.bf16 %v3399_v52, %v3387_v50  ;;  %v10172_v46 = vpack.c.bf16 %v3401_v32, %v3389_v47  ;;  %v3041_v10 = vpop.f32.mrb[80].mxu0  ;;  %v3267_v0 = vpop.f32.mrb[80].mxu1  ;;  %v9092_v32 = vld [vmem:[#allocation8 + $0x5e8] ss:$12 sps:$4 sm:$0xff]  }
 0x2d1   :  { %v7962_v38 = vadd.f32 %v3041_v10, %v10080_v5  ;;  %v7994_v60 = vadd.f32 %v3267_v0, %v10083_v43  ;;  %v3043_v1 = vpop.f32.mrb[81].mxu0  ;;  %v3269_v18 = vpop.f32.mrb[81].mxu1  ;;  %v9097_v10 = vld [vmem:[#allocation8 + $0x604] ss:$12 sps:$4 sm:$0xff]  }
 0x2d2   :  { %v7963_v34 = vadd.f32 %v3043_v1, %v10087_v42  ;;  %v7995_v33 = vadd.f32 %v3269_v18, %v10091_v44  ;;  %v3045_v55 = vpop.f32.mrb[82].mxu0  ;;  %v3271_v54 = vpop.f32.mrb[82].mxu1  ;;  %5897 = vmatpush1.bf16.msra.mxu0 %v9084_v29 }
 0x2d3   :  { %v7964_v26 = vadd.f32 %v3045_v55, %v10080_v5  ;;  %v7996_v37 = vadd.f32 %v3271_v54, %v10083_v43  ;;  %v3047_v3 = vpop.f32.mrb[83].mxu0  ;;  %v3273_v31 = vpop.f32.mrb[83].mxu1  ;;  %5898 = vmatprep.subr.bf16.mxu0 %v9089_v24  ;;  %v3410_v4 = vmax.f32 %v7962_v38, 0.0  ;;  %v3412_v19 = vmax.f32 %v7994_v60, 0.0 }
 0x2d4   :  { %v7965_v9 = vadd.f32 %v3047_v3, %v10087_v42  ;;  %v7997_v2 = vadd.f32 %v3273_v31, %v10091_v44  ;;  %v3411_v21 = vmax.f32 %v7963_v34, 0.0  ;;  %v3413_v50 = vmax.f32 %v7995_v33, 0.0 }
 0x2d5   :  { %v3422_v59 = vmax.f32 %v7964_v26, 0.0  ;;  %v3424_v8 = vmax.f32 %v7996_v37, 0.0  ;;  %5860 = vmatmul.mubr.bf16.gmra.mrb[124].mxu0 %v10040_v56  ;;  %6492 = vmatmul.mubr.bf16.gmra.mrb[188].mxu1 %v10040_v56  ;;  %v9095_v26 = vld [vmem:[#allocation8 + $0x600] ss:$12 sps:$4 sm:$0xff]  }
 0x2d6   :  { %v3423_v47 = vmax.f32 %v7965_v9, 0.0  ;;  %v3425_v52 = vmax.f32 %v7997_v2, 0.0  ;;  %5899 = vmatpush1.bf16.msra.mxu0 %v9087_v62  ;;  %5902 = vmatprep.mubr.bf16.mxu0 %v9907_v41  ;;  %v9099_v9 = vld [vmem:[#allocation8 + $0x608] ss:$12 sps:$4 sm:$0xff]  }
 0x2d7   :  { %v10185_v29 = vpack.c.bf16 %v3422_v59, %v3410_v4  ;;  %v10187_v24 = vpack.c.bf16 %v3424_v8, %v3412_v19  ;;  %6532 = vmatprep.mubr.bf16.mxu1 %v9907_v41  ;;  %5900 = vmatprep.subr.bf16.mxu0 %v9094_v17  ;;  %v9102_v19 = vld [vmem:[#allocation8 + $0x61c] ss:$12 sps:$4 sm:$0xff]   ;;  %v9106_v59 = vld [vmem:[#allocation8 + $0x6e0] ss:$12 sps:$4 sm:$0xff]  }
 0x2d8   :  { %v10190_v0 = vpack.c.bf16 %v3423_v47, %v3411_v21  ;;  %v10192_v38 = vpack.c.bf16 %v3425_v52, %v3413_v50  ;;  %v3051_v56 = vpop.f32.mrb[84].mxu0  ;;  %v3277_v60 = vpop.f32.mrb[84].mxu1 }
 0x2d9   :  { %v7966_v1 = vadd.f32 %v3051_v56, %v10080_v5  ;;  %v7998_v18 = vadd.f32 %v3277_v60, %v10083_v43  ;;  %v3053_v34 = vpop.f32.mrb[85].mxu0  ;;  %v3279_v33 = vpop.f32.mrb[85].mxu1 }
 0x2da   :  { %v7967_v55 = vadd.f32 %v3053_v34, %v10087_v42  ;;  %v7999_v54 = vadd.f32 %v3279_v33, %v10091_v44  ;;  %v3055_v62 = vpop.f32.mrb[86].mxu0  ;;  %v3281_v41 = vpop.f32.mrb[86].mxu1  ;;  %5901 = vmatpush1.bf16.msra.mxu0 %v9092_v32 }
 0x2db   :  { %v7968_v37 = vadd.f32 %v3055_v62, %v10080_v5  ;;  %v8000_v3 = vadd.f32 %v3281_v41, %v10083_v43  ;;  %v3057_v31 = vpop.f32.mrb[87].mxu0  ;;  %v3283_v17 = vpop.f32.mrb[87].mxu1  ;;  %5983 = vmatprep.subr.bf16.mxu0 %v9097_v10  ;;  %v3434_v8 = vmax.f32 %v7966_v1, 0.0  ;;  %v3436_v21 = vmax.f32 %v7998_v18, 0.0  ;;  %v9100_v10 = vld [vmem:[#allocation8 + $0x618] ss:$12 sps:$4 sm:$0xff]  }
 0x2dc   :  { %v7969_v2 = vadd.f32 %v3057_v31, %v10087_v42  ;;  %v8001_v4 = vadd.f32 %v3283_v17, %v10091_v44  ;;  %v3435_v52 = vmax.f32 %v7967_v55, 0.0  ;;  %v3437_v32 = vmax.f32 %v7999_v54, 0.0  ;;  %v9105_v1 = vld [vmem:[#allocation8 + $0x634] ss:$12 sps:$4 sm:$0xff]   ;;  %v9114_v41 = vld [vmem:[#allocation8 + $0x6f8] ss:$12 sps:$4 sm:$0xff]  }
 0x2dd   :  { %v3446_v50 = vmax.f32 %v7968_v37, 0.0  ;;  %v3448_v47 = vmax.f32 %v8000_v3, 0.0  ;;  %5903 = vmatmul.mubr.bf16.vlgmr.msra.gmra.mrb[96].mxu0 %v9902_v28  ;;  %6533 = vmatmul.mubr.bf16.vlgmr.msra.gmra.mrb[192].mxu1 %v9902_v28  ;;  %v9107_v18 = vld [vmem:[#allocation8 + $0x620] ss:$12 sps:$4 sm:$0xff]  }
 0x2de   :  { %v3447_v56 = vmax.f32 %v7969_v2, 0.0  ;;  %v3449_v60 = vmax.f32 %v8001_v4, 0.0  ;;  %5912 = vmatprep.mubr.bf16.mxu0 %v9927_v53  ;;  %5984 = vmatpush1.bf16.msra.mxu0 %v9095_v26  ;;  %v9103_v4 = vld [vmem:[#allocation8 + $0x630] ss:$12 sps:$4 sm:$0xff]  }
 0x2df   :  { %v10205_v34 = vpack.c.bf16 %v3446_v50, %v3434_v8  ;;  %v10207_v33 = vpack.c.bf16 %v3448_v47, %v3436_v21  ;;  %6540 = vmatprep.mubr.bf16.mxu1 %v9927_v53  ;;  %7691 = vmatpush3.bf16.msra.mxu1 %v9099_v9  ;;  %v9110_v50 = vld [vmem:[#allocation8 + $0x64c] ss:$12 sps:$4 sm:$0xff]  }
 0x2e0   :  { %v10210_v62 = vpack.c.bf16 %v3447_v56, %v3435_v52  ;;  %v10212_v28 = vpack.c.bf16 %v3449_v60, %v3437_v32  ;;  %v3061_v55 = vpop.f32.mrb[88].mxu0  ;;  %v3287_v54 = vpop.f32.mrb[88].mxu1  ;;  %5985 = vmatprep.subr.bf16.mxu0 %v9102_v19  ;;  %7692 = vmatprep.subr.bf16.mxu1 %v9106_v59  ;;  %v9115_v32 = vld [vmem:[#allocation8 + $0x638] ss:$12 sps:$4 sm:$0xff]  }
 0x2e1   :  { %v7970_v26 = vadd.f32 %v3061_v55, %v10080_v5  ;;  %v8002_v37 = vadd.f32 %v3287_v54, %v10083_v43  ;;  %v3063_v3 = vpop.f32.mrb[89].mxu0  ;;  %v3289_v31 = vpop.f32.mrb[89].mxu1  ;;  %v9122_v54 = vld [vmem:[#allocation8 + $0x710] ss:$12 sps:$4 sm:$0xff]  }
 0x2e2   :  { %v7971_v53 = vadd.f32 %v3063_v3, %v10087_v42  ;;  %v8003_v17 = vadd.f32 %v3289_v31, %v10091_v44  ;;  %v3065_v9 = vpop.f32.mrb[90].mxu0  ;;  %v3291_v2 = vpop.f32.mrb[90].mxu1  ;;  %5986 = vmatpush1.bf16.msra.mxu0 %v9100_v10 }
 0x2e3   :  { %v7972_v8 = vadd.f32 %v3065_v9, %v10080_v5  ;;  %v8004_v19 = vadd.f32 %v3291_v2, %v10083_v43  ;;  %v3067_v59 = vpop.f32.mrb[91].mxu0  ;;  %v3293_v21 = vpop.f32.mrb[91].mxu1  ;;  %5987 = vmatprep.subr.bf16.mxu0 %v9105_v1  ;;  %7693 = vmatpush3.bf16.msra.mxu1 %v9107_v18  ;;  %v3458_v56 = vmax.f32 %v7970_v26, 0.0  ;;  %v3460_v60 = vmax.f32 %v8002_v37, 0.0  ;;  %v9108_v9 = vld [vmem:[#allocation8 + $0x648] ss:$12 sps:$4 sm:$0xff]  }
 0x2e4   :  { %v7973_v47 = vadd.f32 %v3067_v59, %v10087_v42  ;;  %v8005_v52 = vadd.f32 %v3293_v21, %v10091_v44  ;;  %7694 = vmatprep.subr.bf16.mxu1 %v9114_v41  ;;  %v3459_v3 = vmax.f32 %v7971_v53, 0.0  ;;  %v3461_v31 = vmax.f32 %v8003_v17, 0.0  ;;  %v9113_v26 = vld [vmem:[#allocation8 + $0x664] ss:$12 sps:$4 sm:$0xff]  }
 0x2e5   :  { %v3470_v55 = vmax.f32 %v7972_v8, 0.0  ;;  %v3472_v10 = vmax.f32 %v8004_v19, 0.0  ;;  %5913 = vmatmul.mubr.bf16.gmra.mrb[100].mxu0 %v9922_v27  ;;  %6541 = vmatmul.mubr.bf16.gmra.mrb[196].mxu1 %v9922_v27  ;;  %v9123_v8 = vld [vmem:[#allocation8 + $0x650] ss:$12 sps:$4 sm:$0xff]  }
 0x2e6   :  { %v3471_v1 = vmax.f32 %v7973_v47, 0.0  ;;  %v3473_v18 = vmax.f32 %v8005_v52, 0.0  ;;  %5922 = vmatprep.mubr.bf16.mxu0 %v9947_v13  ;;  %5988 = vmatpush1.bf16.msra.mxu0 %v9103_v4 }
 0x2e7   :  { %v10225_v2 = vpack.c.bf16 %v3470_v55, %v3458_v56  ;;  %v10227_v41 = vpack.c.bf16 %v3472_v10, %v3460_v60  ;;  %6548 = vmatprep.mubr.bf16.mxu1 %v9947_v13  ;;  %5989 = vmatprep.subr.bf16.mxu0 %v9110_v50  ;;  %v9111_v56 = vld [vmem:[#allocation8 + $0x660] ss:$12 sps:$4 sm:$0xff]  }
 0x2e8   :  { %v10230_v37 = vpack.c.bf16 %v3471_v1, %v3459_v3  ;;  %v10232_v27 = vpack.c.bf16 %v3473_v18, %v3461_v31  ;;  %v3071_v53 = vpop.f32.mrb[92].mxu0  ;;  %v3297_v17 = vpop.f32.mrb[92].mxu1  ;;  %7695 = vmatpush3.bf16.msra.mxu1 %v9115_v32  ;;  %v9118_v3 = vld [vmem:[#allocation8 + $0x67c] ss:$12 sps:$4 sm:$0xff]   ;;  %v9116_v1 = vld [vmem:[#allocation8 + $0x678] ss:$12 sps:$4 sm:$0xff]  }
 0x2e9   :  { %v7974_v19 = vadd.f32 %v3071_v53, %v10080_v5  ;;  %v8006_v4 = vadd.f32 %v3297_v17, %v10083_v43  ;;  %v3073_v59 = vpop.f32.mrb[93].mxu0  ;;  %v3299_v21 = vpop.f32.mrb[93].mxu1  ;;  %7696 = vmatprep.subr.bf16.mxu1 %v9122_v54  ;;  %v9130_v18 = vld [vmem:[#allocation8 + $0x728] ss:$12 sps:$4 sm:$0xff]  }
 0x2ea   :  { %v7975_v47 = vadd.f32 %v3073_v59, %v10087_v42  ;;  %v8007_v13 = vadd.f32 %v3299_v21, %v10091_v44  ;;  %v3075_v50 = vpop.f32.mrb[94].mxu0  ;;  %v3301_v52 = vpop.f32.mrb[94].mxu1  ;;  %5990 = vmatpush1.bf16.msra.mxu0 %v9108_v9 }
 0x2eb   :  { %v7976_v60 = vadd.f32 %v3075_v50, %v10080_v5  ;;  %v8008_v32 = vadd.f32 %v3301_v52, %v10083_v43  ;;  %v3077_v55 = vpop.f32.mrb[95].mxu0  ;;  %v3303_v10 = vpop.f32.mrb[95].mxu1  ;;  %5991 = vmatprep.subr.bf16.mxu0 %v9113_v26  ;;  %v3482_v53 = vmax.f32 %v7974_v19, 0.0  ;;  %v3484_v17 = vmax.f32 %v8006_v4, 0.0  ;;  %v9131_v5 = vld [vmem:[#allocation8 + $0x668] ss:$12 sps:$4 sm:$0xff]  }
 0x2ec   :  { %v7977_v31 = vadd.f32 %v3077_v55, %v10087_v42  ;;  %v8009_v54 = vadd.f32 %v3303_v10, %v10091_v44  ;;  %7697 = vmatpush3.bf16.msra.mxu1 %v9123_v8  ;;  %v3483_v43 = vmax.f32 %v7975_v47, 0.0  ;;  %v3485_v21 = vmax.f32 %v8007_v13, 0.0  ;;  %v9138_v42 = vld [vmem:[#allocation8 + $0x740] ss:$12 sps:$4 sm:$0xff]  }
 0x2ed   :  { %v3494_v59 = vmax.f32 %v7976_v60, 0.0  ;;  %v3496_v9 = vmax.f32 %v8008_v32, 0.0  ;;  %5923 = vmatmul.mubr.bf16.gmra.mrb[104].mxu0 %v9942_v22  ;;  %6549 = vmatmul.mubr.bf16.gmra.mrb[200].mxu1 %v9942_v22  ;;  %v9121_v19 = vld [vmem:[#allocation8 + $0x694] ss:$12 sps:$4 sm:$0xff]   ;;  %v9119_v60 = vld [vmem:[#allocation8 + $0x690] ss:$12 sps:$4 sm:$0xff]  }
 0x2ee   :  { %v3495_v26 = vmax.f32 %v7977_v31, 0.0  ;;  %v3497_v50 = vmax.f32 %v8009_v54, 0.0  ;;  %5932 = vmatprep.mubr.bf16.mxu0 %v9967_v39  ;;  %5992 = vmatpush1.bf16.msra.mxu0 %v9111_v56  ;;  %v9126_v55 = vld [vmem:[#allocation8 + $0x6ac] ss:$12 sps:$4 sm:$0xff]   ;;  %v9124_v54 = vld [vmem:[#allocation8 + $0x6a8] ss:$12 sps:$4 sm:$0xff]  }
 0x2ef   :  { %v10245_v44 = vpack.c.bf16 %v3494_v59, %v3482_v53  ;;  %v10247_v8 = vpack.c.bf16 %v3496_v9, %v3484_v17  ;;  %6556 = vmatprep.mubr.bf16.mxu1 %v9967_v39  ;;  %5993 = vmatprep.subr.bf16.mxu0 %v9118_v3  ;;  %v9139_v10 = vld [vmem:[#allocation8 + $0x680] ss:$12 sps:$4 sm:$0xff]   ;;  %v9146_v3 = vld [vmem:[#allocation8 + $0x758] ss:$12 sps:$4 sm:$0xff]  }
 0x2f0   :  { %v10250_v4 = vpack.c.bf16 %v3495_v26, %v3483_v43  ;;  %v10252_v22 = vpack.c.bf16 %v3497_v50, %v3485_v21  ;;  %v7450_v47 = vpop.f32.mrb[96].mxu1  ;;  %7698 = vmatprep.subr.bf16.mxu1 %v9130_v18  ;;  %v10674_v31 = vld [vmem:[#allocation17_spill] sm:$0xff]  ;;  %v9147_v53 = vld [vmem:[#allocation8 + $0x698] ss:$12 sps:$4 sm:$0xff]   ;;  %v9134_v43 = vld [vmem:[#allocation8 + $0x6dc] ss:$12 sps:$4 sm:$0xff]  }
 0x2f1   :  { %v7451_v13 = vpop.f32.mrb[97].mxu1  ;;  %7699 = vmatpush3.bf16.msra.mxu1 %v9131_v5  ;;  %v9127_v5 = vld [vmem:[#allocation8 + $0x6c0] ss:$12 sps:$4 sm:$0xff]   ;;  %v9154_v26 = vld [vmem:[#allocation8 + $0x770] ss:$12 sps:$4 sm:$0xff]   ;;  %v10675_v50 = vld [vmem:[#allocation16_spill] sm:$0xff] }
 0x2f2   :  { %v10254_v52 = vadd.f32 %v7451_v13, %v7450_v47  ;;  %5994 = vmatpush1.bf16.msra.mxu0 %v9116_v1  ;;  %v7453_v56 = vpop.f32.mrb[98].mxu1  ;;  %7700 = vmatprep.subr.bf16.mxu1 %v9138_v42  ;;  %v9129_v1 = vld [vmem:[#allocation8 + $0x6c4] ss:$12 sps:$4 sm:$0xff]   ;;  %v9162_v13 = vld [vmem:[#allocation8 + $0x848] ss:$12 sps:$4 sm:$0xff]  }
 0x2f3   :  { %v7454_v32 = vpop.f32.mrb[99].mxu1  ;;  %5995 = vmatprep.subr.bf16.mxu0 %v9121_v19  ;;  %v9155_v42 = vld [vmem:[#allocation8 + $0x6b0] ss:$12 sps:$4 sm:$0xff]   ;;  %v9132_v47 = vld [vmem:[#allocation8 + $0x6d8] ss:$12 sps:$4 sm:$0xff]  }
 0x2f4   :  { %v10256_v39 = vadd.f32 %v7454_v32, %v7453_v56  ;;  %v10676_v19 = vld [vmem:[#allocation19_spill] sm:$0xff] }
 0x2f5   :  { %5933 = vmatmul.mubr.bf16.gmra.mrb[108].mxu0 %v9962_v14  ;;  %6557 = vmatmul.mubr.bf16.gmra.mrb[204].mxu1 %v9962_v14  ;;  %v9137_v56 = vld [vmem:[#allocation8 + $0x6f4] ss:$12 sps:$4 sm:$0xff]  }
 0x2f6   :  { %5942 = vmatprep.mubr.bf16.mxu0 %v10674_v31  ;;  %5996 = vmatpush1.bf16.msra.mxu0 %v9119_v60 }
 0x2f7   :  { %6564 = vmatprep.mubr.bf16.mxu1 %v10674_v31  ;;  %5997 = vmatprep.subr.bf16.mxu0 %v9126_v55 }
 0x2f8   :  { %v7456_v18 = vpop.f32.mrb[100].mxu1  ;;  %7701 = vmatpush3.bf16.msra.mxu1 %v9139_v10 }
 0x2f9   :  { %v7457_v17 = vpop.f32.mrb[101].mxu1  ;;  %7702 = vmatprep.subr.bf16.mxu1 %v9146_v3  ;;  %v9135_v3 = vld [vmem:[#allocation8 + $0x6f0] ss:$12 sps:$4 sm:$0xff]  }
 0x2fa   :  { %v10262_v59 = vadd.f32 %v7457_v17, %v7456_v18  ;;  %5998 = vmatpush1.bf16.msra.mxu0 %v9124_v54  ;;  %v7459_v9 = vpop.f32.mrb[102].mxu1  ;;  %v9142_v54 = vld [vmem:[#allocation8 + $0x70c] ss:$12 sps:$4 sm:$0xff]   ;;  %v9145_v17 = vld [vmem:[#allocation8 + $0x724] ss:$12 sps:$4 sm:$0xff]  }
 0x2fb   :  { %v7460_v14 = vpop.f32.mrb[103].mxu1  ;;  %5999 = vmatprep.subr.bf16.mxu0 %v9129_v1  ;;  %v10677_v18 = vld [vmem:[#allocation18_spill] sm:$0xff] }
 0x2fc   :  { %v10264_v21 = vadd.f32 %v7460_v14, %v7459_v9  ;;  %7703 = vmatpush3.bf16.msra.mxu1 %v9147_v53  ;;  %v9140_v53 = vld [vmem:[#allocation8 + $0x708] ss:$12 sps:$4 sm:$0xff]  }
 0x2fd   :  { %5943 = vmatmul.mubr.bf16.gmra.mrb[112].mxu0 %v10675_v50  ;;  %6565 = vmatmul.mubr.bf16.gmra.mrb[208].mxu1 %v10675_v50 }
 0x2fe   :  { %5952 = vmatprep.mubr.bf16.mxu0 %v10676_v19  ;;  %6000 = vmatpush1.bf16.msra.mxu0 %v9127_v5 }
 0x2ff   :  { %6572 = vmatprep.mubr.bf16.mxu1 %v10676_v19  ;;  %6001 = vmatprep.subr.bf16.mxu0 %v9134_v43 }
 0x300   :  { %v7462_v60 = vpop.f32.mrb[104].mxu1  ;;  %7704 = vmatprep.subr.bf16.mxu1 %v9154_v26  ;;  %v9143_v26 = vld [vmem:[#allocation8 + $0x720] ss:$12 sps:$4 sm:$0xff]  }
 0x301   :  { %v7463_v32 = vpop.f32.mrb[105].mxu1  ;;  %7705 = vmatpush3.bf16.msra.mxu1 %v9155_v42  ;;  %v9150_v42 = vld [vmem:[#allocation8 + $0x73c] ss:$12 sps:$4 sm:$0xff]  }
 0x302   :  { %v10270_v55 = vadd.f32 %v7463_v32, %v7462_v60  ;;  %6002 = vmatpush1.bf16.msra.mxu0 %v9132_v47  ;;  %v7465_v10 = vpop.f32.mrb[106].mxu1  ;;  %7754 = vmatprep.subr.bf16.mxu1 %v9162_v13  ;;  %v10678_v47 = vld [vmem:[#allocation20_spill] sm:$0xff]  ;;  %v9153_v13 = vld [vmem:[#allocation8 + $0x754] ss:$12 sps:$4 sm:$0xff]  }
 0x303   :  { %v7466_v31 = vpop.f32.mrb[107].mxu1  ;;  %6003 = vmatprep.subr.bf16.mxu0 %v9137_v56 }
 0x304   :  { %v10272_v1 = vadd.f32 %v7466_v31, %v7465_v10 }
 0x305   :  { %5953 = vmatmul.mubr.bf16.gmra.mrb[116].mxu0 %v10677_v18  ;;  %6573 = vmatmul.mubr.bf16.gmra.mrb[212].mxu1 %v10677_v18 }
 0x306   :  { %5962 = vmatprep.mubr.bf16.mxu0 %v10027_v61  ;;  %6004 = vmatpush1.bf16.msra.mxu0 %v9135_v3  ;;  %v9151_v3 = vld [vmem:[#allocation8 + $0x750] ss:$12 sps:$4 sm:$0xff]  }
 0x307   :  { %6580 = vmatprep.mubr.bf16.mxu1 %v10027_v61  ;;  %6005 = vmatprep.subr.bf16.mxu0 %v9142_v54  ;;  %v9148_v61 = vld [vmem:[#allocation8 + $0x738] ss:$12 sps:$4 sm:$0xff]  }
 0x308   :  { %v7468_v9 = vpop.f32.mrb[108].mxu1  ;;  %v9158_v54 = vld [vmem:[#allocation8 + $0x76c] ss:$12 sps:$4 sm:$0xff]  }
 0x309   :  { %v7469_v5 = vpop.f32.mrb[109].mxu1 }
 0x30a   :  { %v10278_v14 = vadd.f32 %v7469_v5, %v7468_v9  ;;  %6006 = vmatpush1.bf16.msra.mxu0 %v9140_v53  ;;  %v7471_v43 = vpop.f32.mrb[110].mxu1  ;;  %v9161_v53 = vld [vmem:[#allocation8 + $0x784] ss:$12 sps:$4 sm:$0xff]  }
 0x30b   :  { %v7472_v50 = vpop.f32.mrb[111].mxu1  ;;  %6007 = vmatprep.subr.bf16.mxu0 %v9145_v17 }
 0x30c   :  { %v10280_v19 = vadd.f32 %v7472_v50, %v7471_v43 }
 0x30d   :  { %5963 = vmatmul.mubr.bf16.gmra.mrb[120].mxu0 %v10678_v47  ;;  %6581 = vmatmul.mubr.bf16.gmra.mrb[216].mxu1 %v10678_v47 }
 0x30e   :  { %5972 = vmatprep.mubr.bf16.mxu0 %v10047_v48  ;;  %6008 = vmatpush1.bf16.msra.mxu0 %v9143_v26  ;;  %v9159_v26 = vld [vmem:[#allocation8 + $0x780] ss:$12 sps:$4 sm:$0xff]  }
 0x30f   :  { %6588 = vmatprep.mubr.bf16.mxu1 %v10047_v48  ;;  %6009 = vmatprep.subr.bf16.mxu0 %v9150_v42  ;;  %v9156_v48 = vld [vmem:[#allocation8 + $0x768] ss:$12 sps:$4 sm:$0xff]  }
 0x310   :  { %v7474_v56 = vpop.f32.mrb[112].mxu1  ;;  %v9163_v42 = vld [vmem:[#allocation8 + $0x788] ss:$12 sps:$4 sm:$0xff]  }
 0x311   :  { %v7475_v60 = vpop.f32.mrb[113].mxu1 }
 0x312   :  { %v10286_v32 = vadd.f32 %v7475_v60, %v7474_v56  ;;  %6010 = vmatpush1.bf16.msra.mxu0 %v9148_v61  ;;  %v7477_v10 = vpop.f32.mrb[114].mxu1  ;;  %v9170_v61 = vld [vmem:[#allocation8 + $0x860] ss:$12 sps:$4 sm:$0xff]  }
 0x313   :  { %v7478_v31 = vpop.f32.mrb[115].mxu1  ;;  %6011 = vmatprep.subr.bf16.mxu0 %v9153_v13  ;;  %v9169_v13 = vld [vmem:[#allocation8 + $0x7b4] ss:$12 sps:$4 sm:$0xff]  }
 0x314   :  { %v10288_v18 = vadd.f32 %v7478_v31, %v7477_v10  ;;  %v9171_v56 = vld [vmem:[#allocation8 + $0x7a0] ss:$12 sps:$4 sm:$0xff]   ;;  %v9178_v10 = vld [vmem:[#allocation8 + $0x878] ss:$12 sps:$4 sm:$0xff]  }
 0x315   :  { %5973 = vmatmul.mubr.bf16.gmra.mrb[124].mxu0 %v10042_v35  ;;  %6589 = vmatmul.mubr.bf16.gmra.mrb[220].mxu1 %v10042_v35  ;;  %v9166_v35 = vld [vmem:[#allocation8 + $0x79c] ss:$12 sps:$4 sm:$0xff]  }
 0x316   :  { %6012 = vmatpush1.bf16.msra.mxu0 %v9151_v3  ;;  %6015 = vmatprep.mubr.bf16.mxu0 %v10110_v36 }
 0x317   :  { %6629 = vmatprep.mubr.bf16.mxu1 %v10110_v36  ;;  %6013 = vmatprep.subr.bf16.mxu0 %v9158_v54  ;;  %v9164_v36 = vld [vmem:[#allocation8 + $0x798] ss:$12 sps:$4 sm:$0xff]  }
 0x318   :  { %v7480_v17 = vpop.f32.mrb[116].mxu1 }
 0x319   :  { %v7481_v9 = vpop.f32.mrb[117].mxu1 }
 0x31a   :  { %v10294_v5 = vadd.f32 %v7481_v9, %v7480_v17  ;;  %6014 = vmatpush1.bf16.msra.mxu0 %v9156_v48  ;;  %v7483_v43 = vpop.f32.mrb[118].mxu1  ;;  %v9167_v48 = vld [vmem:[#allocation8 + $0x7b0] ss:$12 sps:$4 sm:$0xff]  }
 0x31b   :  { %v7484_v50 = vpop.f32.mrb[119].mxu1  ;;  %6096 = vmatprep.subr.bf16.mxu0 %v9161_v53  ;;  %v9174_v53 = vld [vmem:[#allocation8 + $0x7cc] ss:$12 sps:$4 sm:$0xff]   ;;  %v9186_v9 = vld [vmem:[#allocation8 + $0x890] ss:$12 sps:$4 sm:$0xff]  }
 0x31c   :  { %v10296_v47 = vadd.f32 %v7484_v50, %v7483_v43  ;;  %v9172_v43 = vld [vmem:[#allocation8 + $0x7c8] ss:$12 sps:$4 sm:$0xff]  }
 0x31d   :  { %6016 = vmatmul.mubr.bf16.vlgmr.msra.gmra.mrb[96].mxu0 %v10105_v63  ;;  %6630 = vmatmul.mubr.bf16.vlgmr.msra.gmra.mrb[224].mxu1 %v10105_v63 }
 0x31e   :  { %6025 = vmatprep.mubr.bf16.mxu0 %v10130_v25  ;;  %6097 = vmatpush1.bf16.msra.mxu0 %v9159_v26  ;;  %v9177_v26 = vld [vmem:[#allocation8 + $0x7e4] ss:$12 sps:$4 sm:$0xff]  }
 0x31f   :  { %6637 = vmatprep.mubr.bf16.mxu1 %v10130_v25  ;;  %7755 = vmatpush3.bf16.msra.mxu1 %v9163_v42  ;;  %v9179_v25 = vld [vmem:[#allocation8 + $0x7b8] ss:$12 sps:$4 sm:$0xff]   ;;  %v9187_v42 = vld [vmem:[#allocation8 + $0x7d0] ss:$12 sps:$4 sm:$0xff]  }
 0x320   :  { %v7486_v60 = vpop.f32.mrb[120].mxu1  ;;  %6098 = vmatprep.subr.bf16.mxu0 %v9166_v35  ;;  %7756 = vmatprep.subr.bf16.mxu1 %v9170_v61 }
 0x321   :  { %v7487_v3 = vpop.f32.mrb[121].mxu1 }
 0x322   :  { %v10302_v31 = vadd.f32 %v7487_v3, %v7486_v60  ;;  %6099 = vmatpush1.bf16.msra.mxu0 %v9164_v36  ;;  %v7489_v54 = vpop.f32.mrb[122].mxu1  ;;  %v9182_v60 = vld [vmem:[#allocation8 + $0x7fc] ss:$12 sps:$4 sm:$0xff]  }
 0x323   :  { %v7490_v63 = vpop.f32.mrb[123].mxu1  ;;  %6100 = vmatprep.subr.bf16.mxu0 %v9169_v13  ;;  %7757 = vmatpush3.bf16.msra.mxu1 %v9171_v56  ;;  %v9175_v13 = vld [vmem:[#allocation8 + $0x7e0] ss:$12 sps:$4 sm:$0xff]   ;;  %v9195_v3 = vld [vmem:[#allocation8 + $0x7e8] ss:$12 sps:$4 sm:$0xff]  }
 0x324   :  { %v10304_v17 = vadd.f32 %v7490_v63, %v7489_v54  ;;  %7758 = vmatprep.subr.bf16.mxu1 %v9178_v10  ;;  %v9202_v63 = vld [vmem:[#allocation8 + $0x8c0] ss:$12 sps:$4 sm:$0xff]  }
 0x325   :  { %6026 = vmatmul.mubr.bf16.gmra.mrb[100].mxu0 %v10125_v57  ;;  %6638 = vmatmul.mubr.bf16.gmra.mrb[228].mxu1 %v10125_v57  ;;  %v10312_v57 = vld [vmem:[#allocation10] sm:$0x7] }
 0x326   :  { %6035 = vmatprep.mubr.bf16.mxu0 %v10150_v58  ;;  %6101 = vmatpush1.bf16.msra.mxu0 %v9167_v48  ;;  %v10320_v54 = vrot.slane %v10312_v57, %v9662_v11  ;;  %v9180_v48 = vld [vmem:[#allocation8 + $0x7f8] ss:$12 sps:$4 sm:$0xff]  }
 0x327   :  { %6645 = vmatprep.mubr.bf16.mxu1 %v10150_v58  ;;  %6102 = vmatprep.subr.bf16.mxu0 %v9174_v53  ;;  %v9194_v58 = vld [vmem:[#allocation8 + $0x8a8] ss:$12 sps:$4 sm:$0xff]  }
 0x328   :  { %v7492_v50 = vpop.f32.mrb[124].mxu1  ;;  %7759 = vmatpush3.bf16.msra.mxu1 %v9179_v25  ;;  %v9185_v53 = vld [vmem:[#allocation8 + $0x814] ss:$12 sps:$4 sm:$0xff]  }
 0x329   :  { %v7493_v35 = vpop.f32.mrb[125].mxu1  ;;  %7760 = vmatprep.subr.bf16.mxu1 %v9186_v9 }
 0x32a   :  { %v10310_v61 = vadd.f32 %v7493_v35, %v7492_v50  ;;  %6103 = vmatpush1.bf16.msra.mxu0 %v9172_v43  ;;  %v7495_v36 = vpop.f32.mrb[126].mxu1 }
 0x32b   :  { %v7496_v56 = vpop.f32.mrb[127].mxu1  ;;  %6104 = vmatprep.subr.bf16.mxu0 %v9177_v26  ;;  %v9183_v26 = vld [vmem:[#allocation8 + $0x810] ss:$12 sps:$4 sm:$0xff]  }
 0x32c   :  { %v10314_v10 = vadd.f32 %v7496_v56, %v7495_v36  ;;  %7761 = vmatpush3.bf16.msra.mxu1 %v9187_v42  ;;  %v9190_v42 = vld [vmem:[#allocation8 + $0x82c] ss:$12 sps:$4 sm:$0xff]  }
 0x32d   :  { %6036 = vmatmul.mubr.bf16.gmra.mrb[104].mxu0 %v10145_v16  ;;  %6646 = vmatmul.mubr.bf16.gmra.mrb[232].mxu1 %v10145_v16  ;;  %v6244_v16 = vadd.f32 %v10254_v52, %v10320_v54  ;;  %v9210_v52 = vld [vmem:[#allocation8 + $0x8d8] ss:$12 sps:$4 sm:$0xff]  }
 0x32e   :  { %6045 = vmatprep.mubr.bf16.mxu0 %v10170_v15  ;;  %6105 = vmatpush1.bf16.msra.mxu0 %v9175_v13  ;;  %v9203_v13 = vld [vmem:[#allocation8 + $0x800] ss:$12 sps:$4 sm:$0xff]  }
 0x32f   :  { %6653 = vmatprep.mubr.bf16.mxu1 %v10170_v15  ;;  %6106 = vmatprep.subr.bf16.mxu0 %v9182_v60  ;;  %v6247_v15 = vadd.f32 %v10256_v39, %v10320_v54  ;;  %v9188_v60 = vld [vmem:[#allocation8 + $0x828] ss:$12 sps:$4 sm:$0xff]  }
 0x330   :  { %v7514_v25 = vpop.f32.mrb[128].mxu1  ;;  %7762 = vmatprep.subr.bf16.mxu1 %v9194_v58  ;;  %v9193_v58 = vld [vmem:[#allocation8 + $0x844] ss:$12 sps:$4 sm:$0xff]  }
 0x331   :  { %v7515_v9 = vpop.f32.mrb[129].mxu1  ;;  %7763 = vmatpush3.bf16.msra.mxu1 %v9195_v3  ;;  %v9211_v3 = vld [vmem:[#allocation8 + $0x818] ss:$12 sps:$4 sm:$0xff]  }
 0x332   :  { %v7516_v43 = vadd.f32 %v7515_v9, %v7514_v25  ;;  %6107 = vmatpush1.bf16.msra.mxu0 %v9180_v48  ;;  %v7517_v11 = vpop.f32.mrb[130].mxu1  ;;  %7764 = vmatprep.subr.bf16.mxu1 %v9202_v63  ;;  %v6252_v63 = vadd.f32 %v10262_v59, %v10320_v54  ;;  %v9191_v25 = vld [vmem:[#allocation8 + $0x840] ss:$12 sps:$4 sm:$0xff]   ;;  %v9219_v59 = vld [vmem:[#allocation8 + $0x830] ss:$12 sps:$4 sm:$0xff]  }
 0x333   :  { %v7518_v50 = vpop.f32.mrb[131].mxu1  ;;  %6108 = vmatprep.subr.bf16.mxu0 %v9185_v53 }
 0x334   :  { %v10328_v35 = vadd.f32 %v7516_v43, %v6244_v16  ;;  %v7519_v36 = vadd.f32 %v7518_v50, %v7517_v11  ;;  %v9198_v16 = vld [vmem:[#allocation8 + $0x85c] ss:$12 sps:$4 sm:$0xff]  }
 0x335   :  { %6046 = vmatmul.mubr.bf16.gmra.mrb[108].mxu0 %v10165_v49  ;;  %6654 = vmatmul.mubr.bf16.gmra.mrb[236].mxu1 %v10165_v49 }
 0x336   :  { %v10332_v56 = vadd.f32 %v7519_v36, %v6247_v15  ;;  %6055 = vmatprep.mubr.bf16.mxu0 %v10190_v0  ;;  %6109 = vmatpush1.bf16.msra.mxu0 %v9183_v26  ;;  %v9218_v26 = vld [vmem:[#allocation8 + $0x8f0] ss:$12 sps:$4 sm:$0xff]  }
 0x337   :  { %6661 = vmatprep.mubr.bf16.mxu1 %v10190_v0  ;;  %6110 = vmatprep.subr.bf16.mxu0 %v9190_v42  ;;  %v6255_v0 = vadd.f32 %v10264_v21, %v10320_v54  ;;  %v9196_v42 = vld [vmem:[#allocation8 + $0x858] ss:$12 sps:$4 sm:$0xff]   ;;  %v9201_v21 = vld [vmem:[#allocation8 + $0x874] ss:$12 sps:$4 sm:$0xff]  }
 0x338   :  { %v7520_v39 = vpop.f32.mrb[132].mxu1  ;;  %7765 = vmatpush3.bf16.msra.mxu1 %v9203_v13  ;;  %v6260_v13 = vadd.f32 %v10270_v55, %v10320_v54  ;;  %v9204_v55 = vld [vmem:[#allocation8 + $0x888] ss:$12 sps:$4 sm:$0xff]  }
 0x339   :  { %v7521_v48 = vpop.f32.mrb[133].mxu1  ;;  %7766 = vmatprep.subr.bf16.mxu1 %v9210_v52 }
 0x33a   :  { %v7522_v49 = vadd.f32 %v7521_v48, %v7520_v39  ;;  %6111 = vmatpush1.bf16.msra.mxu0 %v9188_v60  ;;  %v7523_v53 = vpop.f32.mrb[134].mxu1  ;;  %v9199_v60 = vld [vmem:[#allocation8 + $0x870] ss:$12 sps:$4 sm:$0xff]   ;;  %v9206_v39 = vld [vmem:[#allocation8 + $0x88c] ss:$12 sps:$4 sm:$0xff]  }
 0x33b   :  { %v7524_v9 = vpop.f32.mrb[135].mxu1  ;;  %6112 = vmatprep.subr.bf16.mxu0 %v9193_v58 }
 0x33c   :  { %v10340_v43 = vadd.f32 %v7522_v49, %v6252_v63  ;;  %v7525_v11 = vadd.f32 %v7524_v9, %v7523_v53  ;;  %7767 = vmatpush3.bf16.msra.mxu1 %v9211_v3  ;;  %v6263_v3 = vadd.f32 %v10272_v1, %v10320_v54  ;;  %v9209_v49 = vld [vmem:[#allocation8 + $0x8a4] ss:$12 sps:$4 sm:$0xff]   ;;  %v6268_v1 = vadd.f32 %v10278_v14, %v10320_v54 }
 0x33d   :  { %6056 = vmatmul.mubr.bf16.gmra.mrb[112].mxu0 %v10185_v29  ;;  %6662 = vmatmul.mubr.bf16.gmra.mrb[240].mxu1 %v10185_v29  ;;  %v9212_v14 = vld [vmem:[#allocation8 + $0x8b8] ss:$12 sps:$4 sm:$0xff]  }
 0x33e   :  { %v10344_v50 = vadd.f32 %v7525_v11, %v6255_v0  ;;  %6065 = vmatprep.mubr.bf16.mxu0 %v10210_v62  ;;  %6113 = vmatpush1.bf16.msra.mxu0 %v9191_v25  ;;  %v9207_v0 = vld [vmem:[#allocation8 + $0x8a0] ss:$12 sps:$4 sm:$0xff]   ;;  %v9214_v11 = vld [vmem:[#allocation8 + $0x8bc] ss:$12 sps:$4 sm:$0xff]  }
 0x33f   :  { %6669 = vmatprep.mubr.bf16.mxu1 %v10210_v62  ;;  %6114 = vmatprep.subr.bf16.mxu0 %v9198_v16 }
 0x340   :  { %v7526_v15 = vpop.f32.mrb[136].mxu1  ;;  %7768 = vmatprep.subr.bf16.mxu1 %v9218_v26  ;;  %v6271_v26 = vadd.f32 %v10280_v19, %v10320_v54  ;;  %v6276_v19 = vadd.f32 %v10286_v32, %v10320_v54  ;;  %v9220_v32 = vld [vmem:[#allocation8 + $0x8e8] ss:$12 sps:$4 sm:$0xff]  }
 0x341   :  { %v7527_v36 = vpop.f32.mrb[137].mxu1  ;;  %7769 = vmatpush3.bf16.msra.mxu1 %v9219_v59 }
 0x342   :  { %v7528_v52 = vadd.f32 %v7527_v36, %v7526_v15  ;;  %6115 = vmatpush1.bf16.msra.mxu0 %v9196_v42  ;;  %v7529_v29 = vpop.f32.mrb[138].mxu1 }
 0x343   :  { %v7530_v58 = vpop.f32.mrb[139].mxu1  ;;  %6116 = vmatprep.subr.bf16.mxu0 %v9201_v21  ;;  %v9217_v21 = vld [vmem:[#allocation8 + $0x8d4] ss:$12 sps:$4 sm:$0xff]  }
 0x344   :  { %v10352_v62 = vadd.f32 %v7528_v52, %v6260_v13  ;;  %v7531_v48 = vadd.f32 %v7530_v58, %v7529_v29  ;;  %v9215_v29 = vld [vmem:[#allocation8 + $0x8d0] ss:$12 sps:$4 sm:$0xff]   ;;  %v6279_v58 = vadd.f32 %v10288_v18, %v10320_v54  ;;  %v6284_v18 = vadd.f32 %v10294_v5, %v10320_v54 }
 0x345   :  { %6066 = vmatmul.mubr.bf16.gmra.mrb[116].mxu0 %v10205_v34  ;;  %6670 = vmatmul.mubr.bf16.gmra.mrb[244].mxu1 %v10205_v34 }
 0x346   :  { %v10356_v63 = vadd.f32 %v7531_v48, %v6263_v3  ;;  %6075 = vmatprep.mubr.bf16.mxu0 %v10230_v37  ;;  %6117 = vmatpush1.bf16.msra.mxu0 %v9199_v60  ;;  %v9222_v60 = vld [vmem:[#allocation8 + $0x8ec] ss:$12 sps:$4 sm:$0xff]  }
 0x347   :  { %6677 = vmatprep.mubr.bf16.mxu1 %v10230_v37  ;;  %6118 = vmatprep.subr.bf16.mxu0 %v9206_v39 }
 0x348   :  { %v7532_v53 = vpop.f32.mrb[140].mxu1 }
 0x349   :  { %v7533_v25 = vpop.f32.mrb[141].mxu1 }
 0x34a   :  { %v7534_v9 = vadd.f32 %v7533_v25, %v7532_v53  ;;  %6119 = vmatpush1.bf16.msra.mxu0 %v9204_v55  ;;  %v7535_v16 = vpop.f32.mrb[142].mxu1 }
 0x34b   :  { %v7536_v34 = vpop.f32.mrb[143].mxu1  ;;  %6120 = vmatprep.subr.bf16.mxu0 %v9209_v49 }
 0x34c   :  { %v10364_v59 = vadd.f32 %v7534_v9, %v6268_v1  ;;  %v7537_v37 = vadd.f32 %v7536_v34, %v7535_v16 }
 0x34d   :  { %6076 = vmatmul.mubr.bf16.gmra.mrb[120].mxu0 %v10225_v2  ;;  %6678 = vmatmul.mubr.bf16.gmra.mrb[248].mxu1 %v10225_v2 }
 0x34e   :  { %v10368_v42 = vadd.f32 %v7537_v37, %v6271_v26  ;;  %6085 = vmatprep.mubr.bf16.mxu0 %v10250_v4  ;;  %6121 = vmatpush1.bf16.msra.mxu0 %v9207_v0  ;;  %v6292_v0 = vadd.f32 %v10302_v31, %v10320_v54  ;;  %v6295_v26 = vadd.f32 %v10304_v17, %v10320_v54 }
 0x34f   :  { %6685 = vmatprep.mubr.bf16.mxu1 %v10250_v4  ;;  %6122 = vmatprep.subr.bf16.mxu0 %v9214_v11 }
 0x350   :  { %v7538_v15 = vpop.f32.mrb[144].mxu1 }
 0x351   :  { %v7539_v36 = vpop.f32.mrb[145].mxu1 }
 0x352   :  { %v7540_v13 = vadd.f32 %v7539_v36, %v7538_v15  ;;  %6123 = vmatpush1.bf16.msra.mxu0 %v9212_v14  ;;  %v7541_v52 = vpop.f32.mrb[146].mxu1 }
 0x353   :  { %v7542_v2 = vpop.f32.mrb[147].mxu1  ;;  %6124 = vmatprep.subr.bf16.mxu0 %v9217_v21  ;;  %v6300_v21 = vadd.f32 %v10310_v61, %v10320_v54 }
 0x354   :  { %v10376_v39 = vadd.f32 %v7540_v13, %v6276_v19  ;;  %v7543_v4 = vadd.f32 %v7542_v2, %v7541_v52  ;;  %v6303_v19 = vadd.f32 %v10314_v10, %v10320_v54 }
 0x355   :  { %6086 = vmatmul.mubr.bf16.gmra.mrb[124].mxu0 %v10245_v44  ;;  %6686 = vmatmul.mubr.bf16.gmra.mrb[252].mxu1 %v10245_v44  ;;  %v6287_v44 = vadd.f32 %v10296_v47, %v10320_v54 }
 0x356   :  { %v10380_v3 = vadd.f32 %v7543_v4, %v6279_v58  ;;  %6125 = vmatpush1.bf16.msra.mxu0 %v9215_v29  ;;  %6128 = vmatprep.mubr.bf16.mxu0 %v10112_v6 }
 0x357   :  { %6726 = vmatprep.mubr.bf16.mxu1 %v10112_v6  ;;  %6126 = vmatprep.subr.bf16.mxu0 %v9222_v60 }
 0x358   :  { %v7544_v48 = vpop.f32.mrb[148].mxu1 }
 0x359   :  { %v7545_v55 = vpop.f32.mrb[149].mxu1 }
 0x35a   :  { %v7546_v49 = vadd.f32 %v7545_v55, %v7544_v48  ;;  %6127 = vmatpush1.bf16.msra.mxu0 %v9220_v32  ;;  %v7547_v53 = vpop.f32.mrb[150].mxu1 }
 0x35b   :  { %v7548_v25 = vpop.f32.mrb[151].mxu1 }
 0x35c   :  { %v10388_v1 = vadd.f32 %v7546_v49, %v6284_v18  ;;  %v7549_v9 = vadd.f32 %v7548_v25, %v7547_v53 }
 0x35d   :  { %6129 = vmatmul.mubr.bf16.vlgmr.msra.gmra.mrb[96].mxu0 %v10107_v20  ;;  %6727 = vmatmul.mubr.bf16.vlgmr.msra.gmra.mrb[0].mxu1 %v10107_v20 }
 0x35e   :  { %v10392_v6 = vadd.f32 %v7549_v9, %v6287_v44  ;;  %6138 = vmatprep.mubr.bf16.mxu0 %v10132_v40  ;;  %6734 = vmatprep.mubr.bf16.mxu1 %v10132_v40 }
 0x360   :  { %v7550_v5 = vpop.f32.mrb[152].mxu1 }
 0x361   :  { %v7551_v16 = vpop.f32.mrb[153].mxu1 }
 0x362   :  { %v7552_v34 = vadd.f32 %v7551_v16, %v7550_v5  ;;  %v7553_v47 = vpop.f32.mrb[154].mxu1 }
 0x363   :  { %v7554_v11 = vpop.f32.mrb[155].mxu1 }
 0x364   :  { %v10400_v37 = vadd.f32 %v7552_v34, %v6292_v0  ;;  %v7555_v20 = vadd.f32 %v7554_v11, %v7553_v47 }
 0x365   :  { %6139 = vmatmul.mubr.bf16.gmra.mrb[100].mxu0 %v10127_v45  ;;  %6735 = vmatmul.mubr.bf16.gmra.mrb[4].mxu1 %v10127_v45 }
 0x366   :  { %v10404_v14 = vadd.f32 %v7555_v20, %v6295_v26  ;;  %6148 = vmatprep.mubr.bf16.mxu0 %v10152_v30  ;;  %6742 = vmatprep.mubr.bf16.mxu1 %v10152_v30 }
 0x368   :  { %v7556_v40 = vpop.f32.mrb[156].mxu1 }
 0x369   :  { %v7557_v31 = vpop.f32.mrb[157].mxu1 }
 0x36a   :  { %v7558_v15 = vadd.f32 %v7557_v31, %v7556_v40  ;;  %v7559_v17 = vpop.f32.mrb[158].mxu1 }
 0x36b   :  { %v7560_v36 = vpop.f32.mrb[159].mxu1 }
 0x36c   :  { %v10412_v13 = vadd.f32 %v7558_v15, %v6300_v21  ;;  %v7561_v45 = vadd.f32 %v7560_v36, %v7559_v17 }
 0x36d   :  { %6149 = vmatmul.mubr.bf16.gmra.mrb[104].mxu0 %v10147_v51  ;;  %6743 = vmatmul.mubr.bf16.gmra.mrb[8].mxu1 %v10147_v51 }
 0x36e   :  { %v10416_v52 = vadd.f32 %v7561_v45, %v6303_v19  ;;  %6158 = vmatprep.mubr.bf16.mxu0 %v10172_v46  ;;  %6750 = vmatprep.mubr.bf16.mxu1 %v10172_v46 }
 0x370   :  { %v7578_v30 = vpop.f32.mrb[160].mxu1 }
 0x371   :  { %v7579_v61 = vpop.f32.mrb[161].mxu1 }
 0x372   :  { %v7580_v29 = vadd.f32 %v7579_v61, %v7578_v30  ;;  %v7581_v2 = vpop.f32.mrb[162].mxu1 }
 0x373   :  { %v7582_v60 = vpop.f32.mrb[163].mxu1 }
 0x374   :  { %v10421_v10 = vadd.f32 %v7580_v29, %v10328_v35  ;;  %v7583_v54 = vadd.f32 %v7582_v60, %v7581_v2 }
 0x375   :  { %6159 = vmatmul.mubr.bf16.gmra.mrb[108].mxu0 %v10167_v12  ;;  %6751 = vmatmul.mubr.bf16.gmra.mrb[12].mxu1 %v10167_v12 }
 0x376   :  { %v10426_v51 = vadd.f32 %v7583_v54, %v10332_v56  ;;  %6168 = vmatprep.mubr.bf16.mxu0 %v10192_v38  ;;  %6758 = vmatprep.mubr.bf16.mxu1 %v10192_v38 }
 0x378   :  { %v7584_v46 = vpop.f32.mrb[164].mxu1 }
 0x379   :  { %v7585_v58 = vpop.f32.mrb[165].mxu1 }
 0x37a   :  { %v7586_v4 = vadd.f32 %v7585_v58, %v7584_v46  ;;  %v7587_v32 = vpop.f32.mrb[166].mxu1 }
 0x37b   :  { %v7588_v48 = vpop.f32.mrb[167].mxu1 }
 0x37c   :  { %v10431_v35 = vadd.f32 %v7586_v4, %v10340_v43  ;;  %v7589_v55 = vadd.f32 %v7588_v48, %v7587_v32 }
 0x37d   :  { %6169 = vmatmul.mubr.bf16.gmra.mrb[112].mxu0 %v10187_v24  ;;  %6759 = vmatmul.mubr.bf16.gmra.mrb[16].mxu1 %v10187_v24 }
 0x37e   :  { %v10436_v12 = vadd.f32 %v7589_v55, %v10344_v50  ;;  %6178 = vmatprep.mubr.bf16.mxu0 %v10212_v28  ;;  %6766 = vmatprep.mubr.bf16.mxu1 %v10212_v28 }
 0x380   :  { %v7590_v38 = vpop.f32.mrb[168].mxu1 }
 0x381   :  { %v7591_v56 = vpop.f32.mrb[169].mxu1 }
 0x382   :  { %v7592_v18 = vadd.f32 %v7591_v56, %v7590_v38  ;;  %v7593_v49 = vpop.f32.mrb[170].mxu1 }
 0x383   :  { %v7594_v53 = vpop.f32.mrb[171].mxu1 }
 0x384   :  { %v10441_v43 = vadd.f32 %v7592_v18, %v10352_v62  ;;  %v7595_v25 = vadd.f32 %v7594_v53, %v7593_v49 }
 0x385   :  { %6179 = vmatmul.mubr.bf16.gmra.mrb[116].mxu0 %v10207_v33  ;;  %6767 = vmatmul.mubr.bf16.gmra.mrb[20].mxu1 %v10207_v33 }
 0x386   :  { %v10446_v24 = vadd.f32 %v7595_v25, %v10356_v63  ;;  %6188 = vmatprep.mubr.bf16.mxu0 %v10232_v27  ;;  %6774 = vmatprep.mubr.bf16.mxu1 %v10232_v27 }
 0x388   :  { %v7596_v28 = vpop.f32.mrb[172].mxu1 }
 0x389   :  { %v7597_v50 = vpop.f32.mrb[173].mxu1 }
 0x38a   :  { %v7598_v44 = vadd.f32 %v7597_v50, %v7596_v28  ;;  %v7599_v9 = vpop.f32.mrb[174].mxu1 }
 0x38b   :  { %v7600_v5 = vpop.f32.mrb[175].mxu1 }
 0x38c   :  { %v10451_v62 = vadd.f32 %v7598_v44, %v10364_v59  ;;  %v7601_v16 = vadd.f32 %v7600_v5, %v7599_v9 }
 0x38d   :  { %6189 = vmatmul.mubr.bf16.gmra.mrb[120].mxu0 %v10227_v41  ;;  %6775 = vmatmul.mubr.bf16.gmra.mrb[24].mxu1 %v10227_v41 }
 0x38e   :  { %v10456_v33 = vadd.f32 %v7601_v16, %v10368_v42  ;;  %6198 = vmatprep.mubr.bf16.mxu0 %v10252_v22  ;;  %6782 = vmatprep.mubr.bf16.mxu1 %v10252_v22 }
 0x390   :  { %v7602_v27 = vpop.f32.mrb[176].mxu1 }
 0x391   :  { %v7603_v63 = vpop.f32.mrb[177].mxu1 }
 0x392   :  { %v7604_v0 = vadd.f32 %v7603_v63, %v7602_v27  ;;  %v7605_v34 = vpop.f32.mrb[178].mxu1 }
 0x393   :  { %v7606_v47 = vpop.f32.mrb[179].mxu1 }
 0x394   :  { %v10461_v59 = vadd.f32 %v7604_v0, %v10376_v39  ;;  %v7607_v11 = vadd.f32 %v7606_v47, %v7605_v34 }
 0x395   :  { %6199 = vmatmul.mubr.bf16.gmra.mrb[124].mxu0 %v10247_v8  ;;  %6783 = vmatmul.mubr.bf16.gmra.mrb[28].mxu1 %v10247_v8 }
 0x396   :  { %v10466_v41 = vadd.f32 %v7607_v11, %v10380_v3 }
 0x398   :  { %v7608_v42 = vpop.f32.mrb[180].mxu1 }
 0x399   :  { %v7609_v26 = vpop.f32.mrb[181].mxu1 }
 0x39a   :  { %v7610_v20 = vadd.f32 %v7609_v26, %v7608_v42  ;;  %v7611_v22 = vpop.f32.mrb[182].mxu1 }
 0x39b   :  { %v7612_v40 = vpop.f32.mrb[183].mxu1 }
 0x39c   :  { %v10469_v31 = vadd.f32 %v7610_v20, %v10388_v1  ;;  %v7613_v21 = vadd.f32 %v7612_v40, %v7611_v22 }
 0x39e   :  { %v10472_v39 = vadd.f32 %v7613_v21, %v10392_v6 }
 0x3a0   :  { %v7614_v15 = vpop.f32.mrb[184].mxu1 }
 0x3a1   :  { %v7615_v17 = vpop.f32.mrb[185].mxu1 }
 0x3a2   :  { %v7616_v36 = vadd.f32 %v7615_v17, %v7614_v15  ;;  %v7617_v19 = vpop.f32.mrb[186].mxu1 }
 0x3a3   :  { %v7618_v8 = vpop.f32.mrb[187].mxu1 }
 0x3a4   :  { %v10475_v3 = vadd.f32 %v7616_v36, %v10400_v37  ;;  %v7619_v45 = vadd.f32 %v7618_v8, %v7617_v19 }
 0x3a6   :  { %v10478_v30 = vadd.f32 %v7619_v45, %v10404_v14 }
 0x3a8   :  { %v7620_v61 = vpop.f32.mrb[188].mxu1 }
 0x3a9   :  { %v7621_v29 = vpop.f32.mrb[189].mxu1 }
 0x3aa   :  { %v7622_v1 = vadd.f32 %v7621_v29, %v7620_v61  ;;  %v7623_v2 = vpop.f32.mrb[190].mxu1 }
 0x3ab   :  { %v7624_v60 = vpop.f32.mrb[191].mxu1 }
 0x3ac   :  { %v10481_v6 = vadd.f32 %v7622_v1, %v10412_v13  ;;  %v7625_v54 = vadd.f32 %v7624_v60, %v7623_v2 }
 0x3ae   :  { %v10484_v46 = vadd.f32 %v7625_v54, %v10416_v52 }
 0x3b0   :  { %v7642_v58 = vpop.f32.mrb[192].mxu1 }
 0x3b1   :  { %v7643_v4 = vpop.f32.mrb[193].mxu1 }
 0x3b2   :  { %v7644_v37 = vadd.f32 %v7643_v4, %v7642_v58  ;;  %v7645_v32 = vpop.f32.mrb[194].mxu1 }
 0x3b3   :  { %v7646_v48 = vpop.f32.mrb[195].mxu1 }
 0x3b4   :  { %v10487_v14 = vadd.f32 %v7644_v37, %v10421_v10  ;;  %v7647_v55 = vadd.f32 %v7646_v48, %v7645_v32 }
 0x3b6   :  { %v10490_v38 = vadd.f32 %v7647_v55, %v10426_v51 }
 0x3b8   :  { %v7648_v56 = vpop.f32.mrb[196].mxu1 }
 0x3b9   :  { %v7649_v18 = vpop.f32.mrb[197].mxu1 }
 0x3ba   :  { %v7650_v13 = vadd.f32 %v7649_v18, %v7648_v56  ;;  %v7651_v49 = vpop.f32.mrb[198].mxu1 }
 0x3bb   :  { %v7652_v53 = vpop.f32.mrb[199].mxu1 }
 0x3bc   :  { %v10493_v52 = vadd.f32 %v7650_v13, %v10431_v35  ;;  %v7653_v25 = vadd.f32 %v7652_v53, %v7651_v49 }
 0x3be   :  { %v10496_v28 = vadd.f32 %v7653_v25, %v10436_v12 }
 0x3c0   :  { %v7654_v50 = vpop.f32.mrb[200].mxu1 }
 0x3c1   :  { %v7655_v44 = vpop.f32.mrb[201].mxu1 }
 0x3c2   :  { %v7656_v10 = vadd.f32 %v7655_v44, %v7654_v50  ;;  %v7657_v9 = vpop.f32.mrb[202].mxu1 }
 0x3c3   :  { %v7658_v5 = vpop.f32.mrb[203].mxu1 }
 0x3c4   :  { %v10499_v51 = vadd.f32 %v7656_v10, %v10441_v43  ;;  %v7659_v16 = vadd.f32 %v7658_v5, %v7657_v9 }
 0x3c6   :  { %v10502_v27 = vadd.f32 %v7659_v16, %v10446_v24 }
 0x3c8   :  { %v7660_v63 = vpop.f32.mrb[204].mxu1 }
 0x3c9   :  { %v7661_v0 = vpop.f32.mrb[205].mxu1 }
 0x3ca   :  { %v7662_v35 = vadd.f32 %v7661_v0, %v7660_v63  ;;  %v7663_v34 = vpop.f32.mrb[206].mxu1 }
 0x3cb   :  { %v7664_v47 = vpop.f32.mrb[207].mxu1 }
 0x3cc   :  { %v10505_v12 = vadd.f32 %v7662_v35, %v10451_v62  ;;  %v7665_v11 = vadd.f32 %v7664_v47, %v7663_v34 }
 0x3ce   :  { %v10508_v42 = vadd.f32 %v7665_v11, %v10456_v33 }
 0x3d0   :  { %v7666_v26 = vpop.f32.mrb[208].mxu1 }
 0x3d1   :  { %v7667_v20 = vpop.f32.mrb[209].mxu1 }
 0x3d2   :  { %v7668_v43 = vadd.f32 %v7667_v20, %v7666_v26  ;;  %v7669_v22 = vpop.f32.mrb[210].mxu1 }
 0x3d3   :  { %v7670_v40 = vpop.f32.mrb[211].mxu1 }
 0x3d4   :  { %v10511_v24 = vadd.f32 %v7668_v43, %v10461_v59  ;;  %v7671_v21 = vadd.f32 %v7670_v40, %v7669_v22 }
 0x3d6   :  { %v10514_v15 = vadd.f32 %v7671_v21, %v10466_v41 }
 0x3d8   :  { %v7672_v17 = vpop.f32.mrb[212].mxu1 }
 0x3d9   :  { %v7673_v36 = vpop.f32.mrb[213].mxu1 }
 0x3da   :  { %v7674_v62 = vadd.f32 %v7673_v36, %v7672_v17  ;;  %v7675_v19 = vpop.f32.mrb[214].mxu1 }
 0x3db   :  { %v7676_v8 = vpop.f32.mrb[215].mxu1 }
 0x3dc   :  { %v10517_v33 = vadd.f32 %v7674_v62, %v10469_v31  ;;  %v7677_v45 = vadd.f32 %v7676_v8, %v7675_v19 }
 0x3de   :  { %v10520_v61 = vadd.f32 %v7677_v45, %v10472_v39 }
 0x3e0   :  { %v7678_v29 = vpop.f32.mrb[216].mxu1 }
 0x3e1   :  { %v7679_v1 = vpop.f32.mrb[217].mxu1 }
 0x3e2   :  { %v7680_v59 = vadd.f32 %v7679_v1, %v7678_v29  ;;  %v7681_v2 = vpop.f32.mrb[218].mxu1 }
 0x3e3   :  { %v7682_v60 = vpop.f32.mrb[219].mxu1 }
 0x3e4   :  { %v10523_v41 = vadd.f32 %v7680_v59, %v10475_v3  ;;  %v7683_v54 = vadd.f32 %v7682_v60, %v7681_v2 }
 0x3e6   :  { %v10526_v58 = vadd.f32 %v7683_v54, %v10478_v30 }
 0x3e8   :  { %v7684_v4 = vpop.f32.mrb[220].mxu1 }
 0x3e9   :  { %v7685_v37 = vpop.f32.mrb[221].mxu1 }
 0x3ea   :  { %v7686_v31 = vadd.f32 %v7685_v37, %v7684_v4  ;;  %v7687_v32 = vpop.f32.mrb[222].mxu1 }
 0x3eb   :  { %v7688_v48 = vpop.f32.mrb[223].mxu1 }
 0x3ec   :  { %v10529_v39 = vadd.f32 %v7686_v31, %v10481_v6  ;;  %v7689_v55 = vadd.f32 %v7688_v48, %v7687_v32 }
 0x3ee   :  { %v10532_v56 = vadd.f32 %v7689_v55, %v10484_v46 }
 0x3f0   :  { %v7706_v18 = vpop.f32.mrb[224].mxu1 }
 0x3f1   :  { %v7707_v13 = vpop.f32.mrb[225].mxu1 }
 0x3f2   :  { %v7708_v3 = vadd.f32 %v7707_v13, %v7706_v18  ;;  %v7709_v49 = vpop.f32.mrb[226].mxu1 }
 0x3f3   :  { %v7710_v53 = vpop.f32.mrb[227].mxu1 }
 0x3f4   :  { %v10535_v30 = vadd.f32 %v7708_v3, %v10487_v14  ;;  %v7711_v25 = vadd.f32 %v7710_v53, %v7709_v49 }
 0x3f6   :  { %v10538_v50 = vadd.f32 %v7711_v25, %v10490_v38 }
 0x3f8   :  { %v7712_v44 = vpop.f32.mrb[228].mxu1 }
 0x3f9   :  { %v7713_v10 = vpop.f32.mrb[229].mxu1 }
 0x3fa   :  { %v7714_v6 = vadd.f32 %v7713_v10, %v7712_v44  ;;  %v7715_v9 = vpop.f32.mrb[230].mxu1  ;;  %v10581_v44 = vrot.slane %v10312_v57, %v9659_v7 }
 0x3fb   :  { %v7716_v5 = vpop.f32.mrb[231].mxu1 }
 0x3fc   :  { %v10541_v46 = vadd.f32 %v7714_v6, %v10493_v52  ;;  %v7717_v16 = vadd.f32 %v7716_v5, %v7715_v9 }
 0x3fe   :  { %v10544_v63 = vadd.f32 %v7717_v16, %v10496_v28 }
 0x400   :  { %v7718_v0 = vpop.f32.mrb[232].mxu1 }
 0x401   :  { %v7719_v35 = vpop.f32.mrb[233].mxu1 }
 0x402   :  { %v7720_v14 = vadd.f32 %v7719_v35, %v7718_v0  ;;  %v7721_v34 = vpop.f32.mrb[234].mxu1 }
 0x403   :  { %v7722_v47 = vpop.f32.mrb[235].mxu1 }
 0x404   :  { %v10547_v38 = vadd.f32 %v7720_v14, %v10499_v51  ;;  %v7723_v11 = vadd.f32 %v7722_v47, %v7721_v34 }
 0x406   :  { %v10550_v26 = vadd.f32 %v7723_v11, %v10502_v27 }
 0x408   :  { %v7724_v20 = vpop.f32.mrb[236].mxu1 }
 0x409   :  { %v7725_v43 = vpop.f32.mrb[237].mxu1 }
 0x40a   :  { %v7726_v52 = vadd.f32 %v7725_v43, %v7724_v20  ;;  %v7727_v22 = vpop.f32.mrb[238].mxu1 }
 0x40b   :  { %v7728_v40 = vpop.f32.mrb[239].mxu1 }
 0x40c   :  { %v10553_v28 = vadd.f32 %v7726_v52, %v10505_v12  ;;  %v7729_v21 = vadd.f32 %v7728_v40, %v7727_v22 }
 0x40e   :  { %v10556_v17 = vadd.f32 %v7729_v21, %v10508_v42 }
 0x410   :  { %v7730_v36 = vpop.f32.mrb[240].mxu1 }
 0x411   :  { %v7731_v62 = vpop.f32.mrb[241].mxu1 }
 0x412   :  { %v7732_v51 = vadd.f32 %v7731_v62, %v7730_v36  ;;  %v7733_v19 = vpop.f32.mrb[242].mxu1 }
 0x413   :  { %v7734_v8 = vpop.f32.mrb[243].mxu1 }
 0x414   :  { %v10559_v27 = vadd.f32 %v7732_v51, %v10511_v24  ;;  %v7735_v45 = vadd.f32 %v7734_v8, %v7733_v19 }
 0x416   :  { %v10562_v29 = vadd.f32 %v7735_v45, %v10514_v15 }
 0x418   :  { %v7736_v1 = vpop.f32.mrb[244].mxu1 }
 0x419   :  { %v7737_v59 = vpop.f32.mrb[245].mxu1 }
 0x41a   :  { %v7738_v12 = vadd.f32 %v7737_v59, %v7736_v1  ;;  %v7739_v2 = vpop.f32.mrb[246].mxu1 }
 0x41b   :  { %v7740_v60 = vpop.f32.mrb[247].mxu1 }
 0x41c   :  { %v10565_v42 = vadd.f32 %v7738_v12, %v10517_v33  ;;  %v7741_v54 = vadd.f32 %v7740_v60, %v7739_v2 }
 0x41e   :  { %v10568_v4 = vadd.f32 %v7741_v54, %v10520_v61 }
 0x420   :  { %v7742_v37 = vpop.f32.mrb[248].mxu1 }
 0x421   :  { %v7743_v31 = vpop.f32.mrb[249].mxu1 }
 0x422   :  { %v7744_v24 = vadd.f32 %v7743_v31, %v7742_v37  ;;  %v7745_v32 = vpop.f32.mrb[250].mxu1 }
 0x423   :  { %v7746_v48 = vpop.f32.mrb[251].mxu1 }
 0x424   :  { %v10571_v15 = vadd.f32 %v7744_v24, %v10523_v41  ;;  %v7747_v55 = vadd.f32 %v7746_v48, %v7745_v32 }
 0x426   :  { %v10574_v18 = vadd.f32 %v7747_v55, %v10526_v58  ;;  %v10588_v58 = vrot.slane %v10312_v57, %v9665_v23 }
 0x428   :  { %v7748_v13 = vpop.f32.mrb[252].mxu1 }
 0x429   :  { %v7749_v3 = vpop.f32.mrb[253].mxu1 }
 0x42a   :  { %v7750_v33 = vadd.f32 %v7749_v3, %v7748_v13  ;;  %v7751_v49 = vpop.f32.mrb[254].mxu1 }
 0x42b   :  { %v7752_v53 = vpop.f32.mrb[255].mxu1 }
 0x42c   :  { %v10577_v61 = vadd.f32 %v7750_v33, %v10529_v39  ;;  %v7753_v25 = vadd.f32 %v7752_v53, %v7751_v49 }
 0x42e   :  { %v10584_v41 = vadd.f32 %v7753_v25, %v10532_v56 }
 0x430   :  { %v6130_v10 = vpop.f32.mrb[96].mxu0  ;;  %v7770_v6 = vpop.f32.mrb[0].mxu1 }
 0x431   :  { %v8010_v9 = vadd.f32 %v6130_v10, %v10581_v44  ;;  %v6132_v5 = vpop.f32.mrb[97].mxu0  ;;  %v7771_v16 = vpop.f32.mrb[1].mxu1 }
 0x432   :  { %v8011_v39 = vadd.f32 %v6132_v5, %v10588_v58  ;;  %v7772_v0 = vadd.f32 %v7771_v16, %v7770_v6  ;;  %v6134_v35 = vpop.f32.mrb[98].mxu0  ;;  %v7773_v14 = vpop.f32.mrb[2].mxu1 }
 0x433   :  { %6791 = vst [vmem:[#allocation11] sm:$0xff] %v8010_v9  ;;  %v8012_v7 = vadd.f32 %v6134_v35, %v10581_v44  ;;  %v6136_v56 = vpop.f32.mrb[99].mxu0  ;;  %v7774_v34 = vpop.f32.mrb[3].mxu1 }
 0x434   :  { %6792 = vst [vmem:[#allocation11 + $0x8] sm:$0xff] %v8011_v39  ;;  %v6729_v23 = vadd.f32 %v7772_v0, %v10535_v30  ;;  %v8013_v57 = vadd.f32 %v6136_v56, %v10588_v58  ;;  %v7775_v47 = vadd.f32 %v7774_v34, %v7773_v14 }
 0x435   :  { %6794 = vst [vmem:[#allocation11 + $0x18] sm:$0xff] %v8012_v7 }
 0x436   :  { %6793 = vst [vmem:[#allocation11 + $0x10] sm:$0xff] %v6729_v23  ;;  %6795 = vst [vmem:[#allocation11 + $0x20] sm:$0xff] %v8013_v57  ;;  %v6732_v11 = vadd.f32 %v7775_v47, %v10538_v50 }
 0x438   :  { %6796 = vst [vmem:[#allocation11 + $0x28] sm:$0xff] %v6732_v11  ;;  %v6140_v20 = vpop.f32.mrb[100].mxu0  ;;  %v7776_v43 = vpop.f32.mrb[4].mxu1 }
 0x439   :  { %v8014_v52 = vadd.f32 %v6140_v20, %v10581_v44  ;;  %v6142_v22 = vpop.f32.mrb[101].mxu0  ;;  %v7777_v40 = vpop.f32.mrb[5].mxu1 }
 0x43a   :  { %v8015_v21 = vadd.f32 %v6142_v22, %v10588_v58  ;;  %v7778_v36 = vadd.f32 %v7777_v40, %v7776_v43  ;;  %v6144_v62 = vpop.f32.mrb[102].mxu0  ;;  %v7779_v30 = vpop.f32.mrb[6].mxu1 }
 0x43b   :  { %6797 = vst [vmem:[#allocation11 + $0x30] sm:$0xff] %v8014_v52  ;;  %v8016_v51 = vadd.f32 %v6144_v62, %v10581_v44  ;;  %v6146_v19 = vpop.f32.mrb[103].mxu0  ;;  %v7780_v8 = vpop.f32.mrb[7].mxu1 }
 0x43c   :  { %6798 = vst [vmem:[#allocation11 + $0x38] sm:$0xff] %v8015_v21  ;;  %v6737_v50 = vadd.f32 %v7778_v36, %v10541_v46  ;;  %v8017_v45 = vadd.f32 %v6146_v19, %v10588_v58  ;;  %v7781_v1 = vadd.f32 %v7780_v8, %v7779_v30 }
 0x43d   :  { %6800 = vst [vmem:[#allocation11 + $0x48] sm:$0xff] %v8016_v51 }
 0x43e   :  { %6799 = vst [vmem:[#allocation11 + $0x40] sm:$0xff] %v6737_v50  ;;  %6801 = vst [vmem:[#allocation11 + $0x50] sm:$0xff] %v8017_v45  ;;  %v6740_v59 = vadd.f32 %v7781_v1, %v10544_v63 }
 0x440   :  { %6802 = vst [vmem:[#allocation11 + $0x58] sm:$0xff] %v6740_v59  ;;  %v6150_v12 = vpop.f32.mrb[104].mxu0  ;;  %v7782_v2 = vpop.f32.mrb[8].mxu1 }
 0x441   :  { %v8018_v60 = vadd.f32 %v6150_v12, %v10581_v44  ;;  %v6152_v54 = vpop.f32.mrb[105].mxu0  ;;  %v7783_v37 = vpop.f32.mrb[9].mxu1 }
 0x442   :  { %v8019_v31 = vadd.f32 %v6152_v54, %v10588_v58  ;;  %v7784_v24 = vadd.f32 %v7783_v37, %v7782_v2  ;;  %v6154_v32 = vpop.f32.mrb[106].mxu0  ;;  %v7785_v46 = vpop.f32.mrb[10].mxu1 }
 0x443   :  { %6803 = vst [vmem:[#allocation11 + $0x60] sm:$0xff] %v8018_v60  ;;  %v8020_v48 = vadd.f32 %v6154_v32, %v10581_v44  ;;  %v6156_v55 = vpop.f32.mrb[107].mxu0  ;;  %v7786_v13 = vpop.f32.mrb[11].mxu1 }
 0x444   :  { %6804 = vst [vmem:[#allocation11 + $0x68] sm:$0xff] %v8019_v31  ;;  %v6745_v63 = vadd.f32 %v7784_v24, %v10547_v38  ;;  %v8021_v3 = vadd.f32 %v6156_v55, %v10588_v58  ;;  %v7787_v33 = vadd.f32 %v7786_v13, %v7785_v46 }
 0x445   :  { %6806 = vst [vmem:[#allocation11 + $0x78] sm:$0xff] %v8020_v48 }
 0x446   :  { %6805 = vst [vmem:[#allocation11 + $0x70] sm:$0xff] %v6745_v63  ;;  %6807 = vst [vmem:[#allocation11 + $0x80] sm:$0xff] %v8021_v3  ;;  %v6748_v49 = vadd.f32 %v7787_v33, %v10550_v26 }
 0x448   :  { %6808 = vst [vmem:[#allocation11 + $0x88] sm:$0xff] %v6748_v49  ;;  %v6160_v53 = vpop.f32.mrb[108].mxu0  ;;  %v7788_v25 = vpop.f32.mrb[12].mxu1 }
 0x449   :  { %v8022_v10 = vadd.f32 %v6160_v53, %v10581_v44  ;;  %v6162_v6 = vpop.f32.mrb[109].mxu0  ;;  %v7789_v9 = vpop.f32.mrb[13].mxu1 }
 0x44a   :  { %v8023_v5 = vadd.f32 %v6162_v6, %v10588_v58  ;;  %v7790_v16 = vadd.f32 %v7789_v9, %v7788_v25  ;;  %v6164_v39 = vpop.f32.mrb[110].mxu0  ;;  %v7791_v38 = vpop.f32.mrb[14].mxu1 }
 0x44b   :  { %6809 = vst [vmem:[#allocation11 + $0x90] sm:$0xff] %v8022_v10  ;;  %v8024_v0 = vadd.f32 %v6164_v39, %v10581_v44  ;;  %v6166_v35 = vpop.f32.mrb[111].mxu0  ;;  %v7792_v14 = vpop.f32.mrb[15].mxu1 }
 0x44c   :  { %6810 = vst [vmem:[#allocation11 + $0x98] sm:$0xff] %v8023_v5  ;;  %v6753_v26 = vadd.f32 %v7790_v16, %v10553_v28  ;;  %v8025_v7 = vadd.f32 %v6166_v35, %v10588_v58  ;;  %v7793_v56 = vadd.f32 %v7792_v14, %v7791_v38 }
 0x44d   :  { %6812 = vst [vmem:[#allocation11 + $0xa8] sm:$0xff] %v8024_v0 }
 0x44e   :  { %6811 = vst [vmem:[#allocation11 + $0xa0] sm:$0xff] %v6753_v26  ;;  %6813 = vst [vmem:[#allocation11 + $0xb0] sm:$0xff] %v8025_v7  ;;  %v6756_v34 = vadd.f32 %v7793_v56, %v10556_v17 }
 0x450   :  { %6814 = vst [vmem:[#allocation11 + $0xb8] sm:$0xff] %v6756_v34  ;;  %v6170_v23 = vpop.f32.mrb[112].mxu0  ;;  %v7794_v57 = vpop.f32.mrb[16].mxu1 }
 0x451   :  { %v8026_v47 = vadd.f32 %v6170_v23, %v10581_v44  ;;  %v6172_v11 = vpop.f32.mrb[113].mxu0  ;;  %v7795_v20 = vpop.f32.mrb[17].mxu1 }
 0x452   :  { %v8027_v43 = vadd.f32 %v6172_v11, %v10588_v58  ;;  %v7796_v52 = vadd.f32 %v7795_v20, %v7794_v57  ;;  %v6174_v22 = vpop.f32.mrb[114].mxu0  ;;  %v7797_v28 = vpop.f32.mrb[18].mxu1 }
 0x453   :  { %6815 = vst [vmem:[#allocation11 + $0xc0] sm:$0xff] %v8026_v47  ;;  %v8028_v40 = vadd.f32 %v6174_v22, %v10581_v44  ;;  %v6176_v21 = vpop.f32.mrb[115].mxu0  ;;  %v7798_v36 = vpop.f32.mrb[19].mxu1 }
 0x454   :  { %6816 = vst [vmem:[#allocation11 + $0xc8] sm:$0xff] %v8027_v43  ;;  %v6761_v17 = vadd.f32 %v7796_v52, %v10559_v27  ;;  %v8029_v62 = vadd.f32 %v6176_v21, %v10588_v58  ;;  %v7799_v30 = vadd.f32 %v7798_v36, %v7797_v28 }
 0x455   :  { %6818 = vst [vmem:[#allocation11 + $0xd8] sm:$0xff] %v8028_v40 }
 0x456   :  { %6817 = vst [vmem:[#allocation11 + $0xd0] sm:$0xff] %v6761_v17  ;;  %6819 = vst [vmem:[#allocation11 + $0xe0] sm:$0xff] %v8029_v62  ;;  %v6764_v51 = vadd.f32 %v7799_v30, %v10562_v29 }
 0x458   :  { %6820 = vst [vmem:[#allocation11 + $0xe8] sm:$0xff] %v6764_v51  ;;  %v6180_v19 = vpop.f32.mrb[116].mxu0  ;;  %v7800_v8 = vpop.f32.mrb[20].mxu1 }
 0x459   :  { %v8030_v50 = vadd.f32 %v6180_v19, %v10581_v44  ;;  %v6182_v45 = vpop.f32.mrb[117].mxu0  ;;  %v7801_v1 = vpop.f32.mrb[21].mxu1 }
 0x45a   :  { %v8031_v59 = vadd.f32 %v6182_v45, %v10588_v58  ;;  %v7802_v12 = vadd.f32 %v7801_v1, %v7800_v8  ;;  %v6184_v2 = vpop.f32.mrb[118].mxu0  ;;  %v7803_v27 = vpop.f32.mrb[22].mxu1 }
 0x45b   :  { %6821 = vst [vmem:[#allocation11 + $0xf0] sm:$0xff] %v8030_v50  ;;  %v8032_v60 = vadd.f32 %v6184_v2, %v10581_v44  ;;  %v6186_v54 = vpop.f32.mrb[119].mxu0  ;;  %v7804_v37 = vpop.f32.mrb[23].mxu1 }
 0x45c   :  { %6822 = vst [vmem:[#allocation11 + $0xf8] sm:$0xff] %v8031_v59  ;;  %v6769_v29 = vadd.f32 %v7802_v12, %v10565_v42  ;;  %v8033_v31 = vadd.f32 %v6186_v54, %v10588_v58  ;;  %v7805_v24 = vadd.f32 %v7804_v37, %v7803_v27 }
 0x45d   :  { %6824 = vst [vmem:[#allocation11 + $0x108] sm:$0xff] %v8032_v60 }
 0x45e   :  { %6823 = vst [vmem:[#allocation11 + $0x100] sm:$0xff] %v6769_v29  ;;  %6825 = vst [vmem:[#allocation11 + $0x110] sm:$0xff] %v8033_v31  ;;  %v6772_v32 = vadd.f32 %v7805_v24, %v10568_v4 }
 0x460   :  { %6826 = vst [vmem:[#allocation11 + $0x118] sm:$0xff] %v6772_v32  ;;  %v6190_v46 = vpop.f32.mrb[120].mxu0  ;;  %v7806_v48 = vpop.f32.mrb[24].mxu1 }
 0x461   :  { %v8034_v55 = vadd.f32 %v6190_v46, %v10581_v44  ;;  %v6192_v13 = vpop.f32.mrb[121].mxu0  ;;  %v7807_v63 = vpop.f32.mrb[25].mxu1 }
 0x462   :  { %v8035_v3 = vadd.f32 %v6192_v13, %v10588_v58  ;;  %v7808_v33 = vadd.f32 %v7807_v63, %v7806_v48  ;;  %v6194_v49 = vpop.f32.mrb[122].mxu0  ;;  %v7809_v42 = vpop.f32.mrb[26].mxu1 }
 0x463   :  { %6827 = vst [vmem:[#allocation11 + $0x120] sm:$0xff] %v8034_v55  ;;  %v8036_v53 = vadd.f32 %v6194_v49, %v10581_v44  ;;  %v6196_v25 = vpop.f32.mrb[123].mxu0  ;;  %v7810_v10 = vpop.f32.mrb[27].mxu1 }
 0x464   :  { %6828 = vst [vmem:[#allocation11 + $0x128] sm:$0xff] %v8035_v3  ;;  %v6777_v4 = vadd.f32 %v7808_v33, %v10571_v15  ;;  %v8037_v6 = vadd.f32 %v6196_v25, %v10588_v58  ;;  %v7811_v9 = vadd.f32 %v7810_v10, %v7809_v42 }
 0x465   :  { %6830 = vst [vmem:[#allocation11 + $0x138] sm:$0xff] %v8036_v53 }
 0x466   :  { %6829 = vst [vmem:[#allocation11 + $0x130] sm:$0xff] %v6777_v4  ;;  %6831 = vst [vmem:[#allocation11 + $0x140] sm:$0xff] %v8037_v6  ;;  %v6780_v5 = vadd.f32 %v7811_v9, %v10574_v18 }
 0x468   :  { %6832 = vst [vmem:[#allocation11 + $0x148] sm:$0xff] %v6780_v5  ;;  %v6200_v16 = vpop.f32.mrb[124].mxu0  ;;  %v7812_v39 = vpop.f32.mrb[28].mxu1 }
 0x469   :  { %v8038_v38 = vadd.f32 %v6200_v16, %v10581_v44  ;;  %v6202_v0 = vpop.f32.mrb[125].mxu0  ;;  %v7813_v35 = vpop.f32.mrb[29].mxu1 }
 0x46a   :  { %v8039_v14 = vadd.f32 %v6202_v0, %v10588_v58  ;;  %v7814_v26 = vadd.f32 %v7813_v35, %v7812_v39  ;;  %v6204_v7 = vpop.f32.mrb[126].mxu0  ;;  %v7815_v15 = vpop.f32.mrb[30].mxu1 }
 0x46b   :  { %6833 = vst [vmem:[#allocation11 + $0x150] sm:$0xff] %v8038_v38  ;;  %v8040_v56 = vadd.f32 %v6204_v7, %v10581_v44  ;;  %v6206_v34 = vpop.f32.mrb[127].mxu0  ;;  %v7816_v23 = vpop.f32.mrb[31].mxu1 }
 0x46c   :  { %6834 = vst [vmem:[#allocation11 + $0x158] sm:$0xff] %v8039_v14  ;;  %v6785_v18 = vadd.f32 %v7814_v26, %v10577_v61  ;;  %v8041_v57 = vadd.f32 %v6206_v34, %v10588_v58  ;;  %v7817_v47 = vadd.f32 %v7816_v23, %v7815_v15 }
 0x46d   :  { %6836 = vst [vmem:[#allocation11 + $0x168] sm:$0xff] %v8040_v56 }
 0x46e   :  { %6835 = vst [vmem:[#allocation11 + $0x160] sm:$0xff] %v6785_v18  ;;  %6837 = vst [vmem:[#allocation11 + $0x170] sm:$0xff] %v8041_v57  ;;  %v6788_v11 = vadd.f32 %v7817_v47, %v10584_v41 }
 0x470   :  { %6838 = vst [vmem:[#allocation11 + $0x178] sm:$0xff] %v6788_v11 }
 0x471   :  { %9345 = shalt.err (!%p9342_p2)
}
 0x472   :  { %s9346_s10 = scalar_lea.hbm %s10658_s5, 6144 }
 0x473   :  { %p9347_p3 = scmp.ne.s32.totalorder %s10658_s5, %s9346_s10  ;;  %p9350_p4 = scmp.lt.u32.totalorder %s9346_s10, %s10658_s5 }
 0x475   :  { %p9352_p5 = pnand %p9350_p4, %p9347_p3 }
 0x477   :  { %9355 = shalt.err (!%p9352_p5)
}
 0x478   :  { %6850 = dma.vmem_to_hbm [thread:$0]  %s6845_s6, 6144, %s10658_s5, [#allocation4], %s9371_s3, %s9371_s3, %s9372_s30  }
 0x479   :  { %9362 = dma.done.wait [#allocation4], 6144  }
 0x47a   :  { %9363 = vsyncadd [#allocation4], 4294961152 }
 0x47b   :  { %6854 = vsyncpa [#allocation3], 1 }
 0x47c   :  { %6855 = vsyncpa [#allocation6], 1 }
 0x47d   :  { %6856 = vsyncpa [#allocation9], 1 }
 0x47e   :  { %6857 = vsyncpa [#allocation4], 1 }

</bundles_post_ra>
